<compile_context>
chip_gen: v5e
topology: v5e:2x2
jax: 0.10.0
libtpu: 0.0.40
codegen_flags: <defaults>
</compile_context>

<pallas_src>
import functools

import jax
import jax.numpy as jnp
from jax import lax
from jax.experimental import pallas as pl
from jax.experimental.pallas import tpu as pltpu


def _round_up(a, b):
    return (a + b - 1) // b * b


# ------------------------------- kernels ------------------------------------


def _gemm_stats_kernel(p_ref, w_ref, o_ref, st_ref, acc_ref):
    """Im2col GEMM tile of the transposed conv + per-tile BN partial stats.

    grid = (m_tiles, k_tiles)
    p_ref: (tm, tk) patches, w_ref: (tk, Coutp), o_ref: (tm, Coutp) conv out,
    st_ref: (1, 2, Coutp) per-tile [sum, sum-of-squares] (reduced on host),
    acc_ref: (tm, Coutp) f32 accumulator.
    """
    k = pl.program_id(1)

    @pl.when(k == 0)
    def _():
        acc_ref[...] = jnp.zeros_like(acc_ref)

    acc_ref[...] += jnp.dot(p_ref[...], w_ref[...],
                            preferred_element_type=jnp.float32)

    @pl.when(k == pl.num_programs(1) - 1)
    def _():
        acc = acc_ref[...]
        o_ref[...] = acc.astype(o_ref.dtype)
        st_ref[0:1, 0:1, :] = jnp.sum(acc, axis=0, keepdims=True)[None]
        st_ref[0:1, 1:2, :] = jnp.sum(acc * acc, axis=0, keepdims=True)[None]


def _se_gap_kernel(conv_ref, prm_ref, gap_ref, *, tile_m, m_valid):
    """Per-image global-average-pool numerator of PReLU(BN(conv)).

    grid = (N, tiles_per_img); gap_ref (1, 8, Coutp) is resident per image
    (sublane 0 holds the running sum).  BN+PReLU are recomputed here so the
    activated tensor never round-trips through HBM.
    """
    i = pl.program_id(1)

    @pl.when(i == 0)
    def _():
        gap_ref[...] = jnp.zeros_like(gap_ref)

    y = conv_ref[...] * prm_ref[0:1, :] + prm_ref[1:2, :]
    y = jnp.where(y >= 0.0, y, prm_ref[2:3, :] * y)
    row = i * tile_m + lax.broadcasted_iota(jnp.int32, (tile_m, 1), 0)
    y = jnp.where(row < m_valid, y, 0.0)          # mask per-image row padding
    gap_ref[0:1, 0:1, :] += jnp.sum(y, axis=0, keepdims=True)[None]


def _bn_act_gate_kernel(conv_ref, prm_ref, gate_ref, o_ref):
    """Fused BN (affine) + PReLU + SE channel gating; the tile is written
    transposed so the kernel output is already in (N, C, H*W) layout."""
    y = conv_ref[...] * prm_ref[0:1, :] + prm_ref[1:2, :]
    y = jnp.where(y >= 0.0, y, prm_ref[2:3, :] * y)
    y = y * gate_ref[0]                           # (tm, Coutp) * (1, Coutp)
    o_ref[...] = jnp.transpose(y, (1, 0))[None].astype(o_ref.dtype)


# ------------------------------ JAX glue -------------------------------------


def _deconv_patches(x, kh, kw, stride, padding, output_padding):
    """ConvTranspose2d -> equivalent stride-1 conv on a zero-dilated, padded
    input, expressed as im2col patches (NHWC: channels on the lane axis)."""
    N, Cin, H, W = x.shape
    sh, sw = stride
    ph, pw = padding
    oph, opw = output_padding
    Hout = (H - 1) * sh - 2 * ph + kh + oph
    Wout = (W - 1) * sw - 2 * pw + kw + opw
    Hd, Wd = (H - 1) * sh + 1, (W - 1) * sw + 1
    pt, pb = kh - 1 - ph, kh - 1 - ph + oph
    pf, pr = kw - 1 - pw, kw - 1 - pw + opw
    # TODO(synk): padding > kernel_size-1 would require cropping the dilated input.
    assert pt >= 0 and pf >= 0, "padding > kernel_size - 1 not supported"

    xh = jnp.transpose(x, (0, 2, 3, 1))                         # NHWC
    xd = jnp.zeros((N, Hd + pt + pb, Wd + pf + pr, Cin), x.dtype)
    xd = xd.at[:, pt:pt + Hd:sh, pf:pf + Wd:sw, :].set(xh)      # dilate+pad in one op
    cols = [xd[:, i:i + Hout, j:j + Wout, :]
            for i in range(kh) for j in range(kw)]
    patches = jnp.concatenate(cols, axis=-1)                    # (N, Ho, Wo, kh*kw*Cin)
    return patches.reshape(N, Hout * Wout, kh * kw * Cin), Hout, Wout


@functools.partial(jax.jit, static_argnames=(
    "stride", "padding", "output_padding", "use_se", "eps",
    "tile_m", "tile_k", "compute_dtype"))
def deconv_bn_act_forward(x, weight, gamma, beta, prelu_alpha, se_w1, se_w2, *,
                          stride=(2, 2), padding=(1, 1), output_padding=(1, 1),
                          use_se=True, eps=1e-5, tile_m=512, tile_k=512,
                          compute_dtype=jnp.float32):
    """Forward of Deconv_BN_ACT.

    x: (N, Cin, H, W);  weight: (Cin, Cout, kh, kw)  [ConvTranspose2d layout];
    gamma/beta/prelu_alpha: (Cout,);  se_w1: (Cout//r, Cout);  se_w2: (Cout, Cout//r).
    Returns (N, Cout, Hout, Wout) in x.dtype.
    """
    # TODO(synk): groups > 1 and bias=True are not implemented (module uses
    # groups=1, bias=False).
    N, Cin, H, W = x.shape
    _, Cout, kh, kw = weight.shape

    patches, Hout, Wout = _deconv_patches(x, kh, kw, stride, padding, output_padding)
    K = Cin * kh * kw
    Mimg = Hout * Wout

    # ---- generation-agnostic tile sizing (well under v7x's 64 MiB VMEM) -----
    tile_m = max(128, (int(tile_m) // 128) * 128)
    tile_k = max(128, (int(tile_k) // 128) * 128)
    tm = tile_m if Mimg >= tile_m else _round_up(Mimg, 8)
    Mimg_p = _round_up(Mimg, tm)
    tpi = Mimg_p // tm                              # row tiles per image
    K8 = _round_up(K, 8)
    if K8 <= tile_k:
        tk, Kp = K8, K8
    else:
        tk, Kp = tile_k, _round_up(K, tile_k)
    k_tiles = Kp // tk
    Coutp = _round_up(Cout, 128)                    # lane-dense output channels
    m_tiles = N * tpi

    patches = jnp.pad(patches, ((0, 0), (0, Mimg_p - Mimg), (0, Kp - K)))
    patches = patches.reshape(N * Mimg_p, Kp).astype(compute_dtype)

    # ConvTranspose weight -> equivalent forward-conv GEMM weight:
    #   w2d[(i*kw+j)*Cin + cin, cout] = weight[cin, cout, kh-1-i, kw-1-j]
    w2d = jnp.flip(weight, (2, 3)).transpose(2, 3, 0, 1).reshape(K, Cout)
    w2d = jnp.pad(w2d, ((0, Kp - K), (0, Coutp - Cout))).astype(compute_dtype)

    # ---- pass 1: GEMM (deconv) + per-tile BN partial statistics --------------
    conv2d, stats = pl.pallas_call(
        _gemm_stats_kernel,
        out_shape=(jax.ShapeDtypeStruct((N * Mimg_p, Coutp), jnp.float32),
                   jax.ShapeDtypeStruct((m_tiles, 2, Coutp), jnp.float32)),
        grid=(m_tiles, k_tiles),
        in_specs=[pl.BlockSpec((tm, tk), lambda i, k: (i, k)),
                  pl.BlockSpec((tk, Coutp), lambda i, k: (k, 0))],
        out_specs=(pl.BlockSpec((tm, Coutp), lambda i, k: (i, 0)),
                   pl.BlockSpec((1, 2, Coutp), lambda i, k: (i, 0, 0))),
        scratch_shapes=[pltpu.VMEM((tm, Coutp), jnp.float32)],
        compiler_params=pltpu.CompilerParams(
            dimension_semantics=("parallel", "arbitrary")),
    )(patches, w2d)

    # ---- BN training-mode statistics (biased variance); tiny host math ------
    cnt = jnp.float32(N * Mimg)
    mean = jnp.sum(stats[:, 0, :], axis=0) / cnt
    var = jnp.maximum(jnp.sum(stats[:, 1, :], axis=0) / cnt - mean * mean, 0.0)
    invstd = lax.rsqrt(var + jnp.float32(eps))
    gamma_p = jnp.pad(gamma.astype(jnp.float32), (0, Coutp - Cout))
    beta_p = jnp.pad(beta.astype(jnp.float32), (0, Coutp - Cout))
    alpha_p = jnp.pad(prelu_alpha.astype(jnp.float32), (0, Coutp - Cout))
    scale = gamma_p * invstd
    shift = beta_p - mean * scale
    prm = jnp.stack([scale, shift, alpha_p], axis=0)            # (3, Coutp)

    # ---- pass 2 (+ tiny FC): SE gate ----------------------------------------
    if use_se:
        gap_part = pl.pallas_call(
            functools.partial(_se_gap_kernel, tile_m=tm, m_valid=Mimg),
            out_shape=jax.ShapeDtypeStruct((N, 8, Coutp), jnp.float32),
            grid=(N, tpi),
            in_specs=[pl.BlockSpec((tm, Coutp), lambda n, i: (n * tpi + i, 0)),
                      pl.BlockSpec((3, Coutp), lambda n, i: (0, 0))],
            out_specs=pl.BlockSpec((1, 8, Coutp), lambda n, i: (n, 0, 0)),
            compiler_params=pltpu.CompilerParams(
                dimension_semantics=("parallel", "arbitrary")),
        )(conv2d, prm)
        gap = gap_part[:, 0, :Cout] / jnp.float32(Mimg)          # (N, Cout)
        # SE bottleneck FC (C -> C/r -> C): a few hundred FLOPs, left to XLA.
        hid = jnp.maximum(gap @ se_w1.astype(jnp.float32).T, 0.0)
        gate = jax.nn.sigmoid(hid @ se_w2.astype(jnp.float32).T)
        gate_p = jnp.pad(gate, ((0, 0), (0, Coutp - Cout)))[:, None, :]
    else:
        gate_p = jnp.ones((N, 1, Coutp), jnp.float32)

    # ---- pass 3: fused BN + PReLU + SE gating, written transposed -----------
    out_t = pl.pallas_call(
        _bn_act_gate_kernel,
        out_shape=jax.ShapeDtypeStruct((N, Coutp, Mimg_p), x.dtype),
        grid=(N, tpi),
        in_specs=[pl.BlockSpec((tm, Coutp), lambda n, i: (n * tpi + i, 0)),
                  pl.BlockSpec((3, Coutp), lambda n, i: (0, 0)),
                  pl.BlockSpec((1, 1, Coutp), lambda n, i: (n, 0, 0))],
        out_specs=pl.BlockSpec((1, Coutp, tm), lambda n, i: (n, 0, i)),
        compiler_params=pltpu.CompilerParams(
            dimension_semantics=("parallel", "parallel")),
    )(conv2d, prm, gate_p)

    return out_t[:, :Cout, :Mimg].reshape(N, Cout, Hout, Wout)


# ------------------------------ demo / check ---------------------------------

if __name__ == "__main__":
    # Deconv_BN_ACT(in_channels=4, out_channels=8, kernel_size=3, stride=2, use_se=True)
    N, Cin, H, W = 2, 4, 16, 16
    Cout, ksz, s = 8, 3, 2
    ratio = 8
    Cmid = max(Cout // ratio, 1)

    key = jax.random.PRNGKey(0)
    kx, kw_, k1, k2 = jax.random.split(key, 4)
    x = jax.random.normal(kx, (N, Cin, H, W), jnp.float32)
    bound = 1.0 / float(jnp.sqrt(jnp.float32(Cin * ksz * ksz)))
    weight = jax.random.uniform(kw_, (Cin, Cout, ksz, ksz), jnp.float32,
                                minval=-bound, maxval=bound)
    gamma = jnp.ones((Cout,), jnp.float32)
    beta = jnp.zeros((Cout,), jnp.float32)
    alpha = jnp.full((Cout,), 0.25, jnp.float32)        # PReLU default init
    se_w1 = 0.01 * jax.random.normal(k1, (Cmid, Cout), jnp.float32)
    se_w2 = 0.01 * jax.random.normal(k2, (Cout, Cmid), jnp.float32)

    out = deconv_bn_act_forward(
        x, weight, gamma, beta, alpha, se_w1, se_w2,
        stride=(s, s), padding=(ksz // 2, ksz // 2), output_padding=(1, 1),
        use_se=True, eps=1e-5)
    out = jax.block_until_ready(out)

    # ---- pure-JAX reference of the PyTorch forward ---------------------------
    ph = pw = ksz // 2
    w_oihw = jnp.flip(weight, (2, 3)).transpose(1, 0, 2, 3)     # (Cout, Cin, kh, kw)
    ref_conv = lax.conv_general_dilated(
        x, w_oihw, window_strides=(1, 1),
        padding=((ksz - 1 - ph, ksz - 1 - ph + 1),
                 (ksz - 1 - pw, ksz - 1 - pw + 1)),
        lhs_dilation=(s, s),
        dimension_numbers=("NCHW", "OIHW", "NCHW"))
    mean = ref_conv.mean(axis=(0, 2, 3))
    var = ref_conv.var(axis=(0, 2, 3))
    y = ((ref_conv - mean[None, :, None, None])
         * lax.rsqrt(var + 1e-5)[None, :, None, None]
         * gamma[None, :, None, None] + beta[None, :, None, None])
    y = jnp.where(y >= 0, y, alpha[None, :, None, None] * y)
    gap = y.mean(axis=(2, 3))
    gate = jax.nn.sigmoid(jnp.maximum(gap @ se_w1.T, 0.0) @ se_w2.T)
    ref = y * gate[:, :, None, None]

    assert out.shape == (N, Cout, s * H, s * W), out.shape
    assert jnp.allclose(out, ref, atol=3e-4, rtol=3e-4), \
        float(jnp.max(jnp.abs(out - ref)))

    # bf16 GEMM operands with f32 accumulation (MXU-native path on v6e/v7x);
    # tolerance is loose because the operands themselves are quantized.
    out_bf16 = deconv_bn_act_forward(
        x, weight, gamma, beta, alpha, se_w1, se_w2,
        stride=(s, s), padding=(ksz // 2, ksz // 2), output_padding=(1, 1),
        use_se=True, eps=1e-5, compute_dtype=jnp.bfloat16)
    out_bf16 = jax.block_until_ready(out_bf16)
    assert jnp.allclose(out_bf16, ref, atol=1e-1, rtol=1e-1), \
        float(jnp.max(jnp.abs(out_bf16 - ref)))

    print("KERNEL_OK")
</pallas_src>

<mosaic_0001>
module attributes {stable_mosaic.version = 11 : i64} {
  func.func @_gemm_stats_kernel(%arg0: i32, %arg1: i32, %arg2: memref<512x40xf32, #tpu.memory_space<vmem>>, %arg3: memref<40x128xf32, #tpu.memory_space<vmem>>, %arg4: memref<512x128xf32, #tpu.memory_space<vmem>>, %arg5: memref<1x2x128xf32, #tpu.memory_space<vmem>>, %arg6: memref<512x128xf32, #tpu.memory_space<vmem>>) attributes {dimension_semantics = [#tpu.dimension_semantics<parallel>, #tpu.dimension_semantics<arbitrary>], iteration_bounds = array<i64: 4, 1>, scalar_prefetch = 0 : i64, scratch_operands = 1 : i64, tpu.core_type = #tpu.core_type<tc>, window_params = [{transform_indices = @transform_0, window_bounds = array<i64: 512, 40>}, {transform_indices = @transform_1, window_bounds = array<i64: 40, 128>}, {transform_indices = @transform_2, window_bounds = array<i64: 512, 128>}, {transform_indices = @transform_3, window_bounds = array<i64: 1, 2, 128>}]} {
    %c0_i32 = arith.constant 0 : i32
    %0 = arith.cmpi eq, %arg1, %c0_i32 : i32
    %1 = arith.extui %0 : i1 to i32
    %c0_i32_0 = arith.constant 0 : i32
    %2 = arith.cmpi ne, %1, %c0_i32_0 : i32
    scf.if %2 {
      %cst_10 = arith.constant 0.000000e+00 : f32
      %12 = vector.broadcast %cst_10 : f32 to vector<512x128xf32>
      %c0_11 = arith.constant 0 : index
      %c0_12 = arith.constant 0 : index
      %13 = vector.load %arg6[%c0_11, %c0_12] : memref<512x128xf32, #tpu.memory_space<vmem>>, vector<512x128xf32>
      tpu.vector_store %arg6[%c0_11, %c0_12], %12 {strides = array<i32>} : memref<512x128xf32, #tpu.memory_space<vmem>>, vector<512x128xf32>,
    } else {
    }
    %c0 = arith.constant 0 : index
    %c0_1 = arith.constant 0 : index
    %3 = vector.load %arg6[%c0, %c0_1] : memref<512x128xf32, #tpu.memory_space<vmem>>, vector<512x128xf32>
    %c0_2 = arith.constant 0 : index
    %c0_3 = arith.constant 0 : index
    %4 = vector.load %arg2[%c0_2, %c0_3] : memref<512x40xf32, #tpu.memory_space<vmem>>, vector<512x40xf32>
    %c0_4 = arith.constant 0 : index
    %c0_5 = arith.constant 0 : index
    %5 = vector.load %arg3[%c0_4, %c0_5] : memref<40x128xf32, #tpu.memory_space<vmem>>, vector<40x128xf32>
    %cst = arith.constant dense<0.000000e+00> : vector<512x128xf32>
    %6 = tpu.matmul %4, %5, %cst {dimension_numbers = #tpu.dot_dimension_numbers<[1], [0], [0], [1], [0, 0, 1, 1], [], []>} : vector<512x40xf32>, vector<40x128xf32>, vector<512x128xf32> -> vector<512x128xf32>
    %7 = arith.addf %3, %6 : vector<512x128xf32>
    %c0_6 = arith.constant 0 : index
    %c0_7 = arith.constant 0 : index
    %8 = vector.load %arg6[%c0_6, %c0_7] : memref<512x128xf32, #tpu.memory_space<vmem>>, vector<512x128xf32>
    tpu.vector_store %arg6[%c0_6, %c0_7], %7 {strides = array<i32>} : memref<512x128xf32, #tpu.memory_space<vmem>>, vector<512x128xf32>,
    %c0_i32_8 = arith.constant 0 : i32
    %9 = arith.cmpi eq, %arg1, %c0_i32_8 : i32
    %10 = arith.extui %9 : i1 to i32
    %c0_i32_9 = arith.constant 0 : i32
    %11 = arith.cmpi ne, %10, %c0_i32_9 : i32
    scf.if %11 {
      %c0_10 = arith.constant 0 : index
      %c0_11 = arith.constant 0 : index
      %12 = vector.load %arg6[%c0_10, %c0_11] : memref<512x128xf32, #tpu.memory_space<vmem>>, vector<512x128xf32>
      %c0_12 = arith.constant 0 : index
      %c0_13 = arith.constant 0 : index
      %13 = vector.load %arg4[%c0_12, %c0_13] : memref<512x128xf32, #tpu.memory_space<vmem>>, vector<512x128xf32>
      tpu.vector_store %arg4[%c0_12, %c0_13], %12 {strides = array<i32>} : memref<512x128xf32, #tpu.memory_space<vmem>>, vector<512x128xf32>,
      %cst_14 = arith.constant dense<0.000000e+00> : vector<128xf32>
      %14 = vector.multi_reduction <add>, %12, %cst_14 [0] : vector<512x128xf32> to vector<128xf32>
      %15 = vector.shape_cast %14 : vector<128xf32> to vector<1x128xf32>
      %16 = vector.shape_cast %15 : vector<1x128xf32> to vector<1x1x128xf32>
      %c0_15 = arith.constant 0 : index
      %c0_16 = arith.constant 0 : index
      %c0_17 = arith.constant 0 : index
      %17 = vector.load %arg5[%c0_15, %c0_16, %c0_17] : memref<1x2x128xf32, #tpu.memory_space<vmem>>, vector<1x1x128xf32>
      tpu.vector_store %arg5[%c0_15, %c0_16, %c0_17], %16 {strides = array<i32>} : memref<1x2x128xf32, #tpu.memory_space<vmem>>, vector<1x1x128xf32>,
      %18 = arith.mulf %12, %12 : vector<512x128xf32>
      %cst_18 = arith.constant dense<0.000000e+00> : vector<128xf32>
      %19 = vector.multi_reduction <add>, %18, %cst_18 [0] : vector<512x128xf32> to vector<128xf32>
      %20 = vector.shape_cast %19 : vector<128xf32> to vector<1x128xf32>
      %21 = vector.shape_cast %20 : vector<1x128xf32> to vector<1x1x128xf32>
      %c0_19 = arith.constant 0 : index
      %c1 = arith.constant 1 : index
      %c0_20 = arith.constant 0 : index
      %22 = vector.load %arg5[%c0_19, %c1, %c0_20] : memref<1x2x128xf32, #tpu.memory_space<vmem>>, vector<1x1x128xf32>
      tpu.vector_store %arg5[%c0_19, %c1, %c0_20], %21 {strides = array<i32>} : memref<1x2x128xf32, #tpu.memory_space<vmem>>, vector<1x1x128xf32>,
    } else {
    }
    return
  }
  func.func @transform_0(%arg0: i32, %arg1: i32) -> (i32, i32) {
    %c0_i32 = arith.constant 0 : i32
    return %arg0, %arg1 : i32, i32
  }
  func.func @transform_1(%arg0: i32, %arg1: i32) -> (i32, i32) {
    %c0_i32 = arith.constant 0 : i32
    %c0_i32_0 = arith.constant 0 : i32
    return %arg1, %c0_i32 : i32, i32
  }
  func.func @transform_2(%arg0: i32, %arg1: i32) -> (i32, i32) {
    %c0_i32 = arith.constant 0 : i32
    %c0_i32_0 = arith.constant 0 : i32
    return %arg0, %c0_i32 : i32, i32
  }
  func.func @transform_3(%arg0: i32, %arg1: i32) -> (i32, i32, i32) {
    %c0_i32 = arith.constant 0 : i32
    %c0_i32_0 = arith.constant 0 : i32
    %c0_i32_1 = arith.constant 0 : i32
    return %arg0, %c0_i32, %c0_i32_0 : i32, i32, i32
  }
}

module attributes {stable_mosaic.version = 11 : i64} {
  func.func @_se_gap_kernel(%arg0: i32, %arg1: i32, %arg2: memref<512x128xf32, #tpu.memory_space<vmem>>, %arg3: memref<3x128xf32, #tpu.memory_space<vmem>>, %arg4: memref<1x8x128xf32, #tpu.memory_space<vmem>>) attributes {dimension_semantics = [#tpu.dimension_semantics<parallel>, #tpu.dimension_semantics<arbitrary>], iteration_bounds = array<i64: 2, 2>, scalar_prefetch = 0 : i64, scratch_operands = 0 : i64, tpu.core_type = #tpu.core_type<tc>, window_params = [{transform_indices = @transform_0, window_bounds = array<i64: 512, 128>}, {pipeline_mode = #tpu.pipeline_mode<synchronous>, transform_indices = @transform_1, window_bounds = array<i64: 3, 128>}, {transform_indices = @transform_2, window_bounds = array<i64: 1, 8, 128>}]} {
    %c0_i32 = arith.constant 0 : i32
    %0 = arith.cmpi eq, %arg1, %c0_i32 : i32
    %1 = arith.extui %0 : i1 to i32
    %c0_i32_0 = arith.constant 0 : i32
    %2 = arith.cmpi ne, %1, %c0_i32_0 : i32
    scf.if %2 {
      %cst_14 = arith.constant 0.000000e+00 : f32
      %32 = vector.broadcast %cst_14 : f32 to vector<1x8x128xf32>
      %c0_15 = arith.constant 0 : index
      %c0_16 = arith.constant 0 : index
      %c0_17 = arith.constant 0 : index
      %33 = vector.load %arg4[%c0_15, %c0_16, %c0_17] : memref<1x8x128xf32, #tpu.memory_space<vmem>>, vector<1x8x128xf32>
      tpu.vector_store %arg4[%c0_15, %c0_16, %c0_17], %32 {strides = array<i32>} : memref<1x8x128xf32, #tpu.memory_space<vmem>>, vector<1x8x128xf32>,
    } else {
    }
    %c0 = arith.constant 0 : index
    %c0_1 = arith.constant 0 : index
    %3 = vector.load %arg2[%c0, %c0_1] : memref<512x128xf32, #tpu.memory_space<vmem>>, vector<512x128xf32>
    %c0_2 = arith.constant 0 : index
    %c0_3 = arith.constant 0 : index
    %4 = vector.load %arg3[%c0_2, %c0_3] : memref<3x128xf32, #tpu.memory_space<vmem>>, vector<1x128xf32>
    %5 = vector.broadcast %4 : vector<1x128xf32> to vector<512x128xf32>
    %6 = arith.mulf %3, %5 : vector<512x128xf32>
    %c1 = arith.constant 1 : index
    %c0_4 = arith.constant 0 : index
    %7 = vector.load %arg3[%c1, %c0_4] : memref<3x128xf32, #tpu.memory_space<vmem>>, vector<1x128xf32>
    %8 = vector.broadcast %7 : vector<1x128xf32> to vector<512x128xf32>
    %9 = arith.addf %6, %8 : vector<512x128xf32>
    %cst = arith.constant 0.000000e+00 : f32
    %10 = vector.broadcast %cst : f32 to vector<512x128xf32>
    %11 = arith.cmpf oge, %9, %10 : vector<512x128xf32>
    %c2 = arith.constant 2 : index
    %c0_5 = arith.constant 0 : index
    %12 = vector.load %arg3[%c2, %c0_5] : memref<3x128xf32, #tpu.memory_space<vmem>>, vector<1x128xf32>
    %13 = vector.broadcast %12 : vector<1x128xf32> to vector<512x128xf32>
    %14 = arith.mulf %13, %9 : vector<512x128xf32>
    %15 = arith.select %11, %9, %14 : vector<512x128xi1>, vector<512x128xf32>
    %c512_i32 = arith.constant 512 : i32
    %16 = arith.muli %arg1, %c512_i32 : i32
    %17 = tpu.iota {dimensions = array<i32: 0>} : vector<512x1xi32>
    %18 = vector.broadcast %16 : i32 to vector<512x1xi32>
    %19 = arith.addi %18, %17 : vector<512x1xi32>
    %c1024_i32 = arith.constant 1024 : i32
    %20 = vector.broadcast %c1024_i32 : i32 to vector<512x1xi32>
    %21 = arith.cmpi slt, %19, %20 : vector<512x1xi32>
    %cst_6 = arith.constant 0.000000e+00 : f32
    %22 = vector.shape_cast %21 : vector<512x1xi1> to vector<512x1xi1>
    %23 = vector.broadcast %22 : vector<512x1xi1> to vector<512x128xi1>
    %24 = vector.broadcast %cst_6 : f32 to vector<512x128xf32>
    %25 = arith.select %23, %15, %24 : vector<512x128xi1>, vector<512x128xf32>
    %c0_7 = arith.constant 0 : index
    %c0_8 = arith.constant 0 : index
    %c0_9 = arith.constant 0 : index
    %26 = vector.load %arg4[%c0_7, %c0_8, %c0_9] : memref<1x8x128xf32, #tpu.memory_space<vmem>>, vector<1x1x128xf32>
    %cst_10 = arith.constant dense<0.000000e+00> : vector<128xf32>
    %27 = vector.multi_reduction <add>, %25, %cst_10 [0] : vector<512x128xf32> to vector<128xf32>
    %28 = vector.shape_cast %27 : vector<128xf32> to vector<1x128xf32>
    %29 = vector.shape_cast %28 : vector<1x128xf32> to vector<1x1x128xf32>
    %30 = arith.addf %26, %29 : vector<1x1x128xf32>
    %c0_11 = arith.constant 0 : index
    %c0_12 = arith.constant 0 : index
    %c0_13 = arith.constant 0 : index
    %31 = vector.load %arg4[%c0_11, %c0_12, %c0_13] : memref<1x8x128xf32, #tpu.memory_space<vmem>>, vector<1x1x128xf32>
    tpu.vector_store %arg4[%c0_11, %c0_12, %c0_13], %30 {strides = array<i32>} : memref<1x8x128xf32, #tpu.memory_space<vmem>>, vector<1x1x128xf32>,
    return
  }
  func.func @transform_0(%arg0: i32, %arg1: i32) -> (i32, i32) {
    %c2_i32 = arith.constant 2 : i32
    %0 = arith.muli %arg0, %c2_i32 : i32
    %1 = arith.addi %0, %arg1 : i32
    %c0_i32 = arith.constant 0 : i32
    %c0_i32_0 = arith.constant 0 : i32
    return %1, %c0_i32 : i32, i32
  }
  func.func @transform_1(%arg0: i32, %arg1: i32) -> (i32, i32) {
    %c0_i32 = arith.constant 0 : i32
    %c0_i32_0 = arith.constant 0 : i32
    %c0_i32_1 = arith.constant 0 : i32
    return %c0_i32, %c0_i32_0 : i32, i32
  }
  func.func @transform_2(%arg0: i32, %arg1: i32) -> (i32, i32, i32) {
    %c0_i32 = arith.constant 0 : i32
    %c0_i32_0 = arith.constant 0 : i32
    %c0_i32_1 = arith.constant 0 : i32
    return %arg0, %c0_i32, %c0_i32_0 : i32, i32, i32
  }
}

module attributes {stable_mosaic.version = 11 : i64} {
  func.func @_bn_act_gate_kernel(%arg0: i32, %arg1: i32, %arg2: memref<512x128xf32, #tpu.memory_space<vmem>>, %arg3: memref<3x128xf32, #tpu.memory_space<vmem>>, %arg4: memref<1x1x128xf32, #tpu.memory_space<vmem>>, %arg5: memref<1x128x512xf32, #tpu.memory_space<vmem>>) attributes {dimension_semantics = [#tpu.dimension_semantics<parallel>, #tpu.dimension_semantics<parallel>], iteration_bounds = array<i64: 2, 2>, scalar_prefetch = 0 : i64, scratch_operands = 0 : i64, tpu.core_type = #tpu.core_type<tc>, window_params = [{transform_indices = @transform_0, window_bounds = array<i64: 512, 128>}, {pipeline_mode = #tpu.pipeline_mode<synchronous>, transform_indices = @transform_1, window_bounds = array<i64: 3, 128>}, {transform_indices = @transform_2, window_bounds = array<i64: 1, 1, 128>}, {transform_indices = @transform_3, window_bounds = array<i64: 1, 128, 512>}]} {
    %c0 = arith.constant 0 : index
    %c0_0 = arith.constant 0 : index
    %0 = vector.load %arg2[%c0, %c0_0] : memref<512x128xf32, #tpu.memory_space<vmem>>, vector<512x128xf32>
    %c0_1 = arith.constant 0 : index
    %c0_2 = arith.constant 0 : index
    %1 = vector.load %arg3[%c0_1, %c0_2] : memref<3x128xf32, #tpu.memory_space<vmem>>, vector<1x128xf32>
    %2 = vector.broadcast %1 : vector<1x128xf32> to vector<512x128xf32>
    %3 = arith.mulf %0, %2 : vector<512x128xf32>
    %c1 = arith.constant 1 : index
    %c0_3 = arith.constant 0 : index
    %4 = vector.load %arg3[%c1, %c0_3] : memref<3x128xf32, #tpu.memory_space<vmem>>, vector<1x128xf32>
    %5 = vector.broadcast %4 : vector<1x128xf32> to vector<512x128xf32>
    %6 = arith.addf %3, %5 : vector<512x128xf32>
    %cst = arith.constant 0.000000e+00 : f32
    %7 = vector.broadcast %cst : f32 to vector<512x128xf32>
    %8 = arith.cmpf oge, %6, %7 : vector<512x128xf32>
    %c2 = arith.constant 2 : index
    %c0_4 = arith.constant 0 : index
    %9 = vector.load %arg3[%c2, %c0_4] : memref<3x128xf32, #tpu.memory_space<vmem>>, vector<1x128xf32>
    %10 = vector.broadcast %9 : vector<1x128xf32> to vector<512x128xf32>
    %11 = arith.mulf %10, %6 : vector<512x128xf32>
    %12 = arith.select %8, %6, %11 : vector<512x128xi1>, vector<512x128xf32>
    %c0_5 = arith.constant 0 : index
    %c0_6 = arith.constant 0 : index
    %c0_7 = arith.constant 0 : index
    %13 = vector.load %arg4[%c0_5, %c0_6, %c0_7] : memref<1x1x128xf32, #tpu.memory_space<vmem>>, vector<1x1x128xf32>
    %14 = vector.shape_cast %13 : vector<1x1x128xf32> to vector<1x128xf32>
    %15 = vector.broadcast %14 : vector<1x128xf32> to vector<512x128xf32>
    %16 = arith.mulf %12, %15 : vector<512x128xf32>
    %17 = tpu.transpose %16, [1, 0] : vector<512x128xf32> -> vector<128x512xf32>
    %18 = vector.shape_cast %17 : vector<128x512xf32> to vector<1x128x512xf32>
    %c0_8 = arith.constant 0 : index
    %c0_9 = arith.constant 0 : index
    %c0_10 = arith.constant 0 : index
    %19 = vector.load %arg5[%c0_8, %c0_9, %c0_10] : memref<1x128x512xf32, #tpu.memory_space<vmem>>, vector<1x128x512xf32>
    tpu.vector_store %arg5[%c0_8, %c0_9, %c0_10], %18 {strides = array<i32>} : memref<1x128x512xf32, #tpu.memory_space<vmem>>, vector<1x128x512xf32>,
    return
  }
  func.func @transform_0(%arg0: i32, %arg1: i32) -> (i32, i32) {
    %c2_i32 = arith.constant 2 : i32
    %0 = arith.muli %arg0, %c2_i32 : i32
    %1 = arith.addi %0, %arg1 : i32
    %c0_i32 = arith.constant 0 : i32
    %c0_i32_0 = arith.constant 0 : i32
    return %1, %c0_i32 : i32, i32
  }
  func.func @transform_1(%arg0: i32, %arg1: i32) -> (i32, i32) {
    %c0_i32 = arith.constant 0 : i32
    %c0_i32_0 = arith.constant 0 : i32
    %c0_i32_1 = arith.constant 0 : i32
    return %c0_i32, %c0_i32_0 : i32, i32
  }
  func.func @transform_2(%arg0: i32, %arg1: i32) -> (i32, i32, i32) {
    %c0_i32 = arith.constant 0 : i32
    %c0_i32_0 = arith.constant 0 : i32
    %c0_i32_1 = arith.constant 0 : i32
    return %arg0, %c0_i32, %c0_i32_0 : i32, i32, i32
  }
  func.func @transform_3(%arg0: i32, %arg1: i32) -> (i32, i32, i32) {
    %c0_i32 = arith.constant 0 : i32
    %c0_i32_0 = arith.constant 0 : i32
    return %arg0, %c0_i32, %arg1 : i32, i32, i32
  }
}

</mosaic_0001>

<bundles_post_ra>
// kernel: deconv_bn_act_forward.4
= control target key start
LH: loop header
LB: loop body
LE: loop exit
PB: predicated region body
PF: predicated region fallthrough
CT: control target
= control target key end

     0   :  { %s1205_s9 = smov 0   ;;  %s1207_s10 = smov 0   ;;  %s2653_s0 = inlined_call_operand.vmem [shape: f32[2048,128], index: 0, kind: input, shape index: {}]   ;;  %s2654_s1 = inlined_call_operand.vmem [shape: f32[3,128], index: 1, kind: input, shape index: {}]   ;;  %s2655_s2 = inlined_call_operand.vmem [shape: f32[2,8,128], index: 2, kind: output, shape index: {}]  }
   0x1   :  { %s1209_s11 = smov 0   ;;  %s1211_s12 = smov 0  }
   0x2   :  { %s1213_s13 = smov 0  }
   0x3 LB: > { %s21_s14 = sadd.s32 1, %s1179_s11  ;;  %s24_s15 = sadd.s32 1, %s1183_s12  ;;  %s1187_s13 = sphi %s1213_s13, %s12_s13   ;;  %s1183_s12 = sphi %s1211_s12, %s2871_s12   ;;  %s1179_s11 = sphi %s1209_s11, %s2870_s11   ;;  %s1175_s10 = sphi %s1207_s10, %s2869_s10   ;;  %s1171_s9 = sphi %s1205_s9, %s2868_s9  }
   0x4   : > { %p22_p0 = scmp.ge.s32.totalorder %s21_s14, 2  ;;  %p1094_p1 = scmp.ge.s32.totalorder %s1187_s13, 1 }
   0x5   : > { %p133_p2 = scmp.lt.s32.totalorder %s1187_s13, 5 }
   0x6   : > { %s2873_s14 = smov (%p22_p0, %s21_s14), 0  ;;  %s2875_s15 = smov (!%p22_p0, %s24_s15), %s1183_s12 }
   0x7   : > { %p134_p3 = pnand %p1094_p1, %p133_p2  ;;  %p26_p4 = scmp.ge.s32.totalorder %s2875_s15, 2 }
   0x9   : > { %s2877_s15 = smov (%p26_p4, %s2875_s15), 0  ;;  %137 = sbr.rel (%p134_p3) target bundleno = 286 (0x11e), region = 28 }
   0xe   : > { %s1095_s16 = sshll.u32 %s1175_s10, 1  ;;  %p166_p5 = scmp.lt.s32.totalorder %s1175_s10, 1 }
   0xf   : > { %s157_s17 = sadd.s32 %s1171_s9, %s1095_s16  ;;  %p1099_p7 = scmp.ne.s32.totalorder %s1171_s9, 0 }
  0x10   : > { %s1096_s18 = sshll.u32 %s157_s17, 6  ;;  %s2879_s10 = smov (!%p166_p5, %s1175_s10), 1 }
  0x11   : > { %p159_p6 = scmp.lt.s32.totalorder %s1096_s18, 255  ;;  %s1098_s19 = sshll.u32 %s2879_s10, 3 }
  0x12   : > { %s1241_s23 = scalar_lea.vmem %s2655_s2, %s1098_s19  ;;  %173 = sbr.rel (%p1099_p7) target bundleno = 25 (0x19), region = 32 }
  0x13   : > { %s2881_s18 = smov (!%p159_p6, %s1096_s18), 255 }
  0x14   : > { %s1097_s20 = sshll.u32 %s2881_s18, 3 }
  0x15   : > { %s1246_s26 = scalar_lea.vmem %s2653_s0, %s1097_s20 }
  0x17   : > { %v1189_v0 = vmov 0.0  }
  0x18   : > { %174 = vst [vmem:[%s1241_s23] sm:$0xff] %v1189_v0 }
  0x19 PF: > { %v208_v1 = vld [vmem:[%s1246_s26 + $0x108] sm:$0xff]  ;;  %v209_v2 = vld [vmem:[%s1246_s26 + $0x110] sm:$0xff]  ;;  %v210_v3 = vld [vmem:[%s1246_s26 + $0x118] sm:$0xff]  ;;  %s1100_s5 = sshll.u32 %s1171_s9, 9 }
  0x1a   : > { %v211_v4 = vld [vmem:[%s1246_s26 + $0x120] sm:$0xff]  ;;  %v212_v5 = vld [vmem:[%s1246_s26 + $0x128] sm:$0xff]  ;;  %v213_v6 = vld [vmem:[%s1246_s26 + $0x130] sm:$0xff] }
  0x1b   : > { %v214_v7 = vld [vmem:[%s1246_s26 + $0x138] sm:$0xff]  ;;  %v215_v8 = vld [vmem:[%s1246_s26 + $0x140] sm:$0xff]  ;;  %v216_v9 = vld [vmem:[%s1246_s26 + $0x148] sm:$0xff] }
  0x1c   : > { %v217_v10 = vld [vmem:[%s1246_s26 + $0x150] sm:$0xff]  ;;  %v218_v11 = vld [vmem:[%s1246_s26 + $0x158] sm:$0xff]  ;;  %v219_v12 = vld [vmem:[%s1246_s26 + $0x160] sm:$0xff] }
  0x1d   : > { %v1265_v13 = vld [vmem:[%s2654_s1] ss:$0 sm:$0xff]  ;;  %v220_v14 = vld [vmem:[%s1246_s26 + $0x168] sm:$0xff]  ;;  %v221_v15 = vld [vmem:[%s1246_s26 + $0x170] sm:$0xff] }
  0x1e   : > { %2693 = vst [vmem:[#allocation2_spill] sm:$0xff] %v1265_v13  ;;  %v222_v16 = vld [vmem:[%s1246_s26 + $0x178] sm:$0xff]  ;;  %v223_v17 = vld [vmem:[%s1246_s26 + $0x180] sm:$0xff]  ;;  %v224_v18 = vld [vmem:[%s1246_s26 + $0x188] sm:$0xff]  ;;  %v274_v20 = vmul.f32 %v1265_v13, %v208_v1  ;;  %v275_v21 = vmul.f32 %v1265_v13, %v209_v2  ;;  %v276_v25 = vmul.f32 %v1265_v13, %v210_v3  ;;  %v277_v26 = vmul.f32 %v1265_v13, %v211_v4 }
  0x1f   : > { %v225_v19 = vld [vmem:[%s1246_s26 + $0x190] sm:$0xff]  ;;  %v226_v22 = vld [vmem:[%s1246_s26 + $0x198] sm:$0xff]  ;;  %v227_v23 = vld [vmem:[%s1246_s26 + $0x1a0] sm:$0xff]  ;;  %v278_v27 = vmul.f32 %v1265_v13, %v212_v5  ;;  %v279_v28 = vmul.f32 %v1265_v13, %v213_v6  ;;  %v280_v32 = vmul.f32 %v1265_v13, %v214_v7  ;;  %v281_v33 = vmul.f32 %v1265_v13, %v215_v8 }
  0x20   : > { %v228_v24 = vld [vmem:[%s1246_s26 + $0x1a8] sm:$0xff]  ;;  %v229_v29 = vld [vmem:[%s1246_s26 + $0x1b0] sm:$0xff]  ;;  %v230_v30 = vld [vmem:[%s1246_s26 + $0x1b8] sm:$0xff]  ;;  %v282_v34 = vmul.f32 %v1265_v13, %v216_v9  ;;  %v283_v35 = vmul.f32 %v1265_v13, %v217_v10  ;;  %v284_v39 = vmul.f32 %v1265_v13, %v218_v11  ;;  %v285_v40 = vmul.f32 %v1265_v13, %v219_v12 }
  0x21   : > { %v231_v31 = vld [vmem:[%s1246_s26 + $0x1c0] sm:$0xff]  ;;  %v232_v36 = vld [vmem:[%s1246_s26 + $0x1c8] sm:$0xff]  ;;  %v233_v37 = vld [vmem:[%s1246_s26 + $0x1d0] sm:$0xff]  ;;  %v286_v41 = vmul.f32 %v1265_v13, %v220_v14  ;;  %v287_v42 = vmul.f32 %v1265_v13, %v221_v15  ;;  %v288_v46 = vmul.f32 %v1265_v13, %v222_v16  ;;  %v289_v47 = vmul.f32 %v1265_v13, %v223_v17 }
  0x22   : > { %v234_v38 = vld [vmem:[%s1246_s26 + $0x1d8] sm:$0xff]  ;;  %v235_v43 = vld [vmem:[%s1246_s26 + $0x1e0] sm:$0xff]  ;;  %v236_v44 = vld [vmem:[%s1246_s26 + $0x1e8] sm:$0xff]  ;;  %v290_v48 = vmul.f32 %v1265_v13, %v224_v18  ;;  %v291_v49 = vmul.f32 %v1265_v13, %v225_v19  ;;  %v292_v51 = vmul.f32 %v1265_v13, %v226_v22  ;;  %v293_v52 = vmul.f32 %v1265_v13, %v227_v23 }
  0x23   : > { %v237_v45 = vld [vmem:[%s1246_s26 + $0x1f0] sm:$0xff]  ;;  %v238_v50 = vld [vmem:[%s1246_s26 + $0x1f8] sm:$0xff]  ;;  %v294_v53 = vmul.f32 %v1265_v13, %v228_v24  ;;  %v295_v54 = vmul.f32 %v1265_v13, %v229_v29  ;;  %v296_v55 = vmul.f32 %v1265_v13, %v230_v30  ;;  %v297_v56 = vmul.f32 %v1265_v13, %v231_v31  ;;  %v1315_v59 = vld [vmem:[%s2654_s1 + $0x1] ss:$0 sm:$0xff] }
  0x24   : > { %v298_v57 = vmul.f32 %v1265_v13, %v232_v36  ;;  %v299_v58 = vmul.f32 %v1265_v13, %v233_v37  ;;  %2694 = vst [vmem:[#allocation3_spill] sm:$0xff] %v1315_v59  ;;  %v300_v60 = vmul.f32 %v1265_v13, %v234_v38  ;;  %v301_v61 = vmul.f32 %v1265_v13, %v235_v43 }
  0x25   : > { %v302_v62 = vmul.f32 %v1265_v13, %v236_v44  ;;  %v303_v63 = vmul.f32 %v1265_v13, %v237_v45  ;;  %v304_v0 = vmul.f32 %v1265_v13, %v238_v50  ;;  %v1323_v1 = vadd.f32 %v1315_v59, %v274_v20 }
  0x26   : > { %v1326_v2 = vadd.f32 %v1315_v59, %v275_v21  ;;  %v1329_v3 = vadd.f32 %v1315_v59, %v276_v25  ;;  %v1332_v4 = vadd.f32 %v1315_v59, %v277_v26  ;;  %v1335_v5 = vadd.f32 %v1315_v59, %v278_v27 }
  0x27   : > { %v1338_v6 = vadd.f32 %v1315_v59, %v279_v28  ;;  %v1341_v7 = vadd.f32 %v1315_v59, %v280_v32  ;;  %v1344_v8 = vadd.f32 %v1315_v59, %v281_v33  ;;  %v1347_v9 = vadd.f32 %v1315_v59, %v282_v34  ;;  %v1418_v33 = vld [vmem:[%s2654_s1 + $0x2] ss:$0 sm:$0xff] }
  0x28   : > { %v1350_v10 = vadd.f32 %v1315_v59, %v283_v35  ;;  %v1353_v11 = vadd.f32 %v1315_v59, %v284_v39  ;;  %v1356_v12 = vadd.f32 %v1315_v59, %v285_v40  ;;  %v1359_v14 = vadd.f32 %v1315_v59, %v286_v41  ;;  %2696 = vst [vmem:[#allocation5_spill] sm:$0xff] %v1418_v33 }
  0x29   : > { %v1362_v15 = vadd.f32 %v1315_v59, %v287_v42  ;;  %v1365_v16 = vadd.f32 %v1315_v59, %v288_v46  ;;  %v1368_v17 = vadd.f32 %v1315_v59, %v289_v47  ;;  %v1371_v18 = vadd.f32 %v1315_v59, %v290_v48 }
  0x2a   : > { %v1374_v19 = vadd.f32 %v1315_v59, %v291_v49  ;;  %v1377_v20 = vadd.f32 %v1315_v59, %v292_v51  ;;  %v1380_v21 = vadd.f32 %v1315_v59, %v293_v52  ;;  %v1383_v22 = vadd.f32 %v1315_v59, %v294_v53 }
  0x2b   : > { %v1386_v23 = vadd.f32 %v1315_v59, %v295_v54  ;;  %v1389_v24 = vadd.f32 %v1315_v59, %v296_v55  ;;  %v1392_v25 = vadd.f32 %v1315_v59, %v297_v56  ;;  %v1395_v26 = vadd.f32 %v1315_v59, %v298_v57 }
  0x2c   : > { %v1398_v27 = vadd.f32 %v1315_v59, %v299_v58  ;;  %v1401_v28 = vadd.f32 %v1315_v59, %v300_v60  ;;  %v1404_v29 = vadd.f32 %v1315_v59, %v301_v61  ;;  %v1407_v30 = vadd.f32 %v1315_v59, %v302_v62 }
  0x2d   : > { %v1410_v31 = vadd.f32 %v1315_v59, %v303_v63  ;;  %v1413_v32 = vadd.f32 %v1315_v59, %v304_v0  ;;  %v1422_v34 = vmul.f32 %v1418_v33, %v1323_v1  ;;  %v1426_v35 = vmul.f32 %v1418_v33, %v1326_v2 }
  0x2e   : > { %v1430_v36 = vmul.f32 %v1418_v33, %v1329_v3  ;;  %v1434_v37 = vmul.f32 %v1418_v33, %v1332_v4  ;;  %v1438_v38 = vmul.f32 %v1418_v33, %v1335_v5  ;;  %v1442_v39 = vmul.f32 %v1418_v33, %v1338_v6 }
  0x2f   : > { %2695 = vst [vmem:[#allocation4_spill] sm:$0xff] %v1413_v32  ;;  %v1446_v40 = vmul.f32 %v1418_v33, %v1341_v7  ;;  %v1450_v41 = vmul.f32 %v1418_v33, %v1344_v8  ;;  %v1454_v42 = vmul.f32 %v1418_v33, %v1347_v9  ;;  %v1458_v43 = vmul.f32 %v1418_v33, %v1350_v10 }
  0x30   : > { %v1462_v44 = vmul.f32 %v1418_v33, %v1353_v11  ;;  %v1466_v45 = vmul.f32 %v1418_v33, %v1356_v12  ;;  %v1470_v46 = vmul.f32 %v1418_v33, %v1359_v14  ;;  %v1474_v47 = vmul.f32 %v1418_v33, %v1362_v15 }
  0x31   : > { %v1478_v48 = vmul.f32 %v1418_v33, %v1365_v16  ;;  %v1482_v49 = vmul.f32 %v1418_v33, %v1368_v17  ;;  %v1486_v50 = vmul.f32 %v1418_v33, %v1371_v18  ;;  %v1490_v51 = vmul.f32 %v1418_v33, %v1374_v19 }
  0x32   : > { %v1494_v52 = vmul.f32 %v1418_v33, %v1377_v20  ;;  %v1498_v53 = vmul.f32 %v1418_v33, %v1380_v21  ;;  %v1502_v54 = vmul.f32 %v1418_v33, %v1383_v22  ;;  %v1506_v55 = vmul.f32 %v1418_v33, %v1386_v23 }
  0x33   : > { %v1510_v56 = vmul.f32 %v1418_v33, %v1389_v24  ;;  %v1514_v57 = vmul.f32 %v1418_v33, %v1392_v25  ;;  %v1518_v58 = vmul.f32 %v1418_v33, %v1395_v26  ;;  %v1522_v60 = vmul.f32 %v1418_v33, %v1398_v27 }
  0x34   : > { %v1526_v61 = vmul.f32 %v1418_v33, %v1401_v28  ;;  %v1530_v62 = vmul.f32 %v1418_v33, %v1404_v29  ;;  %v1534_v63 = vmul.f32 %v1418_v33, %v1407_v30  ;;  %v1538_v0 = vmul.f32 %v1418_v33, %v1410_v31 }
  0x35   : > { %v1542_v59 = vmul.f32 %v1418_v33, %v1413_v32  ;;  %vm404_vm0 = vcmp.ge.f32.partialorder %v1323_v1, 0.0  ;;  %vm405_vm1 = vcmp.ge.f32.partialorder %v1326_v2, 0.0  ;;  %vm406_vm2 = vcmp.ge.f32.partialorder %v1329_v3, 0.0 }
  0x36   : > { %vm407_vm3 = vcmp.ge.f32.partialorder %v1332_v4, 0.0  ;;  %vm408_vm4 = vcmp.ge.f32.partialorder %v1335_v5, 0.0  ;;  %vm409_vm5 = vcmp.ge.f32.partialorder %v1338_v6, 0.0  ;;  %vm425_vm11 = vcmp.ge.f32.partialorder %v1386_v23, 0.0 }
  0x37   : > { %2697 = vst [vmem:[#allocation6_spill] sm:$0xff] %v1542_v59  ;;  %vm426_vm12 = vcmp.ge.f32.partialorder %v1389_v24, 0.0  ;;  %vm427_vm13 = vcmp.ge.f32.partialorder %v1392_v25, 0.0  ;;  %vm428_vm14 = vcmp.ge.f32.partialorder %v1395_v26, 0.0  ;;  %vm429_vm15 = vcmp.ge.f32.partialorder %v1398_v27, 0.0 }
  0x38   : > { %vm430_vm6 = vcmp.ge.f32.partialorder %v1401_v28, 0.0  ;;  %vm431_vm7 = vcmp.ge.f32.partialorder %v1404_v29, 0.0  ;;  %vm432_vm8 = vcmp.ge.f32.partialorder %v1407_v30, 0.0  ;;  %vm433_vm9 = vcmp.ge.f32.partialorder %v1410_v31, 0.0 }
  0x39   : > { %vm434_vm10 = vcmp.ge.f32.partialorder %v1413_v32, 0.0  ;;  %v1579_v33 = vsel %vm404_vm0, %v1323_v1, %v1422_v34  ;;  %v1585_v13 = vsel %vm405_vm1, %v1326_v2, %v1426_v35  ;;  %v1591_v59 = vsel %vm406_vm2, %v1329_v3, %v1430_v36  ;;  %v2744_v34 = vld [vmem:[#allocation4_spill] sm:$0xff]  ;;  %v175_v35 = vld [vmem:[%s1246_s26] sm:$0xff]  ;;  %v176_v36 = vld [vmem:[%s1246_s26 + $0x8] sm:$0xff] }
  0x3a   : > { %2698 = vst [vmem:[#allocation7_spill] sm:$0xff] %v1579_v33  ;;  %v1597_v32 = vsel %vm407_vm3, %v1332_v4, %v1434_v37  ;;  %v1603_v1 = vsel %vm408_vm4, %v1335_v5, %v1438_v38  ;;  %v1609_v2 = vsel %vm409_vm5, %v1338_v6, %v1442_v39  ;;  %vm2704_vm0 = vcmp.ge.f32.partialorder %v1341_v7, 0.0  ;;  %v178_v37 = vld [vmem:[%s1246_s26 + $0x18] sm:$0xff]  ;;  %v179_v38 = vld [vmem:[%s1246_s26 + $0x20] sm:$0xff]  ;;  %v180_v39 = vld [vmem:[%s1246_s26 + $0x28] sm:$0xff] }
  0x3b   : > { %2699 = vst [vmem:[#allocation8_spill] sm:$0xff] %v1585_v13  ;;  %v1615_v3 = vsel %vm2704_vm0, %v1341_v7, %v1446_v40  ;;  %vm2706_vm1 = vcmp.ge.f32.partialorder %v1344_v8, 0.0  ;;  %vm2708_vm2 = vcmp.ge.f32.partialorder %v1347_v9, 0.0  ;;  %vm2710_vm3 = vcmp.ge.f32.partialorder %v1350_v10, 0.0  ;;  %v181_v40 = vld [vmem:[%s1246_s26 + $0x30] sm:$0xff] }
  0x3c   : > { %2700 = vst [vmem:[#allocation9_spill] sm:$0xff] %v1591_v59  ;;  %v1621_v4 = vsel %vm2706_vm1, %v1344_v8, %v1450_v41  ;;  %v1627_v5 = vsel %vm2708_vm2, %v1347_v9, %v1454_v42  ;;  %v1633_v6 = vsel %vm2710_vm3, %v1350_v10, %v1458_v43  ;;  %vm2712_vm4 = vcmp.ge.f32.partialorder %v1353_v11, 0.0  ;;  %v183_v41 = vld [vmem:[%s1246_s26 + $0x40] sm:$0xff]  ;;  %v184_v42 = vld [vmem:[%s1246_s26 + $0x48] sm:$0xff]  ;;  %v185_v43 = vld [vmem:[%s1246_s26 + $0x50] sm:$0xff] }
  0x3d   : > { %2701 = vst [vmem:[#allocation10_spill] sm:$0xff] %v1597_v32  ;;  %v1639_v7 = vsel %vm2712_vm4, %v1353_v11, %v1462_v44  ;;  %vm2714_vm5 = vcmp.ge.f32.partialorder %v1356_v12, 0.0  ;;  %vm2716_vm0 = vcmp.ge.f32.partialorder %v1359_v14, 0.0  ;;  %vm2718_vm1 = vcmp.ge.f32.partialorder %v1362_v15, 0.0  ;;  %v186_v44 = vld [vmem:[%s1246_s26 + $0x58] sm:$0xff] }
  0x3e   : > { %2702 = vst [vmem:[#allocation11_spill] sm:$0xff] %v1603_v1  ;;  %v1645_v8 = vsel %vm2714_vm5, %v1356_v12, %v1466_v45  ;;  %v1651_v9 = vsel %vm2716_vm0, %v1359_v14, %v1470_v46  ;;  %v1657_v10 = vsel %vm2718_vm1, %v1362_v15, %v1474_v47  ;;  %vm2720_vm2 = vcmp.ge.f32.partialorder %v1365_v16, 0.0  ;;  %v187_v45 = vld [vmem:[%s1246_s26 + $0x60] sm:$0xff]  ;;  %v188_v46 = vld [vmem:[%s1246_s26 + $0x68] sm:$0xff]  ;;  %v189_v47 = vld [vmem:[%s1246_s26 + $0x70] sm:$0xff] }
  0x3f   : > { %2703 = vst [vmem:[#allocation12_spill] sm:$0xff] %v1609_v2  ;;  %v1663_v11 = vsel %vm2720_vm2, %v1365_v16, %v1478_v48  ;;  %vm2722_vm3 = vcmp.ge.f32.partialorder %v1368_v17, 0.0  ;;  %vm2724_vm4 = vcmp.ge.f32.partialorder %v1371_v18, 0.0  ;;  %vm2726_vm5 = vcmp.ge.f32.partialorder %v1374_v19, 0.0  ;;  %v190_v48 = vld [vmem:[%s1246_s26 + $0x78] sm:$0xff] }
  0x40   : > { %2705 = vst [vmem:[#allocation13_spill] sm:$0xff] %v1615_v3  ;;  %v1669_v12 = vsel %vm2722_vm3, %v1368_v17, %v1482_v49  ;;  %v1675_v14 = vsel %vm2724_vm4, %v1371_v18, %v1486_v50  ;;  %v1681_v15 = vsel %vm2726_vm5, %v1374_v19, %v1490_v51  ;;  %vm2728_vm0 = vcmp.ge.f32.partialorder %v1377_v20, 0.0  ;;  %v191_v49 = vld [vmem:[%s1246_s26 + $0x80] sm:$0xff]  ;;  %v192_v50 = vld [vmem:[%s1246_s26 + $0x88] sm:$0xff] }
  0x41   : > { %2707 = vst [vmem:[#allocation14_spill] sm:$0xff] %v1621_v4  ;;  %v1687_v16 = vsel %vm2728_vm0, %v1377_v20, %v1494_v52  ;;  %vm2730_vm1 = vcmp.ge.f32.partialorder %v1380_v21, 0.0  ;;  %vm2732_vm2 = vcmp.ge.f32.partialorder %v1383_v22, 0.0  ;;  %v1705_v19 = vsel %vm425_vm11, %v1386_v23, %v1506_v55  ;;  %v2746_v51 = vld [vmem:[#allocation2_spill] sm:$0xff]  ;;  %v193_v55 = vld [vmem:[%s1246_s26 + $0x90] sm:$0xff] }
  0x42   : > { %2709 = vst [vmem:[#allocation15_spill] sm:$0xff] %v1627_v5  ;;  %v1693_v17 = vsel %vm2730_vm1, %v1380_v21, %v1498_v53  ;;  %v1699_v18 = vsel %vm2732_vm2, %v1383_v22, %v1502_v54  ;;  %v1711_v20 = vsel %vm426_vm12, %v1389_v24, %v1510_v56  ;;  %v1717_v21 = vsel %vm427_vm13, %v1392_v25, %v1514_v57  ;;  %v194_v56 = vld [vmem:[%s1246_s26 + $0x98] sm:$0xff]  ;;  %v195_v57 = vld [vmem:[%s1246_s26 + $0xa0] sm:$0xff] }
  0x43   : > { %2711 = vst [vmem:[#allocation16_spill] sm:$0xff] %v1633_v6  ;;  %v1723_v22 = vsel %vm428_vm14, %v1395_v26, %v1518_v58  ;;  %v1729_v23 = vsel %vm429_vm15, %v1398_v27, %v1522_v60  ;;  %v1735_v24 = vsel %vm430_vm6, %v1401_v28, %v1526_v61  ;;  %v1741_v25 = vsel %vm431_vm7, %v1404_v29, %v1530_v62  ;;  %v2743_v28 = vld [vmem:[#allocation6_spill] sm:$0xff] }
  0x44   : > { %2713 = vst [vmem:[#allocation17_spill] sm:$0xff] %v1639_v7  ;;  %v1747_v26 = vsel %vm432_vm8, %v1407_v30, %v1534_v63  ;;  %v1753_v27 = vsel %vm433_vm9, %v1410_v31, %v1538_v0  ;;  %v1759_v29 = vsel %vm434_vm10, %v2744_v34, %v2743_v28  ;;  %v177_v30 = vld [vmem:[%s1246_s26 + $0x10] sm:$0xff]  ;;  %v182_v31 = vld [vmem:[%s1246_s26 + $0x38] sm:$0xff]  ;;  %v241_v52 = vmul.f32 %v2746_v51, %v175_v35  ;;  %v196_v63 = vld [vmem:[%s1246_s26 + $0xa8] sm:$0xff] }
  0x45   : > { %2715 = vst [vmem:[#allocation18_spill] sm:$0xff] %v1645_v8  ;;  %v242_v53 = vmul.f32 %v2746_v51, %v176_v36  ;;  %v243_v54 = vmul.f32 %v2746_v51, %v177_v30  ;;  %v244_v58 = vmul.f32 %v2746_v51, %v178_v37  ;;  %v1787_v60 = vmul.f32 %v2746_v51, %v179_v38  ;;  %v197_v0 = vld [vmem:[%s1246_s26 + $0xb0] sm:$0xff]  ;;  %v198_v28 = vld [vmem:[%s1246_s26 + $0xb8] sm:$0xff]  ;;  %v199_v37 = vld [vmem:[%s1246_s26 + $0xc0] sm:$0xff] }
  0x46   : > { %2717 = vst [vmem:[#allocation19_spill] sm:$0xff] %v1651_v9  ;;  %v1790_v61 = vmul.f32 %v2746_v51, %v180_v39  ;;  %v1793_v62 = vmul.f32 %v2746_v51, %v181_v40  ;;  %v1799_v34 = vmul.f32 %v2746_v51, %v182_v31  ;;  %v1802_v35 = vmul.f32 %v2746_v51, %v183_v41  ;;  %v200_v38 = vld [vmem:[%s1246_s26 + $0xc8] sm:$0xff]  ;;  %v201_v39 = vld [vmem:[%s1246_s26 + $0xd0] sm:$0xff] }
  0x47   : > { %2719 = vst [vmem:[#allocation20_spill] sm:$0xff] %v1657_v10  ;;  %v1805_v36 = vmul.f32 %v2746_v51, %v184_v42  ;;  %v1808_v30 = vmul.f32 %v2746_v51, %v185_v43  ;;  %v1814_v40 = vmul.f32 %v2746_v51, %v186_v44  ;;  %v1817_v31 = vmul.f32 %v2746_v51, %v187_v45  ;;  %v203_v43 = vld [vmem:[%s1246_s26 + $0xe0] sm:$0xff] }
  0x48   : > { %2721 = vst [vmem:[#allocation21_spill] sm:$0xff] %v1663_v11  ;;  %v1820_v41 = vmul.f32 %v2746_v51, %v188_v46  ;;  %v1823_v42 = vmul.f32 %v2746_v51, %v189_v47  ;;  %v1835_v44 = vmul.f32 %v2746_v51, %v192_v50  ;;  %v566_v45 = vlaneseq  ;;  %v206_v46 = vld [vmem:[%s1246_s26 + $0xf8] sm:$0xff] }
  0x49   : > { %2723 = vst [vmem:[#allocation22_spill] sm:$0xff] %v1669_v12  ;;  %v1841_v47 = vmul.f32 %v2746_v51, %v193_v55  ;;  %v1853_v50 = vmul.f32 %v2746_v51, %v197_v0  ;;  %v1862_v55 = vmul.f32 %v2746_v51, %v200_v38 }
  0x4a   : > { %2725 = vst [vmem:[#allocation23_spill] sm:$0xff] %v1675_v14 }
  0x4b   : > { %2727 = vst [vmem:[#allocation24_spill] sm:$0xff] %v1681_v15 }
  0x4c   : > { %2729 = vst [vmem:[#allocation25_spill] sm:$0xff] %v1687_v16 }
  0x4d   : > { %2731 = vst [vmem:[#allocation26_spill] sm:$0xff] %v1693_v17 }
  0x4e   : > { %2733 = vst [vmem:[#allocation27_spill] sm:$0xff] %v1699_v18 }
  0x4f   : > { %2734 = vst [vmem:[#allocation28_spill] sm:$0xff] %v1705_v19 }
  0x50   : > { %2735 = vst [vmem:[#allocation29_spill] sm:$0xff] %v1711_v20  ;;  %v1859_v20 = vmul.f32 %v2746_v51, %v199_v37  ;;  %v1881_v37 = vmul.f32 %v2746_v51, %v206_v46 }
  0x51   : > { %2736 = vst [vmem:[#allocation30_spill] sm:$0xff] %v1717_v21  ;;  %v1856_v21 = vmul.f32 %v2746_v51, %v198_v28 }
  0x52   : > { %2737 = vst [vmem:[#allocation31_spill] sm:$0xff] %v1723_v22  ;;  %v1844_v22 = vmul.f32 %v2746_v51, %v194_v56  ;;  %v1865_v56 = vmul.f32 %v2746_v51, %v201_v39  ;;  %v1886_v39 = vshrl.u32 %v566_v45, 7 }
  0x53   : > { %2738 = vst [vmem:[#allocation32_spill] sm:$0xff] %v1729_v23  ;;  %v207_v23 = vld [vmem:[%s1246_s26 + $0x100] sm:$0xff] }
  0x54   : > { %2739 = vst [vmem:[#allocation33_spill] sm:$0xff] %v1735_v24  ;;  %v205_v24 = vld [vmem:[%s1246_s26 + $0xf0] sm:$0xff]  ;;  %v1884_v38 = vmul.f32 %v2746_v51, %v207_v23  ;;  %v600_v46 = vadd.s32 264, %v1886_v39  ;;  %v601_v18 = vadd.s32 272, %v1886_v39  ;;  %v602_v23 = vadd.s32 280, %v1886_v39 }
  0x55   : > { %2740 = vst [vmem:[#allocation34_spill] sm:$0xff] %v1741_v25  ;;  %v1832_v25 = vmul.f32 %v2746_v51, %v191_v49  ;;  %v1850_v49 = vmul.f32 %v2746_v51, %v196_v63  ;;  %v1871_v63 = vmul.f32 %v2746_v51, %v203_v43  ;;  %v1878_v28 = vmul.f32 %v2746_v51, %v205_v24 }
  0x56   : > { %2741 = vst [vmem:[#allocation35_spill] sm:$0xff] %v1747_v26  ;;  %v1829_v26 = vmul.f32 %v2746_v51, %v190_v48  ;;  %v1847_v48 = vmul.f32 %v2746_v51, %v195_v57  ;;  %v604_v45 = vadd.s32 296, %v1886_v39  ;;  %v609_v17 = vadd.s32 336, %v1886_v39 }
  0x57   : > { %2742 = vst [vmem:[#allocation36_spill] sm:$0xff] %v1753_v27  ;;  %v204_v27 = vld [vmem:[%s1246_s26 + $0xe8] sm:$0xff]  ;;  %v610_v16 = vadd.s32 344, %v1886_v39  ;;  %v611_v15 = vadd.s32 352, %v1886_v39  ;;  %v612_v14 = vadd.s32 360, %v1886_v39  ;;  %v613_v12 = vadd.s32 368, %v1886_v39 }
  0x58   : > { %2745 = vst [vmem:[#allocation6_spill] sm:$0xff] %v1759_v29  ;;  %v202_v29 = vld [vmem:[%s1246_s26 + $0xd8] sm:$0xff]  ;;  %v1874_v0 = vmul.f32 %v2746_v51, %v204_v27  ;;  %v614_v11 = vadd.s32 376, %v1886_v39  ;;  %v615_v10 = vadd.s32 384, %v1886_v39  ;;  %v616_v9 = vadd.s32 392, %v1886_v39 }
  0x59   : > { %v1868_v57 = vmul.f32 %v2746_v51, %v202_v29  ;;  %2747 = vst [vmem:[#allocation4_spill] sm:$0xff] %v1871_v63  ;;  %v2753_v29 = vld [vmem:[#allocation3_spill] sm:$0xff]  ;;  %v1903_v51 = vstv %s1100_s5  ;;  %v617_v8 = vadd.s32 400, %v1886_v39  ;;  %v618_v7 = vadd.s32 408, %v1886_v39 }
  0x5a   : > { %2748 = vst [vmem:[#allocation2_spill] sm:$0xff] %v1874_v0  ;;  %v1889_v19 = vadd.f32 %v2753_v29, %v241_v52  ;;  %v1892_v43 = vadd.f32 %v2753_v29, %v242_v53  ;;  %v1895_v27 = vadd.f32 %v2753_v29, %v243_v54  ;;  %v1898_v24 = vadd.f32 %v2753_v29, %v244_v58 }
  0x5b   : > { %2749 = vst [vmem:[#allocation37_spill] sm:$0xff] %v1878_v28  ;;  %v603_v52 = vadd.s32 288, %v1886_v39  ;;  %v605_v53 = vadd.s32 304, %v1886_v39  ;;  %v606_v54 = vadd.s32 312, %v1886_v39  ;;  %v608_v58 = vadd.s32 328, %v1886_v39 }
  0x5c   : > { %2750 = vst [vmem:[#allocation38_spill] sm:$0xff] %v1881_v37  ;;  %v619_v6 = vadd.s32 416, %v1886_v39  ;;  %v620_v5 = vadd.s32 424, %v1886_v39  ;;  %v621_v4 = vadd.s32 432, %v1886_v39  ;;  %v622_v3 = vadd.s32 440, %v1886_v39 }
  0x5d   : > { %2751 = vst [vmem:[#allocation39_spill] sm:$0xff] %v1884_v38  ;;  %v607_v38 = vadd.s32 320, %v1886_v39  ;;  %v623_v2 = vadd.s32 448, %v1886_v39  ;;  %v624_v1 = vadd.s32 456, %v1886_v39  ;;  %v625_v32 = vadd.s32 464, %v1886_v39 }
  0x5e   : > { %2752 = vst [vmem:[#allocation40_spill] sm:$0xff] %v1886_v39  ;;  %v626_v59 = vadd.s32 472, %v1886_v39  ;;  %v627_v13 = vadd.s32 480, %v1886_v39  ;;  %v628_v33 = vadd.s32 488, %v1886_v39  ;;  %v1940_v37 = vadd.s32 %v1903_v51, %v602_v23 }
  0x5f   : > { %2754 = vst [vmem:[#allocation3_spill] sm:$0xff] %v1889_v19  ;;  %v1937_v19 = vadd.s32 %v1903_v51, %v601_v18  ;;  %v1943_v28 = vadd.s32 %v1903_v51, %v603_v52  ;;  %v1946_v0 = vadd.s32 %v1903_v51, %v604_v45  ;;  %v1949_v63 = vadd.s32 %v1903_v51, %v605_v53 }
  0x60   : > { %2755 = vst [vmem:[#allocation41_spill] sm:$0xff] %v1892_v43  ;;  %v1934_v43 = vadd.s32 %v1903_v51, %v600_v46  ;;  %v1955_v46 = vadd.s32 %v1903_v51, %v607_v38  ;;  %v1958_v18 = vadd.s32 %v1903_v51, %v608_v58  ;;  %v1961_v23 = vadd.s32 %v1903_v51, %v609_v17 }
  0x61   : > { %2756 = vst [vmem:[#allocation42_spill] sm:$0xff] %v1895_v27  ;;  %v630_v27 = vadd.s32 504, %v1886_v39  ;;  %v1964_v52 = vadd.s32 %v1903_v51, %v610_v16  ;;  %v1967_v45 = vadd.s32 %v1903_v51, %v611_v15  ;;  %v1970_v53 = vadd.s32 %v1903_v51, %v612_v14 }
  0x62   : > { %2757 = vst [vmem:[#allocation43_spill] sm:$0xff] %v1898_v24  ;;  %v629_v24 = vadd.s32 496, %v1886_v39  ;;  %v1952_v39 = vadd.s32 %v1903_v51, %v606_v54  ;;  %v1973_v54 = vadd.s32 %v1903_v51, %v613_v12  ;;  %v1976_v38 = vadd.s32 %v1903_v51, %v614_v11 }
  0x63   : > { %v1979_v58 = vadd.s32 %v1903_v51, %v615_v10  ;;  %v1982_v17 = vadd.s32 %v1903_v51, %v616_v9  ;;  %v1985_v16 = vadd.s32 %v1903_v51, %v617_v8  ;;  %v1988_v15 = vadd.s32 %v1903_v51, %v618_v7 }
  0x64   : > { %v1991_v14 = vadd.s32 %v1903_v51, %v619_v6  ;;  %v1994_v12 = vadd.s32 %v1903_v51, %v620_v5  ;;  %v1997_v11 = vadd.s32 %v1903_v51, %v621_v4  ;;  %v2000_v10 = vadd.s32 %v1903_v51, %v622_v3 }
  0x65   : > { %v2003_v9 = vadd.s32 %v1903_v51, %v623_v2  ;;  %v2006_v8 = vadd.s32 %v1903_v51, %v624_v1  ;;  %v2009_v7 = vadd.s32 %v1903_v51, %v625_v32  ;;  %v2012_v6 = vadd.s32 %v1903_v51, %v626_v59 }
  0x66   : > { %v2015_v5 = vadd.s32 %v1903_v51, %v627_v13  ;;  %v311_v4 = vadd.f32 %v2753_v29, %v1787_v60  ;;  %v2020_v3 = vadd.s32 %v1903_v51, %v628_v33  ;;  %v2023_v2 = vadd.s32 %v1903_v51, %v629_v24  ;;  %v2779_v24 = vld [vmem:[#allocation2_spill] sm:$0xff] }
  0x67   : > { %v2026_v1 = vadd.s32 %v1903_v51, %v630_v27  ;;  %v2030_v32 = vadd.f32 %v2753_v29, %v1790_v61  ;;  %v2034_v13 = vadd.f32 %v2753_v29, %v1793_v62  ;;  %v2038_v59 = vadd.f32 %v2753_v29, %v1799_v34  ;;  %v2777_v27 = vld [vmem:[#allocation4_spill] sm:$0xff] }
  0x68   : > { %v2042_v33 = vadd.f32 %v2753_v29, %v1802_v35  ;;  %v2046_v60 = vadd.f32 %v2753_v29, %v1805_v36  ;;  %v2050_v61 = vadd.f32 %v2753_v29, %v1808_v30  ;;  %v2054_v62 = vadd.f32 %v2753_v29, %v1814_v40 }
  0x69   : > { %v2058_v34 = vadd.f32 %v2753_v29, %v1817_v31  ;;  %v2062_v35 = vadd.f32 %v2753_v29, %v1820_v41  ;;  %v2066_v36 = vadd.f32 %v2753_v29, %v1823_v42  ;;  %v2070_v30 = vadd.f32 %v2753_v29, %v1829_v26 }
  0x6a   : > { %2758 = vst [vmem:[#allocation44_spill] sm:$0xff] %v2046_v60  ;;  %v2074_v40 = vadd.f32 %v2753_v29, %v1832_v25  ;;  %v2078_v31 = vadd.f32 %v2753_v29, %v1835_v44  ;;  %v2082_v41 = vadd.f32 %v2753_v29, %v1841_v47  ;;  %v2086_v42 = vadd.f32 %v2753_v29, %v1844_v22 }
  0x6b   : > { %2759 = vst [vmem:[#allocation45_spill] sm:$0xff] %v2050_v61  ;;  %v2090_v26 = vadd.f32 %v2753_v29, %v1847_v48  ;;  %v2094_v25 = vadd.f32 %v2753_v29, %v1850_v49  ;;  %v2098_v44 = vadd.f32 %v2753_v29, %v1853_v50  ;;  %v2102_v47 = vadd.f32 %v2753_v29, %v1856_v21 }
  0x6c   : > { %2760 = vst [vmem:[#allocation46_spill] sm:$0xff] %v2054_v62  ;;  %v2106_v22 = vadd.f32 %v2753_v29, %v1859_v20  ;;  %v2110_v48 = vadd.f32 %v2753_v29, %v1862_v55  ;;  %v2114_v49 = vadd.f32 %v2753_v29, %v1865_v56  ;;  %v2118_v50 = vadd.f32 %v2753_v29, %v1868_v57  ;;  %v2786_v57 = vld [vmem:[#allocation41_spill] sm:$0xff] }
  0x6d   : > { %2761 = vst [vmem:[#allocation47_spill] sm:$0xff] %v2058_v34  ;;  %v2122_v21 = vadd.f32 %v2753_v29, %v2777_v27  ;;  %v2126_v20 = vadd.f32 %v2753_v29, %v2779_v24  ;;  %vm372_vm7 = vcmp.ge.f32.partialorder %v2786_v57, 0.0  ;;  %v2788_v27 = vld [vmem:[#allocation40_spill] sm:$0xff]  ;;  %v2789_v24 = vld [vmem:[#allocation5_spill] sm:$0xff]  ;;  %vm375_vm10 = vcmp.ge.f32.partialorder %v311_v4, 0.0 }
  0x6e   : > { %2762 = vst [vmem:[#allocation48_spill] sm:$0xff] %v2062_v35  ;;  %vm729_vm14 = vcmp.lt.s32.totalorder %v1934_v43, 1024  ;;  %vm730_vm15 = vcmp.lt.s32.totalorder %v1937_v19, 1024  ;;  %vm731_vm3 = vcmp.lt.s32.totalorder %v1940_v37, 1024  ;;  %vm752_vm0 = vcmp.lt.s32.totalorder %v2003_v9, 1024 }
  0x6f   : > { %2763 = vst [vmem:[#allocation49_spill] sm:$0xff] %v2066_v36  ;;  %vm753_vm1 = vcmp.lt.s32.totalorder %v2006_v8, 1024  ;;  %vm754_vm2 = vcmp.lt.s32.totalorder %v2009_v7, 1024  ;;  %vm759_vm5 = vcmp.lt.s32.totalorder %v2026_v1, 1024 }
  0x70   : > { %2764 = vst [vmem:[#allocation50_spill] sm:$0xff] %v2070_v30 }
  0x71   : > { %2765 = vst [vmem:[#allocation51_spill] sm:$0xff] %v2074_v40  ;;  %v2163_v40 = vmul.f32 %v2789_v24, %v2034_v13 }
  0x72   : > { %2766 = vst [vmem:[#allocation52_spill] sm:$0xff] %v2078_v31  ;;  %v2159_v31 = vmul.f32 %v2789_v24, %v2030_v32 }
  0x73   : > { %2767 = vst [vmem:[#allocation53_spill] sm:$0xff] %v2082_v41  ;;  %v632_v41 = vadd.s32 %v1903_v51, %v2788_v27 }
  0x74   : > { %2768 = vst [vmem:[#allocation54_spill] sm:$0xff] %v2086_v42  ;;  %v573_v42 = vadd.s32 48, %v2788_v27 }
  0x75   : > { %2769 = vst [vmem:[#allocation55_spill] sm:$0xff] %v2090_v26  ;;  %v572_v26 = vadd.s32 40, %v2788_v27  ;;  %vm696_vm11 = vcmp.lt.s32.totalorder %v632_v41, 1024  ;;  %v2802_v41 = vld [vmem:[#allocation14_spill] sm:$0xff] }
  0x76   : > { %2770 = vst [vmem:[#allocation56_spill] sm:$0xff] %v2094_v25  ;;  %v571_v25 = vadd.s32 32, %v2788_v27 }
  0x77   : > { %2771 = vst [vmem:[#allocation57_spill] sm:$0xff] %v2098_v44  ;;  %v570_v44 = vadd.s32 24, %v2788_v27 }
  0x78   : > { %2772 = vst [vmem:[#allocation58_spill] sm:$0xff] %v2102_v47  ;;  %v569_v47 = vadd.s32 16, %v2788_v27 }
  0x79   : > { %2773 = vst [vmem:[#allocation59_spill] sm:$0xff] %v2106_v22  ;;  %v2781_v22 = vld [vmem:[#allocation37_spill] sm:$0xff] }
  0x7a   : > { %2774 = vst [vmem:[#allocation60_spill] sm:$0xff] %v2110_v48  ;;  %v2130_v55 = vadd.f32 %v2753_v29, %v2781_v22  ;;  %v2783_v48 = vld [vmem:[#allocation38_spill] sm:$0xff]  ;;  %v438_v22 = vmul.f32 %v2789_v24, %v2786_v57  ;;  %v634_v36 = vadd.s32 %v1903_v51, %v569_v47  ;;  %v2185_v47 = vadd.s32 64, %v2788_v27 }
  0x7b   : > { %2775 = vst [vmem:[#allocation61_spill] sm:$0xff] %v2114_v49  ;;  %v2134_v56 = vadd.f32 %v2753_v29, %v2783_v48  ;;  %v2785_v49 = vld [vmem:[#allocation3_spill] sm:$0xff] }
  0x7c   : > { %2776 = vst [vmem:[#allocation62_spill] sm:$0xff] %v2118_v50  ;;  %vm371_vm6 = vcmp.ge.f32.partialorder %v2785_v49, 0.0  ;;  %v2787_v50 = vld [vmem:[#allocation42_spill] sm:$0xff]  ;;  %v2790_v48 = vld [vmem:[#allocation43_spill] sm:$0xff]  ;;  %v502_v34 = vsel %vm372_vm7, %v2786_v57, %v438_v22  ;;  %v2194_v57 = vadd.s32 %v1903_v51, %v572_v26  ;;  %vm698_vm13 = vcmp.lt.s32.totalorder %v634_v36, 1024  ;;  %v2793_v22 = vld [vmem:[#allocation9_spill] sm:$0xff] }
  0x7d   : > { %2778 = vst [vmem:[#allocation4_spill] sm:$0xff] %v2122_v21  ;;  %vm373_vm8 = vcmp.ge.f32.partialorder %v2787_v50, 0.0  ;;  %v568_v21 = vadd.s32 8, %v2788_v27  ;;  %v439_v29 = vmul.f32 %v2789_v24, %v2787_v50  ;;  %vm374_vm9 = vcmp.ge.f32.partialorder %v2790_v48, 0.0  ;;  %v2798_v36 = vld [vmem:[#allocation12_spill] sm:$0xff] }
  0x7e   : > { %2780 = vst [vmem:[#allocation2_spill] sm:$0xff] %v2126_v20  ;;  %v437_v20 = vmul.f32 %v2789_v24, %v2785_v49  ;;  %vm756_vm7 = vcmp.lt.s32.totalorder %v2015_v5, 1024  ;;  %v444_v5 = vmul.f32 %v2789_v24, %v2038_v59 }
  0x7f   : > { %2782 = vst [vmem:[#allocation37_spill] sm:$0xff] %v2130_v55  ;;  %v441_v55 = vmul.f32 %v2789_v24, %v311_v4  ;;  %v633_v30 = vadd.s32 %v1903_v51, %v568_v21  ;;  %v503_v62 = vsel %vm373_vm8, %v2787_v50, %v439_v29  ;;  %v2182_v21 = vadd.s32 56, %v2788_v27 }
  0x80   : > { %2784 = vst [vmem:[#allocation38_spill] sm:$0xff] %v2134_v56  ;;  %v440_v56 = vmul.f32 %v2789_v24, %v2790_v48  ;;  %v501_v35 = vsel %vm371_vm6, %v2785_v49, %v437_v20  ;;  %v2188_v49 = vadd.s32 %v1903_v51, %v570_v44  ;;  %v2191_v20 = vadd.s32 %v1903_v51, %v571_v25  ;;  %v2791_v25 = vld [vmem:[#allocation7_spill] sm:$0xff] }
  0x81   : > { %v2179_v60 = vsel %vm375_vm10, %v311_v4, %v441_v55  ;;  %v2197_v50 = vadd.s32 %v1903_v51, %v573_v42  ;;  %vm697_vm12 = vcmp.lt.s32.totalorder %v633_v30, 1024  ;;  %vm755_vm6 = vcmp.lt.s32.totalorder %v2012_v6, 1024  ;;  %v2792_v55 = vld [vmem:[#allocation8_spill] sm:$0xff]  ;;  %v2800_v30 = vld [vmem:[#allocation13_spill] sm:$0xff] }
  0x82   : > { %v2177_v61 = vsel %vm374_vm9, %v2790_v48, %v440_v56  ;;  %vm757_vm8 = vcmp.lt.s32.totalorder %v2020_v3, 1024  ;;  %vm758_vm9 = vcmp.lt.s32.totalorder %v2023_v2, 1024  ;;  %vm377_vm10 = vcmp.ge.f32.partialorder %v2034_v13, 0.0  ;;  %v2804_v48 = vld [vmem:[#allocation15_spill] sm:$0xff] }
  0x83   : > { %vm700_vm4 = vcmp.lt.s32.totalorder %v2191_v20, 1024  ;;  %v888_v4 = vsel %vm696_vm11, %v501_v35, 0.0  ;;  %v889_v42 = vsel %vm697_vm12, %v502_v34, 0.0  ;;  %v890_v26 = vsel %vm698_vm13, %v503_v62, 0.0  ;;  %v2794_v35 = vld [vmem:[#allocation10_spill] sm:$0xff]  ;;  %v2796_v62 = vld [vmem:[#allocation11_spill] sm:$0xff] }
  0x84   : > { %v2240_v44 = vsel %vm729_vm14, %v2791_v25, 0.0  ;;  %v2245_v56 = vsel %vm730_vm15, %v2792_v55, 0.0  ;;  %v2250_v29 = vsel %vm731_vm3, %v2793_v22, 0.0  ;;  %vm2795_vm11 = vcmp.lt.s32.totalorder %v1943_v28, 1024  ;;  %v2806_v25 = vld [vmem:[#allocation16_spill] sm:$0xff]  ;;  %v2808_v55 = vld [vmem:[#allocation17_spill] sm:$0xff] }
  0x85   : > { %v2255_v34 = vsel %vm2795_vm11, %v2794_v35, 0.0  ;;  %vm2797_vm12 = vcmp.lt.s32.totalorder %v1946_v0, 1024  ;;  %vm2799_vm13 = vcmp.lt.s32.totalorder %v1949_v63, 1024  ;;  %vm2801_vm14 = vcmp.lt.s32.totalorder %v1952_v39, 1024  ;;  %v2810_v22 = vld [vmem:[#allocation18_spill] sm:$0xff]  ;;  %v2812_v35 = vld [vmem:[#allocation19_spill] sm:$0xff] }
  0x86   : > { %v2260_v43 = vsel %vm2797_vm12, %v2796_v62, 0.0  ;;  %v2265_v19 = vsel %vm2799_vm13, %v2798_v36, 0.0  ;;  %v2270_v37 = vsel %vm2801_vm14, %v2800_v30, 0.0  ;;  %vm2803_vm15 = vcmp.lt.s32.totalorder %v1955_v46, 1024  ;;  %v2814_v62 = vld [vmem:[#allocation20_spill] sm:$0xff]  ;;  %v2816_v36 = vld [vmem:[#allocation21_spill] sm:$0xff] }
  0x87   : > { %v2275_v28 = vsel %vm2803_vm15, %v2802_v41, 0.0  ;;  %vm2805_vm3 = vcmp.lt.s32.totalorder %v1958_v18, 1024  ;;  %vm2807_vm11 = vcmp.lt.s32.totalorder %v1961_v23, 1024  ;;  %vm2809_vm12 = vcmp.lt.s32.totalorder %v1964_v52, 1024  ;;  %v2818_v30 = vld [vmem:[#allocation22_spill] sm:$0xff]  ;;  %v2820_v41 = vld [vmem:[#allocation23_spill] sm:$0xff] }
  0x88   : > { %v2280_v0 = vsel %vm2805_vm3, %v2804_v48, 0.0  ;;  %v2285_v63 = vsel %vm2807_vm11, %v2806_v25, 0.0  ;;  %v2290_v39 = vsel %vm2809_vm12, %v2808_v55, 0.0  ;;  %vm2811_vm13 = vcmp.lt.s32.totalorder %v1967_v45, 1024  ;;  %v2822_v48 = vld [vmem:[#allocation24_spill] sm:$0xff]  ;;  %v2824_v25 = vld [vmem:[#allocation25_spill] sm:$0xff] }
  0x89   : > { %v2295_v46 = vsel %vm2811_vm13, %v2810_v22, 0.0  ;;  %vm2813_vm14 = vcmp.lt.s32.totalorder %v1970_v53, 1024  ;;  %vm2815_vm15 = vcmp.lt.s32.totalorder %v1973_v54, 1024  ;;  %vm2817_vm3 = vcmp.lt.s32.totalorder %v1976_v38, 1024  ;;  %v2826_v55 = vld [vmem:[#allocation26_spill] sm:$0xff]  ;;  %v2828_v22 = vld [vmem:[#allocation27_spill] sm:$0xff] }
  0x8a   : > { %v2300_v18 = vsel %vm2813_vm14, %v2812_v35, 0.0  ;;  %v2305_v23 = vsel %vm2815_vm15, %v2814_v62, 0.0  ;;  %v2310_v52 = vsel %vm2817_vm3, %v2816_v36, 0.0  ;;  %vm2819_vm11 = vcmp.lt.s32.totalorder %v1979_v58, 1024  ;;  %v2830_v35 = vld [vmem:[#allocation28_spill] sm:$0xff]  ;;  %v2832_v62 = vld [vmem:[#allocation29_spill] sm:$0xff] }
  0x8b   : > { %v2315_v45 = vsel %vm2819_vm11, %v2818_v30, 0.0  ;;  %vm2821_vm12 = vcmp.lt.s32.totalorder %v1982_v17, 1024  ;;  %vm2823_vm13 = vcmp.lt.s32.totalorder %v1985_v16, 1024  ;;  %vm2825_vm14 = vcmp.lt.s32.totalorder %v1988_v15, 1024  ;;  %v2834_v36 = vld [vmem:[#allocation30_spill] sm:$0xff]  ;;  %v2835_v30 = vld [vmem:[#allocation31_spill] sm:$0xff] }
  0x8c   : > { %v2320_v53 = vsel %vm2821_vm12, %v2820_v41, 0.0  ;;  %v2325_v54 = vsel %vm2823_vm13, %v2822_v48, 0.0  ;;  %v2330_v38 = vsel %vm2825_vm14, %v2824_v25, 0.0  ;;  %vm2827_vm15 = vcmp.lt.s32.totalorder %v1991_v14, 1024  ;;  %v2836_v41 = vld [vmem:[#allocation32_spill] sm:$0xff]  ;;  %v2837_v48 = vld [vmem:[#allocation33_spill] sm:$0xff] }
  0x8d   : > { %v2335_v58 = vsel %vm2827_vm15, %v2826_v55, 0.0  ;;  %vm2829_vm3 = vcmp.lt.s32.totalorder %v1994_v12, 1024  ;;  %vm2831_vm11 = vcmp.lt.s32.totalorder %v1997_v11, 1024  ;;  %vm2833_vm12 = vcmp.lt.s32.totalorder %v2000_v10, 1024  ;;  %v2838_v25 = vld [vmem:[#allocation34_spill] sm:$0xff]  ;;  %v2839_v55 = vld [vmem:[#allocation35_spill] sm:$0xff] }
  0x8e   : > { %v2340_v17 = vsel %vm2829_vm3, %v2828_v22, 0.0  ;;  %v2345_v16 = vsel %vm2831_vm11, %v2830_v35, 0.0  ;;  %v2350_v15 = vsel %vm2833_vm12, %v2832_v62, 0.0  ;;  %v2355_v14 = vsel %vm752_vm0, %v2834_v36, 0.0  ;;  %v2840_v22 = vld [vmem:[#allocation36_spill] sm:$0xff]  ;;  %v2841_v35 = vld [vmem:[#allocation6_spill] sm:$0xff] }
  0x8f   : > { %v2360_v12 = vsel %vm753_vm1, %v2835_v30, 0.0  ;;  %v2365_v11 = vsel %vm754_vm2, %v2836_v41, 0.0  ;;  %v2370_v10 = vsel %vm755_vm6, %v2837_v48, 0.0  ;;  %v2375_v9 = vsel %vm756_vm7, %v2838_v25, 0.0 }
  0x90   : > { %v2380_v8 = vsel %vm757_vm8, %v2839_v55, 0.0  ;;  %v2385_v7 = vsel %vm758_vm9, %v2840_v22, 0.0  ;;  %v2390_v6 = vsel %vm759_vm5, %v2841_v35, 0.0  ;;  %v953_v62 = vadd.f32 %v889_v42, %v888_v4  ;;  %v2846_v22 = vld [vmem:[#allocation46_spill] sm:$0xff] }
  0x91   : > { %vm378_vm0 = vcmp.ge.f32.partialorder %v2038_v59, 0.0  ;;  %vm2842_vm1 = vcmp.ge.f32.partialorder %v2030_v32, 0.0  ;;  %vm2843_vm2 = vcmp.lt.s32.totalorder %v2188_v49, 1024  ;;  %v576_v36 = vadd.s32 72, %v2788_v27 }
  0x92   : > { %v506_v3 = vsel %vm2842_vm1, %v2030_v32, %v2159_v31  ;;  %v891_v2 = vsel %vm2843_vm2, %v2177_v61, 0.0  ;;  %v639_v1 = vadd.s32 %v1903_v51, %v2182_v21  ;;  %vm701_vm5 = vcmp.lt.s32.totalorder %v2194_v57, 1024  ;;  %v2844_v57 = vld [vmem:[#allocation44_spill] sm:$0xff] }
  0x93   : > { %v954_v4 = vadd.f32 %v953_v62, %v890_v26  ;;  %vm379_vm6 = vcmp.ge.f32.partialorder %v2042_v33, 0.0  ;;  %v445_v42 = vmul.f32 %v2789_v24, %v2042_v33  ;;  %v507_v32 = vsel %vm377_vm10, %v2034_v13, %v2163_v40 }
  0x94   : > { %v892_v61 = vsel %vm700_vm4, %v2179_v60, 0.0  ;;  %v577_v31 = vadd.s32 80, %v2788_v27  ;;  %v640_v21 = vadd.s32 %v1903_v51, %v2185_v47  ;;  %vm702_vm7 = vcmp.lt.s32.totalorder %v2197_v50, 1024  ;;  %v2845_v47 = vld [vmem:[#allocation45_spill] sm:$0xff] }
  0x95   : > { %v955_v49 = vadd.f32 %v954_v4, %v891_v2  ;;  %vm380_vm8 = vcmp.ge.f32.partialorder %v2844_v57, 0.0  ;;  %v446_v26 = vmul.f32 %v2789_v24, %v2844_v57  ;;  %v508_v13 = vsel %vm378_vm0, %v2038_v59, %v444_v5 }
  0x96   : > { %v893_v40 = vsel %vm701_vm5, %v506_v3, 0.0  ;;  %v578_v60 = vadd.s32 88, %v2788_v27  ;;  %v641_v20 = vadd.s32 %v1903_v51, %v576_v36  ;;  %vm703_vm4 = vcmp.lt.s32.totalorder %v639_v1, 1024  ;;  %v2847_v36 = vld [vmem:[#allocation47_spill] sm:$0xff] }
  0x97   : > { %v956_v30 = vadd.f32 %v955_v49, %v892_v61  ;;  %vm381_vm9 = vcmp.ge.f32.partialorder %v2845_v47, 0.0  ;;  %v447_v50 = vmul.f32 %v2789_v24, %v2845_v47  ;;  %v509_v41 = vsel %vm379_vm6, %v2042_v33, %v445_v42 }
  0x98   : > { %v894_v48 = vsel %vm702_vm7, %v507_v32, 0.0  ;;  %v579_v25 = vadd.s32 96, %v2788_v27  ;;  %v642_v59 = vadd.s32 %v1903_v51, %v577_v31  ;;  %vm704_vm10 = vcmp.lt.s32.totalorder %v640_v21, 1024  ;;  %v2848_v21 = vld [vmem:[#allocation48_spill] sm:$0xff] }
  0x99   : > { %v957_v55 = vadd.f32 %v956_v30, %v893_v40  ;;  %vm382_vm13 = vcmp.ge.f32.partialorder %v2846_v22, 0.0  ;;  %v448_v35 = vmul.f32 %v2789_v24, %v2846_v22  ;;  %v510_v62 = vsel %vm380_vm8, %v2844_v57, %v446_v26 }
  0x9a   : > { %v895_v5 = vsel %vm703_vm4, %v508_v13, 0.0  ;;  %v580_v3 = vadd.s32 104, %v2788_v27  ;;  %v643_v33 = vadd.s32 %v1903_v51, %v578_v60  ;;  %vm705_vm14 = vcmp.lt.s32.totalorder %v641_v20, 1024  ;;  %v2849_v20 = vld [vmem:[#allocation49_spill] sm:$0xff] }
  0x9b   : > { %v958_v2 = vadd.f32 %v957_v55, %v894_v48  ;;  %vm383_vm15 = vcmp.ge.f32.partialorder %v2847_v36, 0.0  ;;  %v449_v1 = vmul.f32 %v2789_v24, %v2847_v36  ;;  %v511_v4 = vsel %vm381_vm9, %v2845_v47, %v447_v50 }
  0x9c   : > { %v896_v42 = vsel %vm704_vm10, %v509_v41, 0.0  ;;  %v581_v32 = vadd.s32 112, %v2788_v27  ;;  %v644_v61 = vadd.s32 %v1903_v51, %v579_v25  ;;  %vm706_vm3 = vcmp.lt.s32.totalorder %v642_v59, 1024  ;;  %v2850_v59 = vld [vmem:[#allocation50_spill] sm:$0xff] }
  0x9d   : > { %v959_v31 = vadd.f32 %v958_v2, %v895_v5  ;;  %vm384_vm11 = vcmp.ge.f32.partialorder %v2848_v21, 0.0  ;;  %v450_v49 = vmul.f32 %v2789_v24, %v2848_v21  ;;  %v512_v57 = vsel %vm382_vm13, %v2846_v22, %v448_v35 }
  0x9e   : > { %v897_v26 = vsel %vm705_vm14, %v510_v62, 0.0  ;;  %v582_v13 = vadd.s32 120, %v2788_v27  ;;  %v645_v40 = vadd.s32 %v1903_v51, %v580_v3  ;;  %vm707_vm12 = vcmp.lt.s32.totalorder %v643_v33, 1024  ;;  %v2851_v33 = vld [vmem:[#allocation51_spill] sm:$0xff] }
  0x9f   : > { %v960_v60 = vadd.f32 %v959_v31, %v896_v42  ;;  %vm385_vm0 = vcmp.ge.f32.partialorder %v2849_v20, 0.0  ;;  %v451_v30 = vmul.f32 %v2789_v24, %v2849_v20  ;;  %v513_v47 = vsel %vm383_vm15, %v2847_v36, %v449_v1 }
  0xa0   : > { %v898_v50 = vsel %vm706_vm3, %v511_v4, 0.0  ;;  %v583_v41 = vadd.s32 128, %v2788_v27  ;;  %v646_v48 = vadd.s32 %v1903_v51, %v581_v32  ;;  %vm708_vm1 = vcmp.lt.s32.totalorder %v644_v61, 1024  ;;  %v2852_v61 = vld [vmem:[#allocation52_spill] sm:$0xff] }
  0xa1   : > { %v961_v25 = vadd.f32 %v960_v60, %v897_v26  ;;  %vm386_vm2 = vcmp.ge.f32.partialorder %v2850_v59, 0.0  ;;  %v452_v55 = vmul.f32 %v2789_v24, %v2850_v59  ;;  %v514_v22 = vsel %vm384_vm11, %v2848_v21, %v450_v49 }
  0xa2   : > { %v899_v35 = vsel %vm707_vm12, %v512_v57, 0.0  ;;  %v584_v62 = vadd.s32 136, %v2788_v27  ;;  %v647_v5 = vadd.s32 %v1903_v51, %v582_v13  ;;  %vm709_vm5 = vcmp.lt.s32.totalorder %v645_v40, 1024  ;;  %v2853_v40 = vld [vmem:[#allocation53_spill] sm:$0xff] }
  0xa3   : > { %v962_v3 = vadd.f32 %v961_v25, %v898_v50  ;;  %vm387_vm6 = vcmp.ge.f32.partialorder %v2851_v33, 0.0  ;;  %v453_v2 = vmul.f32 %v2789_v24, %v2851_v33  ;;  %v515_v36 = vsel %vm385_vm0, %v2849_v20, %v451_v30 }
  0xa4   : > { %v900_v1 = vsel %vm708_vm1, %v513_v47, 0.0  ;;  %v585_v4 = vadd.s32 144, %v2788_v27  ;;  %v648_v42 = vadd.s32 %v1903_v51, %v583_v41  ;;  %vm710_vm7 = vcmp.lt.s32.totalorder %v646_v48, 1024  ;;  %v2854_v48 = vld [vmem:[#allocation54_spill] sm:$0xff] }
  0xa5   : > { %v963_v32 = vadd.f32 %v962_v3, %v899_v35  ;;  %vm388_vm8 = vcmp.ge.f32.partialorder %v2852_v61, 0.0  ;;  %v454_v31 = vmul.f32 %v2789_v24, %v2852_v61  ;;  %v516_v21 = vsel %vm386_vm2, %v2850_v59, %v452_v55 }
  0xa6   : > { %v901_v49 = vsel %vm709_vm5, %v514_v22, 0.0  ;;  %v586_v57 = vadd.s32 152, %v2788_v27  ;;  %v649_v26 = vadd.s32 %v1903_v51, %v584_v62  ;;  %vm711_vm4 = vcmp.lt.s32.totalorder %v647_v5, 1024  ;;  %v2855_v5 = vld [vmem:[#allocation55_spill] sm:$0xff] }
  0xa7   : > { %v964_v13 = vadd.f32 %v963_v32, %v900_v1  ;;  %vm389_vm9 = vcmp.ge.f32.partialorder %v2853_v40, 0.0  ;;  %v455_v60 = vmul.f32 %v2789_v24, %v2853_v40  ;;  %v517_v20 = vsel %vm387_vm6, %v2851_v33, %v453_v2 }
  0xa8   : > { %v902_v30 = vsel %vm710_vm7, %v515_v36, 0.0  ;;  %v587_v47 = vadd.s32 160, %v2788_v27  ;;  %v650_v50 = vadd.s32 %v1903_v51, %v585_v4  ;;  %vm712_vm10 = vcmp.lt.s32.totalorder %v648_v42, 1024  ;;  %v2856_v42 = vld [vmem:[#allocation56_spill] sm:$0xff] }
  0xa9   : > { %v965_v41 = vadd.f32 %v964_v13, %v901_v49  ;;  %vm390_vm13 = vcmp.ge.f32.partialorder %v2854_v48, 0.0  ;;  %v456_v25 = vmul.f32 %v2789_v24, %v2854_v48  ;;  %v518_v59 = vsel %vm388_vm8, %v2852_v61, %v454_v31 }
  0xaa   : > { %v903_v55 = vsel %vm711_vm4, %v516_v21, 0.0  ;;  %v588_v22 = vadd.s32 168, %v2788_v27  ;;  %v651_v35 = vadd.s32 %v1903_v51, %v586_v57  ;;  %vm713_vm14 = vcmp.lt.s32.totalorder %v649_v26, 1024  ;;  %v2857_v26 = vld [vmem:[#allocation57_spill] sm:$0xff] }
  0xab   : > { %v966_v62 = vadd.f32 %v965_v41, %v902_v30  ;;  %vm391_vm15 = vcmp.ge.f32.partialorder %v2855_v5, 0.0  ;;  %v457_v3 = vmul.f32 %v2789_v24, %v2855_v5  ;;  %v519_v33 = vsel %vm389_vm9, %v2853_v40, %v455_v60 }
  0xac   : > { %v904_v2 = vsel %vm712_vm10, %v517_v20, 0.0  ;;  %v589_v36 = vadd.s32 176, %v2788_v27  ;;  %v652_v1 = vadd.s32 %v1903_v51, %v587_v47  ;;  %vm714_vm3 = vcmp.lt.s32.totalorder %v650_v50, 1024  ;;  %v2858_v50 = vld [vmem:[#allocation58_spill] sm:$0xff] }
  0xad   : > { %v967_v4 = vadd.f32 %v966_v62, %v903_v55  ;;  %vm392_vm11 = vcmp.ge.f32.partialorder %v2856_v42, 0.0  ;;  %v458_v32 = vmul.f32 %v2789_v24, %v2856_v42  ;;  %v520_v61 = vsel %vm390_vm13, %v2854_v48, %v456_v25 }
  0xae   : > { %v905_v31 = vsel %vm713_vm14, %v518_v59, 0.0  ;;  %v590_v21 = vadd.s32 184, %v2788_v27  ;;  %v653_v49 = vadd.s32 %v1903_v51, %v588_v22  ;;  %vm715_vm12 = vcmp.lt.s32.totalorder %v651_v35, 1024  ;;  %v2859_v35 = vld [vmem:[#allocation59_spill] sm:$0xff] }
  0xaf   : > { %v968_v57 = vadd.f32 %v967_v4, %v904_v2  ;;  %vm393_vm0 = vcmp.ge.f32.partialorder %v2857_v26, 0.0  ;;  %v459_v13 = vmul.f32 %v2789_v24, %v2857_v26  ;;  %v521_v40 = vsel %vm391_vm15, %v2855_v5, %v457_v3 }
  0xb0   : > { %v906_v60 = vsel %vm714_vm3, %v519_v33, 0.0  ;;  %v591_v20 = vadd.s32 192, %v2788_v27  ;;  %v654_v30 = vadd.s32 %v1903_v51, %v589_v36  ;;  %vm716_vm1 = vcmp.lt.s32.totalorder %v652_v1, 1024  ;;  %v2860_v1 = vld [vmem:[#allocation60_spill] sm:$0xff] }
  0xb1   : > { %v969_v47 = vadd.f32 %v968_v57, %v905_v31  ;;  %vm394_vm2 = vcmp.ge.f32.partialorder %v2858_v50, 0.0  ;;  %v460_v41 = vmul.f32 %v2789_v24, %v2858_v50  ;;  %v522_v48 = vsel %vm392_vm11, %v2856_v42, %v458_v32  ;;  %v1147_v57 = vld [vmem:[%s2654_s1 + $0x2] ss:$0 sm:$0xff] }
  0xb2   : > { %v907_v25 = vsel %vm715_vm12, %v520_v61, 0.0  ;;  %v592_v59 = vadd.s32 200, %v2788_v27  ;;  %v655_v55 = vadd.s32 %v1903_v51, %v590_v21  ;;  %vm717_vm5 = vcmp.lt.s32.totalorder %v653_v49, 1024  ;;  %v2861_v49 = vld [vmem:[#allocation61_spill] sm:$0xff] }
  0xb3   : > { %v970_v22 = vadd.f32 %v969_v47, %v906_v60  ;;  %vm395_vm6 = vcmp.ge.f32.partialorder %v2859_v35, 0.0  ;;  %v461_v62 = vmul.f32 %v2789_v24, %v2859_v35  ;;  %v523_v5 = vsel %vm393_vm0, %v2857_v26, %v459_v13 }
  0xb4   : > { %v908_v3 = vsel %vm716_vm1, %v521_v40, 0.0  ;;  %v593_v33 = vadd.s32 208, %v2788_v27  ;;  %v656_v2 = vadd.s32 %v1903_v51, %v591_v20  ;;  %vm718_vm7 = vcmp.lt.s32.totalorder %v654_v30, 1024  ;;  %v2862_v30 = vld [vmem:[#allocation62_spill] sm:$0xff] }
  0xb5   : > { %v971_v36 = vadd.f32 %v970_v22, %v907_v25  ;;  %vm396_vm8 = vcmp.ge.f32.partialorder %v2860_v1, 0.0  ;;  %v462_v4 = vmul.f32 %v2789_v24, %v2860_v1  ;;  %v524_v42 = vsel %vm394_vm2, %v2858_v50, %v460_v41 }
  0xb6   : > { %v909_v32 = vsel %vm717_vm5, %v522_v48, 0.0  ;;  %v594_v61 = vadd.s32 216, %v2788_v27  ;;  %v657_v31 = vadd.s32 %v1903_v51, %v592_v59  ;;  %vm719_vm4 = vcmp.lt.s32.totalorder %v655_v55, 1024  ;;  %v2863_v55 = vld [vmem:[#allocation4_spill] sm:$0xff] }
  0xb7   : > { %v972_v21 = vadd.f32 %v971_v36, %v908_v3  ;;  %vm397_vm9 = vcmp.ge.f32.partialorder %v2861_v49, 0.0  ;;  %v463_v26 = vmul.f32 %v1147_v57, %v2861_v49  ;;  %v525_v24 = vsel %vm395_vm6, %v2859_v35, %v461_v62  ;;  %v2864_v36 = vld [vmem:[#allocation39_spill] sm:$0xff] }
  0xb8   : > { %v910_v13 = vsel %vm718_vm7, %v523_v5, 0.0  ;;  %v595_v40 = vadd.s32 224, %v2788_v27  ;;  %v658_v60 = vadd.s32 %v1903_v51, %v593_v33  ;;  %vm720_vm10 = vcmp.lt.s32.totalorder %v656_v2, 1024  ;;  %v1148_v2 = vld [vmem:[%s2654_s1 + $0x1] ss:$0 sm:$0xff] }
  0xb9   : > { %v973_v20 = vadd.f32 %v972_v21, %v909_v32  ;;  %vm398_vm13 = vcmp.ge.f32.partialorder %v2862_v30, 0.0  ;;  %v464_v47 = vmul.f32 %v1147_v57, %v2862_v30  ;;  %v526_v50 = vsel %vm396_vm8, %v2860_v1, %v462_v4  ;;  %v2865_v4 = vld [vmem:[#allocation2_spill] sm:$0xff] }
  0xba   : > { %v911_v41 = vsel %vm719_vm4, %v524_v42, 0.0  ;;  %v596_v48 = vadd.s32 232, %v2788_v27  ;;  %v659_v25 = vadd.s32 %v1903_v51, %v594_v61  ;;  %vm721_vm14 = vcmp.lt.s32.totalorder %v657_v31, 1024 }
  0xbb   : > { %v974_v59 = vadd.f32 %v973_v20, %v910_v13  ;;  %vm399_vm15 = vcmp.ge.f32.partialorder %v2863_v55, 0.0  ;;  %v465_v22 = vmul.f32 %v1147_v57, %v2863_v55  ;;  %v527_v35 = vsel %vm397_vm9, %v2861_v49, %v463_v26  ;;  %v2866_v26 = vld [vmem:[#allocation37_spill] sm:$0xff] }
  0xbc   : > { %v912_v62 = vsel %vm720_vm10, %v525_v24, 0.0  ;;  %v597_v5 = vadd.s32 240, %v2788_v27  ;;  %v660_v3 = vadd.s32 %v1903_v51, %v595_v40  ;;  %vm722_vm3 = vcmp.lt.s32.totalorder %v658_v60, 1024 }
  0xbd   : > { %v975_v33 = vadd.f32 %v974_v59, %v911_v41  ;;  %v339_v1 = vadd.f32 %v1148_v2, %v2864_v36  ;;  %v466_v42 = vmul.f32 %v1147_v57, %v2865_v4  ;;  %v528_v32 = vsel %vm398_vm13, %v2862_v30, %v464_v47  ;;  %v2867_v47 = vld [vmem:[#allocation38_spill] sm:$0xff] }
  0xbe   : > { %v913_v61 = vsel %vm721_vm14, %v526_v50, 0.0  ;;  %v598_v31 = vadd.s32 248, %v2788_v27  ;;  %v661_v21 = vadd.s32 %v1903_v51, %v596_v48  ;;  %vm723_vm11 = vcmp.lt.s32.totalorder %v659_v25, 1024 }
  0xbf   : > { %v976_v49 = vadd.f32 %v975_v33, %v912_v62  ;;  %vm400_vm12 = vcmp.ge.f32.partialorder %v2865_v4, 0.0  ;;  %v467_v24 = vmul.f32 %v1147_v57, %v2866_v26  ;;  %v529_v13 = vsel %vm399_vm15, %v2863_v55, %v465_v22 }
  0xc0   : > { %v914_v40 = vsel %vm722_vm3, %v527_v35, 0.0  ;;  %v599_v60 = vadd.s32 256, %v2788_v27  ;;  %v662_v20 = vadd.s32 %v1903_v51, %v597_v5  ;;  %vm724_vm0 = vcmp.lt.s32.totalorder %v660_v3, 1024 }
  0xc1   : > { %v977_v30 = vadd.f32 %v976_v49, %v913_v61  ;;  %vm401_vm1 = vcmp.ge.f32.partialorder %v2866_v26, 0.0  ;;  %v468_v50 = vmul.f32 %v1147_v57, %v2867_v47  ;;  %v915_v41 = vsel %vm723_vm11, %v528_v32, 0.0 }
  0xc2   : > { %v530_v48 = vsel %vm400_vm12, %v2865_v4, %v466_v42  ;;  %v663_v25 = vadd.s32 %v1903_v51, %v598_v31  ;;  %vm725_vm2 = vcmp.lt.s32.totalorder %v661_v21, 1024  ;;  %vm402_vm5 = vcmp.ge.f32.partialorder %v2867_v47, 0.0 }
  0xc3   : > { %v978_v59 = vadd.f32 %v977_v30, %v914_v40  ;;  %v469_v55 = vmul.f32 %v1147_v57, %v339_v1  ;;  %v916_v22 = vsel %vm724_vm0, %v529_v13, 0.0  ;;  %v531_v27 = vsel %vm401_vm1, %v2866_v26, %v467_v24 }
  0xc4   : > { %v664_v35 = vadd.s32 %v1903_v51, %v599_v60  ;;  %vm726_vm6 = vcmp.lt.s32.totalorder %v662_v20, 1024  ;;  %vm403_vm7 = vcmp.ge.f32.partialorder %v339_v1, 0.0  ;;  %v917_v5 = vsel %vm725_vm2, %v530_v48, 0.0 }
  0xc5   : > { %v979_v62 = vadd.f32 %v978_v59, %v915_v41  ;;  %v532_v3 = vsel %vm402_vm5, %v2867_v47, %v468_v50  ;;  %vm727_vm8 = vcmp.lt.s32.totalorder %v663_v25, 1024  ;;  %v918_v2 = vsel %vm726_vm6, %v531_v27, 0.0  ;;  %v952_v50 = vld [vmem:[%s1241_s23] sm:$0x1] }
  0xc6   : > { %v533_v36 = vsel %vm403_vm7, %v339_v1, %v469_v55  ;;  %vm728_vm4 = vcmp.lt.s32.totalorder %v664_v35, 1024  ;;  %v919_v42 = vsel %vm727_vm8, %v532_v3, 0.0 }
  0xc7   : > { %v980_v33 = vadd.f32 %v979_v62, %v916_v22  ;;  %v920_v57 = vsel %vm728_vm4, %v533_v36, 0.0 }
  0xc9   : > { %v981_v4 = vadd.f32 %v980_v33, %v917_v5 }
  0xcb   : > { %v982_v32 = vadd.f32 %v981_v4, %v918_v2 }
  0xcd   : > { %v983_v61 = vadd.f32 %v982_v32, %v919_v42 }
  0xcf   : > { %v984_v31 = vadd.f32 %v983_v61, %v920_v57 }
  0xd1   : > { %v985_v21 = vadd.f32 %v984_v31, %v2240_v44 }
  0xd3   : > { %v986_v51 = vadd.f32 %v985_v21, %v2245_v56 }
  0xd5   : > { %v987_v49 = vadd.f32 %v986_v51, %v2250_v29 }
  0xd7   : > { %v988_v26 = vadd.f32 %v987_v49, %v2255_v34 }
  0xd9   : > { %v989_v24 = vadd.f32 %v988_v26, %v2260_v43 }
  0xdb   : > { %v990_v13 = vadd.f32 %v989_v24, %v2265_v19 }
  0xdd   : > { %v991_v1 = vadd.f32 %v990_v13, %v2270_v37 }
  0xdf   : > { %v992_v40 = vadd.f32 %v991_v1, %v2275_v28 }
  0xe1   : > { %v993_v60 = vadd.f32 %v992_v40, %v2280_v0 }
  0xe3   : > { %v994_v20 = vadd.f32 %v993_v60, %v2285_v63 }
  0xe5   : > { %v995_v44 = vadd.f32 %v994_v20, %v2290_v39 }
  0xe7   : > { %v996_v56 = vadd.f32 %v995_v44, %v2295_v46 }
  0xe9   : > { %v997_v29 = vadd.f32 %v996_v56, %v2300_v18 }
  0xeb   : > { %v998_v34 = vadd.f32 %v997_v29, %v2305_v23 }
  0xed   : > { %v999_v43 = vadd.f32 %v998_v34, %v2310_v52 }
  0xef   : > { %v1000_v19 = vadd.f32 %v999_v43, %v2315_v45 }
  0xf1   : > { %v1001_v37 = vadd.f32 %v1000_v19, %v2320_v53 }
  0xf3   : > { %v1002_v28 = vadd.f32 %v1001_v37, %v2325_v54 }
  0xf5   : > { %v1003_v0 = vadd.f32 %v1002_v28, %v2330_v38 }
  0xf7   : > { %v1004_v63 = vadd.f32 %v1003_v0, %v2335_v58 }
  0xf9   : > { %v1005_v39 = vadd.f32 %v1004_v63, %v2340_v17 }
  0xfb   : > { %v1006_v46 = vadd.f32 %v1005_v39, %v2345_v16 }
  0xfd   : > { %v1007_v18 = vadd.f32 %v1006_v46, %v2350_v15 }
  0xff   : > { %v1008_v23 = vadd.f32 %v1007_v18, %v2355_v14 }
 0x101   : > { %v1009_v52 = vadd.f32 %v1008_v23, %v2360_v12 }
 0x103   : > { %v1010_v45 = vadd.f32 %v1009_v52, %v2365_v11 }
 0x105   : > { %v1011_v53 = vadd.f32 %v1010_v45, %v2370_v10 }
 0x107   : > { %v1012_v54 = vadd.f32 %v1011_v53, %v2375_v9 }
 0x109   : > { %v1013_v38 = vadd.f32 %v1012_v54, %v2380_v8 }
 0x10b   : > { %v1014_v58 = vadd.f32 %v1013_v38, %v2385_v7 }
 0x10d   : > { %v1015_v17 = vadd.f32 %v1014_v58, %v2390_v6 }
 0x10f   : > { %v1016_v16 = vrot.slane %v1015_v17, 4 }
 0x111   : > { %v1017_v30 = vadd.f32 %v1016_v16, %v1015_v17 }
 0x113   : > { %v1018_v15 = vrot.slane %v1017_v30, 2 }
 0x115   : > { %v1019_v47 = vadd.f32 %v1018_v15, %v1017_v30 }
 0x117   : > { %v1020_v14 = vrot.slane %v1019_v47, 1 }
 0x119   : > { %v1021_v41 = vadd.f32 %v1020_v14, %v1019_v47 }
 0x11b   : > { %v1022_v12 = vadd.f32 %v1021_v41, %v952_v50 }
 0x11d   : > { %1023 = vst [vmem:[%s1241_s23] sm:$0x1] %v1022_v12 }
 0x11e PF: > { %s12_s13 = sadd.s32 1, %s1187_s13   ;;  %s2868_s9 = smov %s1179_s11 }
 0x11f   : > { %p9_p8 = scmp.ge.s32.totalorder %s12_s13, 6   ;;  %s2869_s10 = smov %s1183_s12 }
 0x120   : > { %s2870_s11 = smov %s2873_s14  ;;  %s2871_s12 = smov %s2877_s15 }
 0x121   :  { %11 = sbr.rel (!%p9_p8) target bundleno = 3 (0x3), region = 62 }

// kernel: deconv_bn_act_forward.3
= control target key start
LH: loop header
LB: loop body
LE: loop exit
PB: predicated region body
PF: predicated region fallthrough
CT: control target
= control target key end

     0   :  { %s1570_s12 = smov 0   ;;  %s1572_s13 = smov 0   ;;  %s2111_s0 = inlined_call_operand.vmem [shape: f32[2048,40], index: 0, kind: input, shape index: {}]   ;;  %s2112_s1 = inlined_call_operand.vmem [shape: f32[40,128], index: 1, kind: input, shape index: {}]   ;;  %s2113_s2 = inlined_call_operand.vmem [shape: f32[2048,128], index: 2, kind: output, shape index: {0}]   ;;  %s2114_s3 = inlined_call_operand.vmem [shape: f32[4,2,128], index: 3, kind: output, shape index: {1}]  }
   0x1   :  { %s1574_s14 = smov 0  }
   0x2 LB: > { %s26_s15 = sadd.s32 1, %s1544_s13  ;;  %p1415_p0 = scmp.ge.s32.totalorder %s1548_s14, 1  ;;  %s1548_s14 = sphi %s1574_s14, %s14_s14   ;;  %s1544_s13 = sphi %s1572_s13, %s2116_s13   ;;  %s1540_s12 = sphi %s1570_s12, %s2115_s12  }
   0x3   : > { %p28_p1 = scmp.ge.s32.totalorder %s26_s15, 4  ;;  %p169_p2 = scmp.lt.s32.totalorder %s1548_s14, 5 }
   0x5   : > { %s2118_s15 = smov (%p28_p1, %s26_s15), 0  ;;  %p170_p3 = pnand %p1415_p0, %p169_p2 }
   0x6   : > { %s1416_s20 = sshll.u32 (!%p170_p3), %s1540_s12, 6  ;;  %p226_p5 = scmp.lt.s32.totalorder (!%p170_p3), %s1540_s12, 3 }
   0x7   : > { %173 = sbr.rel (%p170_p3) target bundleno = 381 (0x17d), region = 28  ;;  %p206_p4 = scmp.lt.s32.totalorder (!%p170_p3), %s1416_s20, 255 }
   0xc   : > { %v430_v0 = vld [vmem:[%s2112_s1 + $0x20] sm:$0xff]  ;;  %v429_v1 = vld [vmem:[%s2112_s1 + $0x18] sm:$0xff]  ;;  %v428_v2 = vld [vmem:[%s2112_s1 + $0x10] sm:$0xff]  ;;  %s2120_s20 = smov (!%p206_p4, %s1416_s20), 255  ;;  %vm431_vm0 = vcmask 326656   ;;  %s2122_s12 = smov (!%p226_p5, %s1540_s12), 3 }
   0xd   : > { %635 = vmatpush.msra.mxu0 %v430_v0  ;;  %1487 = vmatpush.msra.mxu1 %v430_v0  ;;  %v427_v3 = vld [vmem:[%s2112_s1 + $0x8] sm:$0xff]  ;;  %s1417_s25 = sshll.u32 %s2120_s20, 3  ;;  %v426_v4 = vld [vmem:[%s2112_s1] sm:$0xff]  ;;  %s1420_s7 = sshll.u32 %s2122_s12, 1 }
   0xe   : > { %1488 = vmatpush.msra.mxu2 %v430_v0  ;;  %1489 = vmatpush.msra.mxu3 %v430_v0  ;;  %s1614_s30 = scalar_lea.vmem %s2111_s0, %s1417_s25  ;;  %s1729_s6 = scalar_lea.vmem %s2113_s2, %s1417_s25 }
   0xf   : > { %636 = vmatpush.msra.mxu0 %v429_v1  ;;  %1490 = vmatpush.msra.mxu1 %v429_v1  ;;  %v362_v5 = vld [vmem:[%s1614_s30] sm:$0xff]  ;;  %v363_v7 = vld [vmem:[%s1614_s30 + $0x8] sm:$0xff]  ;;  %v364_v9 = vld [vmem:[%s1614_s30 + $0x10] sm:$0xff]  ;;  %s229_s10 = scalar_lea.vmem %s2114_s3, %s1420_s7 }
  0x10   : > { %1491 = vmatpush.msra.mxu2 %v429_v1  ;;  %1492 = vmatpush.msra.mxu3 %v429_v1  ;;  %v378_v6 = vld [vmem:[%s1614_s30 + $0x80] sm:$0xff]  ;;  %v379_v8 = vld [vmem:[%s1614_s30 + $0x88] sm:$0xff]  ;;  %v380_v10 = vld [vmem:[%s1614_s30 + $0x90] sm:$0xff] }
  0x11   : > { %637 = vmatpush.msra.mxu0 %v428_v2  ;;  %1493 = vmatpush.msra.mxu1 %v428_v2  ;;  %v365_v11 = vld [vmem:[%s1614_s30 + $0x18] sm:$0xff]  ;;  %v394_v13 = vld [vmem:[%s1614_s30 + $0x100] sm:$0xff]  ;;  %v395_v16 = vld [vmem:[%s1614_s30 + $0x108] sm:$0xff] }
  0x12   : > { %1494 = vmatpush.msra.mxu2 %v428_v2  ;;  %1495 = vmatpush.msra.mxu3 %v428_v2  ;;  %v381_v12 = vld [vmem:[%s1614_s30 + $0x98] sm:$0xff]  ;;  %v366_v14 = vld [vmem:[%s1614_s30 + $0x20] sm:$0xff]  ;;  %v367_v17 = vld [vmem:[%s1614_s30 + $0x28] sm:$0xff] }
  0x13   : > { %638 = vmatpush.msra.mxu0 %v427_v3  ;;  %1496 = vmatpush.msra.mxu1 %v427_v3  ;;  %v382_v15 = vld [vmem:[%s1614_s30 + $0xa0] sm:$0xff]  ;;  %v383_v18 = vld [vmem:[%s1614_s30 + $0xa8] sm:$0xff]  ;;  %v396_v19 = vld [vmem:[%s1614_s30 + $0x110] sm:$0xff] }
  0x14   : > { %1497 = vmatpush.msra.mxu2 %v427_v3  ;;  %1498 = vmatpush.msra.mxu3 %v427_v3  ;;  %v368_v20 = vld [vmem:[%s1614_s30 + $0x30] sm:$0xff]  ;;  %v397_v22 = vld [vmem:[%s1614_s30 + $0x118] sm:$0xff]  ;;  %v398_v25 = vld [vmem:[%s1614_s30 + $0x120] sm:$0xff] }
  0x15   : > { %639 = vmatpush.msra.mxu0 %v426_v4  ;;  %1499 = vmatpush.msra.mxu1 %v426_v4  ;;  %v384_v21 = vld [vmem:[%s1614_s30 + $0xb0] sm:$0xff]  ;;  %v369_v23 = vld [vmem:[%s1614_s30 + $0x38] sm:$0xff]  ;;  %v410_v26 = vld [vmem:[%s1614_s30 + $0x180] sm:$0xff] }
  0x16   : > { %1421 = vmatmul.msk.f32.vlgmr.msra.gmra.mxu0 %vm431_vm0, %v362_v5  ;;  %1437 = vmatmul.msk.f32.vlgmr.msra.gmra.mxu1 %vm431_vm0, %v378_v6  ;;  %v385_v24 = vld [vmem:[%s1614_s30 + $0xb8] sm:$0xff]  ;;  %v370_v27 = vld [vmem:[%s1614_s30 + $0x40] sm:$0xff]  ;;  %v399_v29 = vld [vmem:[%s1614_s30 + $0x128] sm:$0xff] }
  0x17   : > { %1500 = vmatpush.msra.mxu2 %v426_v4  ;;  %1501 = vmatpush.msra.mxu3 %v426_v4  ;;  %v386_v28 = vld [vmem:[%s1614_s30 + $0xc0] sm:$0xff]  ;;  %v411_v30 = vld [vmem:[%s1614_s30 + $0x188] sm:$0xff]  ;;  %v400_v33 = vld [vmem:[%s1614_s30 + $0x130] sm:$0xff] }
  0x18   : > { %1453 = vmatmul.msk.f32.vlgmr.msra.gmra.mxu2 %vm431_vm0, %v394_v13  ;;  %1469 = vmatmul.msk.f32.vlgmr.msra.gmra.mxu3 %vm431_vm0, %v410_v26  ;;  %v371_v31 = vld [vmem:[%s1614_s30 + $0x48] sm:$0xff]  ;;  %v412_v34 = vld [vmem:[%s1614_s30 + $0x190] sm:$0xff]  ;;  %v401_v37 = vld [vmem:[%s1614_s30 + $0x138] sm:$0xff] }
  0x19   : > { %v387_v32 = vld [vmem:[%s1614_s30 + $0xc8] sm:$0xff]  ;;  %v372_v35 = vld [vmem:[%s1614_s30 + $0x50] sm:$0xff]  ;;  %v413_v38 = vld [vmem:[%s1614_s30 + $0x198] sm:$0xff] }
  0x1a   : > { %v388_v36 = vld [vmem:[%s1614_s30 + $0xd0] sm:$0xff]  ;;  %v373_v39 = vld [vmem:[%s1614_s30 + $0x58] sm:$0xff]  ;;  %v402_v41 = vld [vmem:[%s1614_s30 + $0x140] sm:$0xff] }
  0x1b   : > { %v389_v40 = vld [vmem:[%s1614_s30 + $0xd8] sm:$0xff]  ;;  %v414_v42 = vld [vmem:[%s1614_s30 + $0x1a0] sm:$0xff]  ;;  %v403_v45 = vld [vmem:[%s1614_s30 + $0x148] sm:$0xff] }
  0x1c   : > { %v374_v43 = vld [vmem:[%s1614_s30 + $0x60] sm:$0xff]  ;;  %v415_v46 = vld [vmem:[%s1614_s30 + $0x1a8] sm:$0xff]  ;;  %v404_v49 = vld [vmem:[%s1614_s30 + $0x150] sm:$0xff] }
  0x1d   : > { %v390_v44 = vld [vmem:[%s1614_s30 + $0xe0] sm:$0xff]  ;;  %v375_v47 = vld [vmem:[%s1614_s30 + $0x68] sm:$0xff]  ;;  %v416_v50 = vld [vmem:[%s1614_s30 + $0x1b0] sm:$0xff] }
  0x1e   : > { %1422 = vmatmul.msk.f32.gmra.mxu0 %vm431_vm0, %v363_v7  ;;  %1438 = vmatmul.msk.f32.gmra.mxu1 %vm431_vm0, %v379_v8  ;;  %v391_v48 = vld [vmem:[%s1614_s30 + $0xe8] sm:$0xff]  ;;  %v376_v51 = vld [vmem:[%s1614_s30 + $0x70] sm:$0xff]  ;;  %v405_v53 = vld [vmem:[%s1614_s30 + $0x158] sm:$0xff] }
  0x1f   : > { %v392_v52 = vld [vmem:[%s1614_s30 + $0xf0] sm:$0xff]  ;;  %v417_v54 = vld [vmem:[%s1614_s30 + $0x1b8] sm:$0xff]  ;;  %v406_v57 = vld [vmem:[%s1614_s30 + $0x160] sm:$0xff] }
  0x20   : > { %1454 = vmatmul.msk.f32.gmra.mxu2 %vm431_vm0, %v395_v16  ;;  %1470 = vmatmul.msk.f32.gmra.mxu3 %vm431_vm0, %v411_v30  ;;  %v377_v55 = vld [vmem:[%s1614_s30 + $0x78] sm:$0xff]  ;;  %v418_v58 = vld [vmem:[%s1614_s30 + $0x1c0] sm:$0xff]  ;;  %v407_v61 = vld [vmem:[%s1614_s30 + $0x168] sm:$0xff] }
  0x21   : > { %v393_v56 = vld [vmem:[%s1614_s30 + $0xf8] sm:$0xff]  ;;  %v419_v62 = vld [vmem:[%s1614_s30 + $0x1c8] sm:$0xff]  ;;  %v408_v5 = vld [vmem:[%s1614_s30 + $0x170] sm:$0xff] }
  0x22   : > { %v420_v6 = vld [vmem:[%s1614_s30 + $0x1d0] sm:$0xff]  ;;  %v421_v13 = vld [vmem:[%s1614_s30 + $0x1d8] sm:$0xff]  ;;  %v423_v26 = vld [vmem:[%s1614_s30 + $0x1e8] sm:$0xff] }
  0x23   : > { %v424_v30 = vld [vmem:[%s1614_s30 + $0x1f0] sm:$0xff] }
  0x26   : > { %1423 = vmatmul.msk.f32.gmra.mxu0 %vm431_vm0, %v364_v9  ;;  %1439 = vmatmul.msk.f32.gmra.mxu1 %vm431_vm0, %v380_v10 }
  0x28   : > { %1455 = vmatmul.msk.f32.gmra.mxu2 %vm431_vm0, %v396_v19  ;;  %1471 = vmatmul.msk.f32.gmra.mxu3 %vm431_vm0, %v412_v34  ;;  %v422_v19 = vld [vmem:[%s1614_s30 + $0x1e0] sm:$0xff]  ;;  %v425_v34 = vld [vmem:[%s1614_s30 + $0x1f8] sm:$0xff] }
  0x2e   : > { %1424 = vmatmul.msk.f32.gmra.mxu0 %vm431_vm0, %v365_v11  ;;  %1440 = vmatmul.msk.f32.gmra.mxu1 %vm431_vm0, %v381_v12  ;;  %v409_v12 = vld [vmem:[%s1614_s30 + $0x178] sm:$0xff] }
  0x30   : > { %1456 = vmatmul.msk.f32.gmra.mxu2 %vm431_vm0, %v397_v22  ;;  %1472 = vmatmul.msk.f32.gmra.mxu3 %vm431_vm0, %v413_v38 }
  0x36   : > { %1425 = vmatmul.msk.f32.gmra.mxu0 %vm431_vm0, %v366_v14  ;;  %1441 = vmatmul.msk.f32.gmra.mxu1 %vm431_vm0, %v382_v15 }
  0x38   : > { %1457 = vmatmul.msk.f32.gmra.mxu2 %vm431_vm0, %v398_v25  ;;  %1473 = vmatmul.msk.f32.gmra.mxu3 %vm431_vm0, %v414_v42 }
  0x3e   : > { %1426 = vmatmul.msk.f32.gmra.mxu0 %vm431_vm0, %v367_v17  ;;  %1442 = vmatmul.msk.f32.gmra.mxu1 %vm431_vm0, %v383_v18 }
  0x40   : > { %1458 = vmatmul.msk.f32.gmra.mxu2 %vm431_vm0, %v399_v29  ;;  %1474 = vmatmul.msk.f32.gmra.mxu3 %vm431_vm0, %v415_v46 }
  0x46   : > { %1427 = vmatmul.msk.f32.gmra.mxu0 %vm431_vm0, %v368_v20  ;;  %1443 = vmatmul.msk.f32.gmra.mxu1 %vm431_vm0, %v384_v21 }
  0x48   : > { %1459 = vmatmul.msk.f32.gmra.mxu2 %vm431_vm0, %v400_v33  ;;  %1475 = vmatmul.msk.f32.gmra.mxu3 %vm431_vm0, %v416_v50 }
  0x4e   : > { %1428 = vmatmul.msk.f32.gmra.mxu0 %vm431_vm0, %v369_v23  ;;  %1444 = vmatmul.msk.f32.gmra.mxu1 %vm431_vm0, %v385_v24 }
  0x50   : > { %1460 = vmatmul.msk.f32.gmra.mxu2 %vm431_vm0, %v401_v37  ;;  %1476 = vmatmul.msk.f32.gmra.mxu3 %vm431_vm0, %v417_v54 }
  0x56   : > { %1429 = vmatmul.msk.f32.gmra.mxu0 %vm431_vm0, %v370_v27  ;;  %1445 = vmatmul.msk.f32.gmra.mxu1 %vm431_vm0, %v386_v28 }
  0x58   : > { %1461 = vmatmul.msk.f32.gmra.mxu2 %vm431_vm0, %v402_v41  ;;  %1477 = vmatmul.msk.f32.gmra.mxu3 %vm431_vm0, %v418_v58 }
  0x5e   : > { %1430 = vmatmul.msk.f32.gmra.mxu0 %vm431_vm0, %v371_v31  ;;  %1446 = vmatmul.msk.f32.gmra.mxu1 %vm431_vm0, %v387_v32 }
  0x60   : > { %1462 = vmatmul.msk.f32.gmra.mxu2 %vm431_vm0, %v403_v45  ;;  %1478 = vmatmul.msk.f32.gmra.mxu3 %vm431_vm0, %v419_v62 }
  0x66   : > { %1431 = vmatmul.msk.f32.gmra.mxu0 %vm431_vm0, %v372_v35  ;;  %1447 = vmatmul.msk.f32.gmra.mxu1 %vm431_vm0, %v388_v36 }
  0x68   : > { %1463 = vmatmul.msk.f32.gmra.mxu2 %vm431_vm0, %v404_v49  ;;  %1479 = vmatmul.msk.f32.gmra.mxu3 %vm431_vm0, %v420_v6 }
  0x6e   : > { %1432 = vmatmul.msk.f32.gmra.mxu0 %vm431_vm0, %v373_v39  ;;  %1448 = vmatmul.msk.f32.gmra.mxu1 %vm431_vm0, %v389_v40 }
  0x70   : > { %1464 = vmatmul.msk.f32.gmra.mxu2 %vm431_vm0, %v405_v53  ;;  %1480 = vmatmul.msk.f32.gmra.mxu3 %vm431_vm0, %v421_v13 }
  0x76   : > { %1433 = vmatmul.msk.f32.gmra.mxu0 %vm431_vm0, %v374_v43  ;;  %1449 = vmatmul.msk.f32.gmra.mxu1 %vm431_vm0, %v390_v44 }
  0x78   : > { %1465 = vmatmul.msk.f32.gmra.mxu2 %vm431_vm0, %v406_v57  ;;  %1481 = vmatmul.msk.f32.gmra.mxu3 %vm431_vm0, %v422_v19 }
  0x7e   : > { %1434 = vmatmul.msk.f32.gmra.mxu0 %vm431_vm0, %v375_v47  ;;  %1450 = vmatmul.msk.f32.gmra.mxu1 %vm431_vm0, %v391_v48 }
  0x80   : > { %1466 = vmatmul.msk.f32.gmra.mxu2 %vm431_vm0, %v407_v61  ;;  %1482 = vmatmul.msk.f32.gmra.mxu3 %vm431_vm0, %v423_v26 }
  0x86   : > { %1435 = vmatmul.msk.f32.gmra.mxu0 %vm431_vm0, %v376_v51  ;;  %1451 = vmatmul.msk.f32.gmra.mxu1 %vm431_vm0, %v392_v52 }
  0x88   : > { %1467 = vmatmul.msk.f32.gmra.mxu2 %vm431_vm0, %v408_v5  ;;  %1483 = vmatmul.msk.f32.gmra.mxu3 %vm431_vm0, %v424_v30 }
  0x8e   : > { %1436 = vmatmul.msk.f32.gmra.mxu0 %vm431_vm0, %v377_v55  ;;  %1452 = vmatmul.msk.f32.gmra.mxu1 %vm431_vm0, %v393_v56 }
  0x90   : > { %1468 = vmatmul.msk.f32.gmra.mxu2 %vm431_vm0, %v409_v12  ;;  %1484 = vmatmul.msk.f32.gmra.mxu3 %vm431_vm0, %v425_v34 }
  0x93   : > { %v641_v59 = vpop.f32.mrf.mxu0  ;;  %v1731_v60 = vpop.f32.mrf.mxu1 }
  0x94   : > { %1028 = vst [vmem:[%s1729_s6] sm:$0xff] %v641_v59  ;;  %v1162_v1 = vmul.f32 %v641_v59, %v641_v59 }
  0x95   : > { %1044 = vst [vmem:[%s1729_s6 + $0x80] sm:$0xff] %v1731_v60 }
  0x9b   : > { %v644_v63 = vpop.f32.mrf.mxu0  ;;  %v1740_v0 = vpop.f32.mrf.mxu1 }
  0x9c   : > { %1029 = vst [vmem:[%s1729_s6 + $0x8] sm:$0xff] %v644_v63  ;;  %v1092_v2 = vadd.f32 %v644_v63, %v641_v59  ;;  %v1163_v3 = vmul.f32 %v644_v63, %v644_v63  ;;  %v1770_v24 = vpop.f32.mrf.mxu2  ;;  %v1819_v41 = vpop.f32.mrf.mxu3 }
  0x9d   : > { %1045 = vst [vmem:[%s1729_s6 + $0x88] sm:$0xff] %v1740_v0 }
  0x9e   : > { %v1226_v4 = vadd.f32 %v1163_v3, %v1162_v1  ;;  %1060 = vst [vmem:[%s1729_s6 + $0x100] sm:$0xff] %v1770_v24 }
  0x9f   : > { %1076 = vst [vmem:[%s1729_s6 + $0x180] sm:$0xff] %v1819_v41 }
  0xa3   : > { %v647_v7 = vpop.f32.mrf.mxu0  ;;  %v1749_v8 = vpop.f32.mrf.mxu1 }
  0xa4   : > { %1030 = vst [vmem:[%s1729_s6 + $0x10] sm:$0xff] %v647_v7  ;;  %v1093_v9 = vadd.f32 %v1092_v2, %v647_v7  ;;  %v1164_v10 = vmul.f32 %v647_v7, %v647_v7  ;;  %v1786_v29 = vpop.f32.mrf.mxu2  ;;  %v1832_v45 = vpop.f32.mrf.mxu3 }
  0xa5   : > { %1046 = vst [vmem:[%s1729_s6 + $0x90] sm:$0xff] %v1749_v8 }
  0xa6   : > { %v1227_v11 = vadd.f32 %v1226_v4, %v1164_v10  ;;  %1061 = vst [vmem:[%s1729_s6 + $0x108] sm:$0xff] %v1786_v29 }
  0xa7   : > { %1077 = vst [vmem:[%s1729_s6 + $0x188] sm:$0xff] %v1832_v45 }
  0xab   : > { %v650_v14 = vpop.f32.mrf.mxu0  ;;  %v1758_v15 = vpop.f32.mrf.mxu1 }
  0xac   : > { %1031 = vst [vmem:[%s1729_s6 + $0x18] sm:$0xff] %v650_v14  ;;  %v1094_v16 = vadd.f32 %v1093_v9, %v650_v14  ;;  %v1165_v17 = vmul.f32 %v650_v14, %v650_v14  ;;  %v1797_v33 = vpop.f32.mrf.mxu2  ;;  %v1845_v49 = vpop.f32.mrf.mxu3 }
  0xad   : > { %1047 = vst [vmem:[%s1729_s6 + $0x98] sm:$0xff] %v1758_v15 }
  0xae   : > { %v1228_v18 = vadd.f32 %v1227_v11, %v1165_v17  ;;  %1062 = vst [vmem:[%s1729_s6 + $0x110] sm:$0xff] %v1797_v33 }
  0xaf   : > { %1078 = vst [vmem:[%s1729_s6 + $0x190] sm:$0xff] %v1845_v49 }
  0xb3   : > { %v653_v20 = vpop.f32.mrf.mxu0  ;;  %v1765_v21 = vpop.f32.mrf.mxu1 }
  0xb4   : > { %1032 = vst [vmem:[%s1729_s6 + $0x20] sm:$0xff] %v653_v20  ;;  %v1768_v22 = vadd.f32 %v1094_v16, %v653_v20  ;;  %v1166_v23 = vmul.f32 %v653_v20, %v653_v20  ;;  %v1808_v37 = vpop.f32.mrf.mxu2  ;;  %v1858_v53 = vpop.f32.mrf.mxu3 }
  0xb5   : > { %1048 = vst [vmem:[%s1729_s6 + $0xa0] sm:$0xff] %v1765_v21 }
  0xb6   : > { %v1774_v25 = vadd.f32 %v1228_v18, %v1166_v23  ;;  %1063 = vst [vmem:[%s1729_s6 + $0x118] sm:$0xff] %v1808_v37 }
  0xb7   : > { %1079 = vst [vmem:[%s1729_s6 + $0x198] sm:$0xff] %v1858_v53 }
  0xbb   : > { %v1780_v27 = vpop.f32.mrf.mxu0  ;;  %v1782_v28 = vpop.f32.mrf.mxu1 }
  0xbc   : > { %1033 = vst [vmem:[%s1729_s6 + $0x28] sm:$0xff] %v1780_v27  ;;  %v1817_v40 = vpop.f32.mrf.mxu2  ;;  %v1871_v57 = vpop.f32.mrf.mxu3  ;;  %v1167_v58 = vmul.f32 %v1780_v27, %v1780_v27  ;;  %v1096_v59 = vadd.f32 %v1768_v22, %v1780_v27 }
  0xbd   : > { %1049 = vst [vmem:[%s1729_s6 + $0xa8] sm:$0xff] %v1782_v28 }
  0xbe   : > { %1064 = vst [vmem:[%s1729_s6 + $0x120] sm:$0xff] %v1817_v40  ;;  %v1230_v62 = vadd.f32 %v1774_v25, %v1167_v58 }
  0xbf   : > { %1080 = vst [vmem:[%s1729_s6 + $0x1a0] sm:$0xff] %v1871_v57 }
  0xc3   : > { %v659_v31 = vpop.f32.mrf.mxu0  ;;  %v1794_v32 = vpop.f32.mrf.mxu1 }
  0xc4   : > { %1034 = vst [vmem:[%s1729_s6 + $0x30] sm:$0xff] %v659_v31  ;;  %v1830_v44 = vpop.f32.mrf.mxu2  ;;  %v1168_v61 = vmul.f32 %v659_v31, %v659_v31  ;;  %v1097_v63 = vadd.f32 %v1096_v59, %v659_v31  ;;  %v1889_v9 = vpop.f32.mrf.mxu3 }
  0xc5   : > { %1050 = vst [vmem:[%s1729_s6 + $0xb0] sm:$0xff] %v1794_v32 }
  0xc6   : > { %1065 = vst [vmem:[%s1729_s6 + $0x128] sm:$0xff] %v1830_v44  ;;  %v1231_v4 = vadd.f32 %v1230_v62, %v1168_v61 }
  0xc7   : > { %1081 = vst [vmem:[%s1729_s6 + $0x1a8] sm:$0xff] %v1889_v9 }
  0xcb   : > { %v662_v35 = vpop.f32.mrf.mxu0  ;;  %v1805_v36 = vpop.f32.mrf.mxu1 }
  0xcc   : > { %1035 = vst [vmem:[%s1729_s6 + $0x38] sm:$0xff] %v662_v35  ;;  %v1843_v48 = vpop.f32.mrf.mxu2  ;;  %v1169_v1 = vmul.f32 %v662_v35, %v662_v35  ;;  %v1098_v5 = vadd.f32 %v1097_v63, %v662_v35  ;;  %v1902_v30 = vpop.f32.mrf.mxu3 }
  0xcd   : > { %1051 = vst [vmem:[%s1729_s6 + $0xb8] sm:$0xff] %v1805_v36 }
  0xce   : > { %1066 = vst [vmem:[%s1729_s6 + $0x130] sm:$0xff] %v1843_v48  ;;  %v1232_v10 = vadd.f32 %v1231_v4, %v1169_v1 }
  0xcf   : > { %1082 = vst [vmem:[%s1729_s6 + $0x1b0] sm:$0xff] %v1902_v30 }
  0xd3   : > { %v665_v38 = vpop.f32.mrf.mxu0  ;;  %v1814_v39 = vpop.f32.mrf.mxu1 }
  0xd4   : > { %1036 = vst [vmem:[%s1729_s6 + $0x40] sm:$0xff] %v665_v38  ;;  %v1856_v52 = vpop.f32.mrf.mxu2  ;;  %v1170_v6 = vmul.f32 %v665_v38, %v665_v38  ;;  %v1099_v11 = vadd.f32 %v1098_v5, %v665_v38  ;;  %v1915_v4 = vpop.f32.mrf.mxu3 }
  0xd5   : > { %1052 = vst [vmem:[%s1729_s6 + $0xc0] sm:$0xff] %v1814_v39 }
  0xd6   : > { %1067 = vst [vmem:[%s1729_s6 + $0x138] sm:$0xff] %v1856_v52  ;;  %v1233_v13 = vadd.f32 %v1232_v10, %v1170_v6  ;;  %v1179_v10 = vmul.f32 %v1740_v0, %v1740_v0 }
  0xd7   : > { %1083 = vst [vmem:[%s1729_s6 + $0x1b8] sm:$0xff] %v1915_v4 }
  0xdb   : > { %v668_v42 = vpop.f32.mrf.mxu0  ;;  %v1827_v43 = vpop.f32.mrf.mxu1 }
  0xdc   : > { %1037 = vst [vmem:[%s1729_s6 + $0x48] sm:$0xff] %v668_v42  ;;  %v1869_v56 = vpop.f32.mrf.mxu2  ;;  %v1171_v12 = vmul.f32 %v668_v42, %v668_v42  ;;  %v1100_v14 = vadd.f32 %v1099_v11, %v668_v42 }
  0xdd   : > { %1053 = vst [vmem:[%s1729_s6 + $0xc8] sm:$0xff] %v1827_v43 }
  0xde   : > { %1068 = vst [vmem:[%s1729_s6 + $0x140] sm:$0xff] %v1869_v56  ;;  %v1234_v17 = vadd.f32 %v1233_v13, %v1171_v12  ;;  %v1180_v13 = vmul.f32 %v1749_v8, %v1749_v8 }
  0xe3   : > { %v671_v46 = vpop.f32.mrf.mxu0  ;;  %v1840_v47 = vpop.f32.mrf.mxu1 }
  0xe4   : > { %1038 = vst [vmem:[%s1729_s6 + $0x50] sm:$0xff] %v671_v46  ;;  %v1887_v7 = vpop.f32.mrf.mxu2  ;;  %v1172_v16 = vmul.f32 %v671_v46, %v671_v46  ;;  %v1101_v18 = vadd.f32 %v1100_v14, %v671_v46 }
  0xe5   : > { %1054 = vst [vmem:[%s1729_s6 + $0xd0] sm:$0xff] %v1840_v47 }
  0xe6   : > { %1069 = vst [vmem:[%s1729_s6 + $0x148] sm:$0xff] %v1887_v7  ;;  %v1235_v23 = vadd.f32 %v1234_v17, %v1172_v16 }
  0xeb   : > { %v674_v50 = vpop.f32.mrf.mxu0  ;;  %v1853_v51 = vpop.f32.mrf.mxu1 }
  0xec   : > { %1039 = vst [vmem:[%s1729_s6 + $0x58] sm:$0xff] %v674_v50  ;;  %v1173_v19 = vmul.f32 %v674_v50, %v674_v50  ;;  %v1102_v25 = vadd.f32 %v1101_v18, %v674_v50  ;;  %v1900_v27 = vpop.f32.mrf.mxu2 }
  0xed   : > { %1055 = vst [vmem:[%s1729_s6 + $0xd8] sm:$0xff] %v1853_v51 }
  0xee   : > { %v1236_v31 = vadd.f32 %v1235_v23, %v1173_v19  ;;  %1070 = vst [vmem:[%s1729_s6 + $0x150] sm:$0xff] %v1900_v27 }
  0xf3   : > { %v677_v54 = vpop.f32.mrf.mxu0  ;;  %v1866_v55 = vpop.f32.mrf.mxu1 }
  0xf4   : > { %1040 = vst [vmem:[%s1729_s6 + $0x60] sm:$0xff] %v677_v54  ;;  %v1174_v26 = vmul.f32 %v677_v54, %v677_v54  ;;  %v1103_v34 = vadd.f32 %v1102_v25, %v677_v54  ;;  %v1913_v1 = vpop.f32.mrf.mxu2 }
  0xf5   : > { %1056 = vst [vmem:[%s1729_s6 + $0xe0] sm:$0xff] %v1866_v55 }
  0xf6   : > { %v1237_v38 = vadd.f32 %v1236_v31, %v1174_v26  ;;  %1071 = vst [vmem:[%s1729_s6 + $0x158] sm:$0xff] %v1913_v1  ;;  %v1184_v31 = vmul.f32 %v1794_v32, %v1794_v32 }
  0xfb   : > { %v680_v2 = vpop.f32.mrf.mxu0  ;;  %v1884_v3 = vpop.f32.mrf.mxu1 }
  0xfc   : > { %1041 = vst [vmem:[%s1729_s6 + $0x68] sm:$0xff] %v680_v2  ;;  %v1175_v35 = vmul.f32 %v680_v2, %v680_v2  ;;  %v1104_v42 = vadd.f32 %v1103_v34, %v680_v2  ;;  %v1178_v2 = vmul.f32 %v1731_v60, %v1731_v60  ;;  %v1935_v19 = vpop.f32.mrf.mxu2 }
  0xfd   : > { %1057 = vst [vmem:[%s1729_s6 + $0xe8] sm:$0xff] %v1884_v3 }
  0xfe   : > { %v1238_v50 = vadd.f32 %v1237_v38, %v1175_v35  ;;  %1072 = vst [vmem:[%s1729_s6 + $0x160] sm:$0xff] %v1935_v19  ;;  %v1185_v38 = vmul.f32 %v1805_v36, %v1805_v36 }
 0x103   : > { %v683_v20 = vpop.f32.mrf.mxu0  ;;  %v1897_v22 = vpop.f32.mrf.mxu1 }
 0x104   : > { %1042 = vst [vmem:[%s1729_s6 + $0x70] sm:$0xff] %v683_v20  ;;  %v1176_v46 = vmul.f32 %v683_v20, %v683_v20  ;;  %v1105_v58 = vadd.f32 %v1104_v42, %v683_v20  ;;  %v1937_v20 = vpop.f32.mrf.mxu3 }
 0x105   : > { %1058 = vst [vmem:[%s1729_s6 + $0xf0] sm:$0xff] %v1897_v22 }
 0x106   : > { %v1239_v62 = vadd.f32 %v1238_v50, %v1176_v46  ;;  %1084 = vst [vmem:[%s1729_s6 + $0x1c0] sm:$0xff] %v1937_v20  ;;  %v1955_v46 = vpop.f32.mrf.mxu2 }
 0x107   : > { %1073 = vst [vmem:[%s1729_s6 + $0x168] sm:$0xff] %v1955_v46 }
 0x10b   : > { %v686_v59 = vpop.f32.mrf.mxu0  ;;  %v1910_v61 = vpop.f32.mrf.mxu1 }
 0x10c   : > { %1043 = vst [vmem:[%s1729_s6 + $0x78] sm:$0xff] %v686_v59  ;;  %v1106_v63 = vadd.f32 %v1105_v58, %v686_v59  ;;  %v1177_v54 = vmul.f32 %v686_v59, %v686_v59  ;;  %v1957_v50 = vpop.f32.mrf.mxu3 }
 0x10d   : > { %1059 = vst [vmem:[%s1729_s6 + $0xf8] sm:$0xff] %v1910_v61 }
 0x10e   : > { %v1107_v5 = vadd.f32 %v1106_v63, %v1731_v60  ;;  %v1240_v6 = vadd.f32 %v1239_v62, %v1177_v54  ;;  %v1181_v60 = vmul.f32 %v1758_v15, %v1758_v15  ;;  %1085 = vst [vmem:[%s1729_s6 + $0x1c8] sm:$0xff] %v1957_v50  ;;  %v1188_v63 = vmul.f32 %v1840_v47, %v1840_v47 }
 0x110   : > { %v1108_v11 = vadd.f32 %v1107_v5, %v1740_v0  ;;  %v1241_v12 = vadd.f32 %v1240_v6, %v1178_v2  ;;  %v1182_v0 = vmul.f32 %v1765_v21, %v1765_v21 }
 0x112   : > { %v1109_v14 = vadd.f32 %v1108_v11, %v1749_v8  ;;  %v1242_v16 = vadd.f32 %v1241_v12, %v1179_v10  ;;  %v1975_v10 = vpop.f32.mrf.mxu2 }
 0x113   : > { %1074 = vst [vmem:[%s1729_s6 + $0x170] sm:$0xff] %v1975_v10 }
 0x114   : > { %v1110_v17 = vadd.f32 %v1109_v14, %v1758_v15  ;;  %v1243_v18 = vadd.f32 %v1242_v16, %v1180_v13  ;;  %v1183_v15 = vmul.f32 %v1782_v28, %v1782_v28  ;;  %v1977_v11 = vpop.f32.mrf.mxu3  ;;  %v1191_v14 = vmul.f32 %v1884_v3, %v1884_v3 }
 0x115   : > { %1086 = vst [vmem:[%s1729_s6 + $0x1d0] sm:$0xff] %v1977_v11 }
 0x116   : > { %v1111_v23 = vadd.f32 %v1110_v17, %v1765_v21  ;;  %v1244_v8 = vadd.f32 %v1243_v18, %v1181_v60  ;;  %v1192_v17 = vmul.f32 %v1897_v22, %v1897_v22  ;;  %v1193_v18 = vmul.f32 %v1910_v61, %v1910_v61 }
 0x118   : > { %v1112_v25 = vadd.f32 %v1111_v23, %v1782_v28  ;;  %v1245_v26 = vadd.f32 %v1244_v8, %v1182_v0  ;;  %v1186_v28 = vmul.f32 %v1814_v39, %v1814_v39 }
 0x11a   : > { %v1246_v34 = vadd.f32 %v1245_v26, %v1183_v15  ;;  %v1113_v35 = vadd.f32 %v1112_v25, %v1794_v32  ;;  %v1187_v32 = vmul.f32 %v1827_v43, %v1827_v43  ;;  %v782_v23 = vpop.f32.mrf.mxu2 }
 0x11b   : > { %1075 = vst [vmem:[%s1729_s6 + $0x178] sm:$0xff] %v782_v23 }
 0x11c   : > { %v1114_v21 = vadd.f32 %v1113_v35, %v1805_v36  ;;  %v1247_v42 = vadd.f32 %v1246_v34, %v1184_v31  ;;  %v1995_v8 = vpop.f32.mrf.mxu3 }
 0x11d   : > { %1087 = vst [vmem:[%s1729_s6 + $0x1d8] sm:$0xff] %v1995_v8 }
 0x11e   : > { %v1115_v58 = vadd.f32 %v1114_v21, %v1814_v39  ;;  %v1248_v59 = vadd.f32 %v1247_v42, %v1185_v38  ;;  %v1189_v39 = vmul.f32 %v1853_v51, %v1853_v51  ;;  %v1197_v38 = vmul.f32 %v1808_v37, %v1808_v37 }
 0x120   : > { %v1116_v36 = vadd.f32 %v1115_v58, %v1827_v43  ;;  %v1249_v62 = vadd.f32 %v1248_v59, %v1186_v28 }
 0x122   : > { %v1117_v54 = vadd.f32 %v1116_v36, %v1840_v47  ;;  %v1250_v2 = vadd.f32 %v1249_v62, %v1187_v32  ;;  %v1190_v47 = vmul.f32 %v1866_v55, %v1866_v55 }
 0x124   : > { %v1118_v5 = vadd.f32 %v1117_v54, %v1853_v51  ;;  %v1251_v6 = vadd.f32 %v1250_v2, %v1188_v63  ;;  %v2012_v42 = vpop.f32.mrf.mxu3  ;;  %v1201_v63 = vmul.f32 %v1856_v52, %v1856_v52 }
 0x125   : > { %1088 = vst [vmem:[%s1729_s6 + $0x1e0] sm:$0xff] %v2012_v42 }
 0x126   : > { %v1252_v43 = vadd.f32 %v1251_v6, %v1189_v39  ;;  %v1119_v12 = vadd.f32 %v1118_v5, %v1866_v55 }
 0x128   : > { %v1253_v13 = vadd.f32 %v1252_v43, %v1190_v47  ;;  %v1120_v51 = vadd.f32 %v1119_v12, %v1884_v3  ;;  %v1194_v3 = vmul.f32 %v1770_v24, %v1770_v24 }
 0x12a   : > { %v1254_v16 = vadd.f32 %v1253_v13, %v1191_v14  ;;  %v1121_v60 = vadd.f32 %v1120_v51, %v1897_v22  ;;  %v1195_v22 = vmul.f32 %v1786_v29, %v1786_v29  ;;  %v1205_v51 = vmul.f32 %v1913_v1, %v1913_v1 }
 0x12c   : > { %v1255_v0 = vadd.f32 %v1254_v16, %v1192_v17  ;;  %v1122_v55 = vadd.f32 %v1121_v60, %v1910_v61  ;;  %v1196_v61 = vmul.f32 %v1797_v33, %v1797_v33 }
 0x12e   : > { %v1123_v15 = vadd.f32 %v1122_v55, %v1770_v24  ;;  %v1256_v25 = vadd.f32 %v1255_v0, %v1193_v18 }
 0x130   : > { %v1124_v26 = vadd.f32 %v1123_v15, %v1786_v29  ;;  %v1257_v31 = vadd.f32 %v1256_v25, %v1194_v3  ;;  %v1198_v29 = vmul.f32 %v1817_v40, %v1817_v40  ;;  %v1209_v3 = vmul.f32 %v782_v23, %v782_v23 }
 0x132   : > { %v1125_v34 = vadd.f32 %v1124_v26, %v1797_v33  ;;  %v1258_v35 = vadd.f32 %v1257_v31, %v1195_v22  ;;  %v1199_v33 = vmul.f32 %v1830_v44, %v1830_v44 }
 0x134   : > { %v1126_v24 = vadd.f32 %v1125_v34, %v1808_v37  ;;  %v1259_v21 = vadd.f32 %v1258_v35, %v1196_v61  ;;  %v1200_v37 = vmul.f32 %v1843_v48, %v1843_v48 }
 0x136   : > { %v1127_v28 = vadd.f32 %v1126_v24, %v1817_v40  ;;  %v1260_v58 = vadd.f32 %v1259_v21, %v1197_v38  ;;  %v2028_v40 = vpop.f32.mrf.mxu3  ;;  %v1213_v38 = vmul.f32 %v1858_v53, %v1858_v53 }
 0x137   : > { %1089 = vst [vmem:[%s1729_s6 + $0x1e8] sm:$0xff] %v2028_v40 }
 0x138   : > { %v1128_v59 = vadd.f32 %v1127_v28, %v1830_v44  ;;  %v1261_v32 = vadd.f32 %v1260_v58, %v1198_v29  ;;  %v1202_v44 = vmul.f32 %v1869_v56, %v1869_v56 }
 0x13a   : > { %v1262_v36 = vadd.f32 %v1261_v32, %v1199_v33  ;;  %v1129_v62 = vadd.f32 %v1128_v59, %v1843_v48  ;;  %v1203_v48 = vmul.f32 %v1887_v7, %v1887_v7 }
 0x13c   : > { %v1130_v54 = vadd.f32 %v1129_v62, %v1856_v52  ;;  %v1263_v2 = vadd.f32 %v1262_v36, %v1200_v37  ;;  %v1204_v52 = vmul.f32 %v1900_v27, %v1900_v27 }
 0x13e   : > { %v1131_v5 = vadd.f32 %v1130_v54, %v1869_v56  ;;  %v1264_v39 = vadd.f32 %v1263_v2, %v1201_v63  ;;  %v827_v56 = vpop.f32.mrf.mxu3 }
 0x13f   : > { %1090 = vst [vmem:[%s1729_s6 + $0x1f0] sm:$0xff] %v827_v56 }
 0x140   : > { %v1132_v6 = vadd.f32 %v1131_v5, %v1887_v7  ;;  %v1265_v43 = vadd.f32 %v1264_v39, %v1202_v44  ;;  %v1206_v7 = vmul.f32 %v1935_v19, %v1935_v19  ;;  %v1221_v39 = vmul.f32 %v1995_v8, %v1995_v8 }
 0x142   : > { %v1133_v12 = vadd.f32 %v1132_v6, %v1900_v27  ;;  %v1266_v47 = vadd.f32 %v1265_v43, %v1203_v48  ;;  %v1207_v27 = vmul.f32 %v1955_v46, %v1955_v46 }
 0x144   : > { %v1134_v13 = vadd.f32 %v1133_v12, %v1913_v1  ;;  %v1267_v14 = vadd.f32 %v1266_v47, %v1204_v52  ;;  %v1208_v1 = vmul.f32 %v1975_v10, %v1975_v10 }
 0x146   : > { %v1268_v16 = vadd.f32 %v1267_v14, %v1205_v51  ;;  %v1135_v60 = vadd.f32 %v1134_v13, %v1935_v19  ;;  %v830_v22 = vpop.f32.mrf.mxu3  ;;  %v1210_v19 = vmul.f32 %v1819_v41, %v1819_v41  ;;  %v1224_v13 = vmul.f32 %v827_v56, %v827_v56 }
 0x147   : > { %1091 = vst [vmem:[%s1729_s6 + $0x1f8] sm:$0xff] %v830_v22  ;;  %v1225_v51 = vmul.f32 %v830_v22, %v830_v22 }
 0x148   : > { %v1269_v17 = vadd.f32 %v1268_v16, %v1206_v7  ;;  %v1136_v18 = vadd.f32 %v1135_v60, %v1955_v46  ;;  %v1211_v46 = vmul.f32 %v1832_v45, %v1832_v45 }
 0x14a   : > { %v1270_v0 = vadd.f32 %v1269_v17, %v1207_v27  ;;  %v1137_v55 = vadd.f32 %v1136_v18, %v1975_v10  ;;  %v1212_v10 = vmul.f32 %v1845_v49, %v1845_v49 }
 0x14c   : > { %v1271_v15 = vadd.f32 %v1270_v0, %v1208_v1  ;;  %v1138_v25 = vadd.f32 %v1137_v55, %v782_v23 }
 0x14e   : > { %v1139_v26 = vadd.f32 %v1138_v25, %v1819_v41  ;;  %v1272_v31 = vadd.f32 %v1271_v15, %v1209_v3  ;;  %v1214_v41 = vmul.f32 %v1871_v57, %v1871_v57 }
 0x150   : > { %v1140_v61 = vadd.f32 %v1139_v26, %v1832_v45  ;;  %v1273_v34 = vadd.f32 %v1272_v31, %v1210_v19  ;;  %v1215_v45 = vmul.f32 %v1889_v9, %v1889_v9 }
 0x152   : > { %v1141_v35 = vadd.f32 %v1140_v61, %v1845_v49  ;;  %v1274_v23 = vadd.f32 %v1273_v34, %v1211_v46  ;;  %v1216_v49 = vmul.f32 %v1902_v30, %v1902_v30 }
 0x154   : > { %v1142_v24 = vadd.f32 %v1141_v35, %v1858_v53  ;;  %v1275_v21 = vadd.f32 %v1274_v23, %v1212_v10  ;;  %v1217_v53 = vmul.f32 %v1915_v4, %v1915_v4 }
 0x156   : > { %v1143_v29 = vadd.f32 %v1142_v24, %v1871_v57  ;;  %v1276_v28 = vadd.f32 %v1275_v21, %v1213_v38  ;;  %v1218_v57 = vmul.f32 %v1937_v20, %v1937_v20 }
 0x158   : > { %v1144_v58 = vadd.f32 %v1143_v29, %v1889_v9  ;;  %v1277_v33 = vadd.f32 %v1276_v28, %v1214_v41  ;;  %v1219_v9 = vmul.f32 %v1957_v50, %v1957_v50 }
 0x15a   : > { %v1278_v59 = vadd.f32 %v1277_v33, %v1215_v45  ;;  %v1145_v32 = vadd.f32 %v1144_v58, %v1902_v30  ;;  %v1220_v30 = vmul.f32 %v1977_v11, %v1977_v11 }
 0x15c   : > { %v1146_v37 = vadd.f32 %v1145_v32, %v1915_v4  ;;  %v1279_v36 = vadd.f32 %v1278_v59, %v1216_v49 }
 0x15e   : > { %v1147_v62 = vadd.f32 %v1146_v37, %v1937_v20  ;;  %v1280_v63 = vadd.f32 %v1279_v36, %v1217_v53 }
 0x160   : > { %v1148_v54 = vadd.f32 %v1147_v62, %v1957_v50  ;;  %v1281_v2 = vadd.f32 %v1280_v63, %v1218_v57  ;;  %v1222_v50 = vmul.f32 %v2012_v42, %v2012_v42 }
 0x162   : > { %v1149_v44 = vadd.f32 %v1148_v54, %v1977_v11  ;;  %v1282_v4 = vadd.f32 %v1281_v2, %v1219_v9  ;;  %v1223_v11 = vmul.f32 %v2028_v40, %v2028_v40 }
 0x164   : > { %v1150_v5 = vadd.f32 %v1149_v44, %v1995_v8  ;;  %v1283_v20 = vadd.f32 %v1282_v4, %v1220_v30 }
 0x166   : > { %v1284_v48 = vadd.f32 %v1283_v20, %v1221_v39  ;;  %v1151_v6 = vadd.f32 %v1150_v5, %v2012_v42 }
 0x168   : > { %v1285_v43 = vadd.f32 %v1284_v48, %v1222_v50  ;;  %v1152_v52 = vadd.f32 %v1151_v6, %v2028_v40 }
 0x16a   : > { %v1286_v12 = vadd.f32 %v1285_v43, %v1223_v11  ;;  %v1153_v47 = vadd.f32 %v1152_v52, %v827_v56 }
 0x16c   : > { %v1287_v14 = vadd.f32 %v1286_v12, %v1224_v13  ;;  %v1154_v8 = vadd.f32 %v1153_v47, %v830_v22 }
 0x16e   : > { %v1155_v16 = vrot.slane %v1154_v8, 4  ;;  %v1288_v60 = vadd.f32 %v1287_v14, %v1225_v51 }
 0x170   : > { %v1156_v7 = vadd.f32 %v1155_v16, %v1154_v8  ;;  %v1289_v17 = vrot.slane %v1288_v60, 4 }
 0x172   : > { %v1157_v18 = vrot.slane %v1156_v7, 2  ;;  %v1290_v42 = vadd.f32 %v1289_v17, %v1288_v60 }
 0x174   : > { %v1158_v27 = vadd.f32 %v1157_v18, %v1156_v7  ;;  %v1291_v0 = vrot.slane %v1290_v42, 2 }
 0x176   : > { %v1159_v55 = vrot.slane %v1158_v27, 1  ;;  %v1292_v1 = vadd.f32 %v1291_v0, %v1290_v42 }
 0x178   : > { %v1160_v40 = vadd.f32 %v1159_v55, %v1158_v27  ;;  %v1293_v56 = vrot.slane %v1292_v1, 1 }
 0x17a   : > { %1161 = vst [vmem:[%s229_s10] sm:$0x1] %v1160_v40  ;;  %v1294_v3 = vadd.f32 %v1293_v56, %v1292_v1 }
 0x17c   : > { %1295 = vst [vmem:[%s229_s10 + $0x1] sm:$0x1] %v1294_v3 }
 0x17d PF: > { %s14_s14 = sadd.s32 1, %s1548_s14   ;;  %s2115_s12 = smov %s1544_s13 }
 0x17e   : > { %p11_p6 = scmp.ge.s32.totalorder %s14_s14, 6   ;;  %s2116_s13 = smov %s2118_s15 }
 0x180   :  { %13 = sbr.rel (!%p11_p6) target bundleno = 2 (0x2), region = 81 }

// kernel: deconv_bn_act_forward.5
= control target key start
LH: loop header
LB: loop body
LE: loop exit
PB: predicated region body
PF: predicated region fallthrough
CT: control target
= control target key end

     0   :  { %s1246_s12 = smov 0   ;;  %s1248_s13 = smov 0   ;;  %s1883_s0 = inlined_call_operand.vmem [shape: f32[2048,128], index: 0, kind: input, shape index: {}]   ;;  %s1884_s1 = inlined_call_operand.vmem [shape: f32[3,128], index: 1, kind: input, shape index: {}]   ;;  %s1885_s2 = inlined_call_operand.vmem [shape: f32[2,1,128], index: 2, kind: input, shape index: {}]   ;;  %s1886_s3 = inlined_call_operand.vmem [shape: f32[2,128,1024], index: 3, kind: output, shape index: {}]  }
   0x1   :  { %s1250_s14 = smov 0   ;;  %s1252_s15 = smov 0  }
   0x2   :  { %s1254_s16 = smov 0   ;;  %s1256_s17 = smov 0  }
   0x3   :  { %s1258_s18 = smov 0  }
   0x4 LB: > { %s22_s19 = sadd.s32 1, %s1216_s16  ;;  %s25_s20 = sadd.s32 1, %s1220_s17  ;;  %s1224_s18 = sphi %s1258_s18, %s13_s18   ;;  %s1220_s17 = sphi %s1256_s17, %s1893_s17   ;;  %s1216_s16 = sphi %s1254_s16, %s1892_s16   ;;  %s1212_s15 = sphi %s1252_s15, %s1891_s15   ;;  %s1208_s14 = sphi %s1250_s14, %s1890_s14   ;;  %s1204_s13 = sphi %s1248_s13, %s1889_s13   ;;  %s1200_s12 = sphi %s1246_s12, %s1888_s12  }
   0x5   : > { %p23_p0 = scmp.ge.s32.totalorder %s22_s19, 2  ;;  %s1089_s21 = sadd.s32 4294967295, %s1224_s18  }
   0x6   : > { %p121_p1 = scmp.ne.s32.totalorder %s1204_s13, %s1200_s12  ;;  %p122_p2 = scmp.eq.s32.totalorder %s1089_s21, 3 }
   0x7   : > { %s1895_s19 = smov (%p23_p0, %s22_s19), 0  ;;  %s1897_s20 = smov (!%p23_p0, %s25_s20), %s1220_s17 }
   0x8   : > { %s107_s22 = ssub.s32 %s1216_s16, %s1895_s19  ;;  %p27_p3 = scmp.ge.s32.totalorder %s1897_s20, 2 }
   0x9   : > { %p1095_p4 = scmp.ge.s32.totalorder %s1224_s18, 1  ;;  %p1292_p5 = por %p122_p2, %p121_p1 }
   0xa   : > { %p168_p6 = scmp.lt.s32.totalorder %s1224_s18, 5  ;;  %s1899_s20 = smov (%p27_p3, %s1897_s20), 0 }
   0xb   : > { %s106_s24 = ssub.s32 %s1220_s17, %s1899_s20  ;;  %s111_s26 = sadd.s32 1, %s1204_s13 }
   0xc   : > { %p169_p7 = pnand %p1095_p4, %p168_p6  ;;  %s108_s25 = sor.u32 %s107_s22, %s106_s24 }
   0xd   : > { %p109_p8 = scmp.eq.s32.totalorder %s108_s25, 0  ;;  %s1097_s28 = sshll.u32 (!%p169_p7), %s1212_s15, 1 }
   0xe   : > { %172 = sbr.rel (%p169_p7) target bundleno = 455 (0x1c7), region = 32  ;;  %p206_p9 = scmp.lt.s32.totalorder (!%p169_p7), %s1212_s15, 1 }
   0xf   : > { %s1303_s27 = scalar_select %p109_p8, %s1204_s13, %s111_s26  }
  0x10   : > { %s197_s29 = sadd.s32 (!%p169_p7), %s1208_s14, %s1097_s28 }
  0x11   : > { %s1098_s30 = sshll.u32 (!%p169_p7), %s197_s29, 6  ;;  %s193_s29 = sand.u32 (!%p169_p7), 1, %s1200_s12  }
  0x12   : > { %p199_p10 = scmp.lt.s32.totalorder (!%p169_p7), %s1098_s30, 255 }
  0x13   : > { %s207_s4 = scalar_select %p206_p9, %s1212_s15, 1  ;;  %v1317_v0 = vld [vmem:[%s1884_s1] ss:$0 sm:$0xff]  ;;  %v1327_v1 = vld [vmem:[%s1884_s1 + $0x1] ss:$0 sm:$0xff] }
  0x14   : > { %s1901_s30 = smov (!%p199_p10, %s1098_s30), 255  ;;  %v1335_v5 = vld [vmem:[%s1884_s1 + $0x2] ss:$0 sm:$0xff]  ;;  %s1102_s11 = sshll.u32 (%p1292_p5), %s1212_s15, 7 }
  0x15   : > { %s1312_s7 = scalar_lea.vmem %s1885_s2, %s207_s4  ;;  %s1099_s10 = sshll.u32 %s1901_s30, 3 }
  0x16   : > { %s1322_s22 = scalar_lea.vmem %s1883_s0, %s1099_s10  ;;  %v1341_v9 = vld [vmem:[%s1312_s7] ss:$0 sm:$0xff]  ;;  %s1096_s30 = sshll.u32 %s193_s29, 9 }
  0x17   : > { %v210_v2 = vld [vmem:[%s1322_s22] sm:$0xff]  ;;  %v211_v3 = vld [vmem:[%s1322_s22 + $0x8] sm:$0xff]  ;;  %v212_v10 = vld [vmem:[%s1322_s22 + $0x10] sm:$0xff]  ;;  %s1544_s12 = scalar_lea.vmem [#allocation2], %s1096_s30 }
  0x18   : > { %v276_v4 = vmul.f32 %v1317_v0, %v210_v2  ;;  %v277_v6 = vmul.f32 %v1317_v0, %v211_v3  ;;  %v278_v14 = vmul.f32 %v1317_v0, %v212_v10  ;;  %v213_v18 = vld [vmem:[%s1322_s22 + $0x18] sm:$0xff]  ;;  %v214_v24 = vld [vmem:[%s1322_s22 + $0x20] sm:$0xff]  ;;  %v215_v30 = vld [vmem:[%s1322_s22 + $0x28] sm:$0xff] }
  0x19   : > { %v279_v21 = vmul.f32 %v1317_v0, %v213_v18  ;;  %v280_v27 = vmul.f32 %v1317_v0, %v214_v24  ;;  %v281_v33 = vmul.f32 %v1317_v0, %v215_v30  ;;  %v216_v36 = vld [vmem:[%s1322_s22 + $0x30] sm:$0xff]  ;;  %v217_v42 = vld [vmem:[%s1322_s22 + $0x38] sm:$0xff]  ;;  %v218_v48 = vld [vmem:[%s1322_s22 + $0x40] sm:$0xff] }
  0x1a   : > { %v342_v7 = vadd.f32 %v1327_v1, %v276_v4  ;;  %v343_v8 = vadd.f32 %v1327_v1, %v277_v6  ;;  %v344_v17 = vadd.f32 %v1327_v1, %v278_v14  ;;  %v282_v39 = vmul.f32 %v1317_v0, %v216_v36  ;;  %v219_v54 = vld [vmem:[%s1322_s22 + $0x48] sm:$0xff]  ;;  %v220_v60 = vld [vmem:[%s1322_s22 + $0x50] sm:$0xff]  ;;  %v221_v4 = vld [vmem:[%s1322_s22 + $0x58] sm:$0xff] }
  0x1b   : > { %v345_v23 = vadd.f32 %v1327_v1, %v279_v21  ;;  %v346_v29 = vadd.f32 %v1327_v1, %v280_v27  ;;  %v347_v35 = vadd.f32 %v1327_v1, %v281_v33  ;;  %v283_v45 = vmul.f32 %v1317_v0, %v217_v42  ;;  %v223_v18 = vld [vmem:[%s1322_s22 + $0x68] sm:$0xff]  ;;  %v224_v27 = vld [vmem:[%s1322_s22 + $0x70] sm:$0xff] }
  0x1c   : > { %vm406_vm0 = vcmp.ge.f32.partialorder %v342_v7, 0.0  ;;  %v472_v11 = vmul.f32 %v1335_v5, %v342_v7  ;;  %v473_v13 = vmul.f32 %v1335_v5, %v343_v8  ;;  %vm407_vm1 = vcmp.ge.f32.partialorder %v343_v8, 0.0 }
  0x1d   : > { %v474_v20 = vmul.f32 %v1335_v5, %v344_v17  ;;  %vm408_vm2 = vcmp.ge.f32.partialorder %v344_v17, 0.0  ;;  %v475_v26 = vmul.f32 %v1335_v5, %v345_v23  ;;  %vm409_vm3 = vcmp.ge.f32.partialorder %v345_v23, 0.0 }
  0x1e   : > { %v536_v12 = vsel %vm406_vm0, %v342_v7, %v472_v11  ;;  %v537_v16 = vsel %vm407_vm1, %v343_v8, %v473_v13  ;;  %v476_v32 = vmul.f32 %v1335_v5, %v346_v29  ;;  %vm410_vm4 = vcmp.ge.f32.partialorder %v346_v29, 0.0 }
  0x1f   : > { %v604_v15 = vmul.f32 %v1341_v9, %v536_v12  ;;  %v605_v19 = vmul.f32 %v1341_v9, %v537_v16  ;;  %v538_v22 = vsel %vm408_vm2, %v344_v17, %v474_v20  ;;  %v539_v28 = vsel %vm409_vm3, %v345_v23, %v475_v26  ;;  %v222_v12 = vld [vmem:[%s1322_s22 + $0x60] sm:$0xff] }
  0x20   : > { %v606_v25 = vmul.f32 %v1341_v9, %v538_v22  ;;  %v607_v31 = vmul.f32 %v1341_v9, %v539_v28  ;;  %v540_v34 = vsel %vm410_vm4, %v346_v29, %v476_v32  ;;  %v477_v38 = vmul.f32 %v1335_v5, %v347_v35  ;;  %v226_v22 = vld [vmem:[%s1322_s22 + $0x80] sm:$0xff] }
  0x21   : > { %668 = vxpose.xlu0.b32.start [1/16] %v604_v15, 128  ;;  %v608_v37 = vmul.f32 %v1341_v9, %v540_v34  ;;  %vm411_vm5 = vcmp.ge.f32.partialorder %v347_v35, 0.0  ;;  %v348_v41 = vadd.f32 %v1327_v1, %v282_v39  ;;  %v349_v47 = vadd.f32 %v1327_v1, %v283_v45  ;;  %v227_v34 = vld [vmem:[%s1322_s22 + $0x88] sm:$0xff]  ;;  %v242_v39 = vld [vmem:[%s1322_s22 + $0x100] sm:$0xff] }
  0x22   : > { %v541_v40 = vsel %vm411_vm5, %v347_v35, %v477_v38  ;;  %v284_v51 = vmul.f32 %v1317_v0, %v218_v48  ;;  %v285_v57 = vmul.f32 %v1317_v0, %v219_v54  ;;  %v286_v63 = vmul.f32 %v1317_v0, %v220_v60 }
  0x23   : > { %v609_v43 = vmul.f32 %v1341_v9, %v541_v40  ;;  %v478_v44 = vmul.f32 %v1335_v5, %v348_v41  ;;  %vm412_vm6 = vcmp.ge.f32.partialorder %v348_v41, 0.0  ;;  %v479_v50 = vmul.f32 %v1335_v5, %v349_v47  ;;  %v225_v40 = vld [vmem:[%s1322_s22 + $0x78] sm:$0xff] }
  0x24   : > { %vm413_vm7 = vcmp.ge.f32.partialorder %v349_v47, 0.0  ;;  %v350_v53 = vadd.f32 %v1327_v1, %v284_v51  ;;  %v351_v59 = vadd.f32 %v1327_v1, %v285_v57  ;;  %v352_v3 = vadd.f32 %v1327_v1, %v286_v63  ;;  %v243_v57 = vld [vmem:[%s1322_s22 + $0x108] sm:$0xff] }
  0x25   : > { %v542_v46 = vsel %vm412_vm6, %v348_v41, %v478_v44  ;;  %v543_v52 = vsel %vm413_vm7, %v349_v47, %v479_v50  ;;  %v287_v8 = vmul.f32 %v1317_v0, %v221_v4  ;;  %v288_v15 = vmul.f32 %v1317_v0, %v222_v12  ;;  %v228_v50 = vld [vmem:[%s1322_s22 + $0x90] sm:$0xff] }
  0x26   : > { %v610_v49 = vmul.f32 %v1341_v9, %v542_v46  ;;  %v611_v55 = vmul.f32 %v1341_v9, %v543_v52  ;;  %v480_v56 = vmul.f32 %v1335_v5, %v350_v53  ;;  %vm414_vm8 = vcmp.ge.f32.partialorder %v350_v53, 0.0 }
  0x27   : > { %v481_v62 = vmul.f32 %v1335_v5, %v351_v59  ;;  %vm415_vm9 = vcmp.ge.f32.partialorder %v351_v59, 0.0  ;;  %v482_v7 = vmul.f32 %v1335_v5, %v352_v3  ;;  %vm416_vm10 = vcmp.ge.f32.partialorder %v352_v3, 0.0 }
  0x28   : > { %v544_v58 = vsel %vm414_vm8, %v350_v53, %v480_v56  ;;  %v353_v11 = vadd.f32 %v1327_v1, %v287_v8  ;;  %v354_v17 = vadd.f32 %v1327_v1, %v288_v15  ;;  %v289_v21 = vmul.f32 %v1317_v0, %v223_v18  ;;  %v244_v15 = vld [vmem:[%s1322_s22 + $0x110] sm:$0xff] }
  0x29   : > { %669 = vxpose.xlu0.b32.cont [2/16] %v605_v19, 128  ;;  %v612_v61 = vmul.f32 %v1341_v9, %v544_v58  ;;  %v545_v2 = vsel %vm415_vm9, %v351_v59, %v481_v62  ;;  %v546_v10 = vsel %vm416_vm10, %v352_v3, %v482_v7  ;;  %v292_v23 = vmul.f32 %v1317_v0, %v226_v22  ;;  %v258_v58 = vld [vmem:[%s1322_s22 + $0x180] sm:$0xff]  ;;  %v229_v7 = vld [vmem:[%s1322_s22 + $0x98] sm:$0xff] }
  0x2a   : > { %v613_v6 = vmul.f32 %v1341_v9, %v545_v2  ;;  %v614_v13 = vmul.f32 %v1341_v9, %v546_v10  ;;  %v483_v14 = vmul.f32 %v1335_v5, %v353_v11  ;;  %vm417_vm11 = vcmp.ge.f32.partialorder %v353_v11, 0.0 }
  0x2b   : > { %v484_v20 = vmul.f32 %v1335_v5, %v354_v17  ;;  %vm418_vm12 = vcmp.ge.f32.partialorder %v354_v17, 0.0  ;;  %v358_v26 = vadd.f32 %v1327_v1, %v292_v23  ;;  %v293_v35 = vmul.f32 %v1317_v0, %v227_v34  ;;  %v260_v34 = vld [vmem:[%s1322_s22 + $0x190] sm:$0xff] }
  0x2c   : > { %v547_v16 = vsel %vm417_vm11, %v353_v11, %v483_v14  ;;  %v308_v41 = vmul.f32 %v1317_v0, %v242_v39  ;;  %v291_v46 = vmul.f32 %v1317_v0, %v225_v40  ;;  %v294_v51 = vmul.f32 %v1317_v0, %v228_v50 }
  0x2d   : > { %v615_v19 = vmul.f32 %v1341_v9, %v547_v16  ;;  %v548_v24 = vsel %vm418_vm12, %v354_v17, %v484_v20  ;;  %vm422_vm13 = vcmp.ge.f32.partialorder %v358_v26, 0.0  ;;  %v488_v28 = vmul.f32 %v1335_v5, %v358_v26  ;;  %v259_v16 = vld [vmem:[%s1322_s22 + $0x188] sm:$0xff] }
  0x2e   : > { %v616_v29 = vmul.f32 %v1341_v9, %v548_v24  ;;  %v359_v38 = vadd.f32 %v1327_v1, %v293_v35  ;;  %v374_v44 = vadd.f32 %v1327_v1, %v308_v41  ;;  %v357_v54 = vadd.f32 %v1327_v1, %v291_v46 }
  0x2f   : > { %v552_v32 = vsel %vm422_vm13, %v358_v26, %v488_v28  ;;  %v360_v56 = vadd.f32 %v1327_v1, %v294_v51  ;;  %v309_v59 = vmul.f32 %v1317_v0, %v243_v57  ;;  %v324_v2 = vmul.f32 %v1317_v0, %v258_v58  ;;  %v230_v26 = vld [vmem:[%s1322_s22 + $0xa0] sm:$0xff] }
  0x30   : > { %v620_v33 = vmul.f32 %v1341_v9, %v552_v32  ;;  %vm423_vm15 = vcmp.ge.f32.partialorder %v359_v38, 0.0  ;;  %v489_v42 = vmul.f32 %v1335_v5, %v359_v38  ;;  %vm438_vm1 = vcmp.ge.f32.partialorder %v374_v44, 0.0  ;;  %v246_v51 = vld [vmem:[%s1322_s22 + $0x120] sm:$0xff] }
  0x31   : > { %670 = vxpose.xlu0.b32.cont [3/16] %v606_v25, 128  ;;  %v355_v25 = vadd.f32 %v1327_v1, %v289_v21  ;;  %vm424_vm2 = vcmp.ge.f32.partialorder %v360_v56, 0.0  ;;  %v490_v60 = vmul.f32 %v1335_v5, %v360_v56  ;;  %v375_v62 = vadd.f32 %v1327_v1, %v309_v59 }
  0x32   : > { %700 = vxpose.xlu1.b32.start [1/16] %v620_v33, 128  ;;  %v553_v47 = vsel %vm423_vm15, %v359_v38, %v489_v42  ;;  %v487_v63 = vmul.f32 %v1335_v5, %v357_v54  ;;  %vm421_vm3 = vcmp.ge.f32.partialorder %v357_v54, 0.0  ;;  %v295_v8 = vmul.f32 %v1317_v0, %v229_v7  ;;  %v245_v33 = vld [vmem:[%s1322_s22 + $0x118] sm:$0xff] }
  0x33   : > { %v485_v30 = vmul.f32 %v1335_v5, %v355_v25  ;;  %vm419_vm14 = vcmp.ge.f32.partialorder %v355_v25, 0.0  ;;  %v621_v48 = vmul.f32 %v1341_v9, %v553_v47  ;;  %v554_v3 = vsel %vm424_vm2, %v360_v56, %v490_v60 }
  0x34   : > { %v622_v4 = vmul.f32 %v1341_v9, %v554_v3  ;;  %vm439_vm4 = vcmp.ge.f32.partialorder %v375_v62, 0.0  ;;  %v551_v11 = vsel %vm421_vm3, %v357_v54, %v487_v63  ;;  %v390_v12 = vadd.f32 %v1327_v1, %v324_v2 }
  0x35   : > { %v549_v36 = vsel %vm419_vm14, %v355_v25, %v485_v30  ;;  %v361_v14 = vadd.f32 %v1327_v1, %v295_v8  ;;  %v310_v17 = vmul.f32 %v1317_v0, %v244_v15  ;;  %v325_v22 = vmul.f32 %v1317_v0, %v259_v16  ;;  %v247_v8 = vld [vmem:[%s1322_s22 + $0x128] sm:$0xff] }
  0x36   : > { %v520_v21 = vmul.f32 %v1335_v5, %v390_v12  ;;  %vm454_vm6 = vcmp.ge.f32.partialorder %v390_v12, 0.0  ;;  %v311_v35 = vmul.f32 %v1317_v0, %v245_v33  ;;  %v326_v40 = vmul.f32 %v1317_v0, %v260_v34 }
  0x37   : > { %vm425_vm5 = vcmp.ge.f32.partialorder %v361_v14, 0.0  ;;  %v491_v18 = vmul.f32 %v1335_v5, %v361_v14  ;;  %v376_v20 = vadd.f32 %v1327_v1, %v310_v17  ;;  %v391_v30 = vadd.f32 %v1327_v1, %v325_v22 }
  0x38   : > { %v377_v38 = vadd.f32 %v1327_v1, %v311_v35 }
  0x39   : > { %671 = vxpose.xlu0.b32.cont [4/16] %v607_v31, 128  ;;  %v290_v31 = vmul.f32 %v1317_v0, %v224_v27  ;;  %v555_v23 = vsel %vm425_vm5, %v361_v14, %v491_v18  ;;  %v506_v25 = vmul.f32 %v1335_v5, %v376_v20  ;;  %vm440_vm7 = vcmp.ge.f32.partialorder %v376_v20, 0.0 }
  0x3a   : > { %701 = vxpose.xlu1.b32.cont [2/16] %v621_v48, 128  ;;  %v623_v24 = vmul.f32 %v1341_v9, %v555_v23  ;;  %v296_v27 = vmul.f32 %v1317_v0, %v230_v26  ;;  %v521_v39 = vmul.f32 %v1335_v5, %v391_v30  ;;  %vm455_vm9 = vcmp.ge.f32.partialorder %v391_v30, 0.0 }
  0x3b   : > { %v570_v28 = vsel %vm440_vm7, %v376_v20, %v506_v25  ;;  %vm441_vm10 = vcmp.ge.f32.partialorder %v377_v38, 0.0  ;;  %v392_v48 = vadd.f32 %v1327_v1, %v326_v40  ;;  %v233_v20 = vld [vmem:[%s1322_s22 + $0xb8] sm:$0xff] }
  0x3c   : > { %v362_v32 = vadd.f32 %v1327_v1, %v296_v27  ;;  %v585_v47 = vsel %vm455_vm9, %v391_v30, %v521_v39  ;;  %v248_v27 = vld [vmem:[%s1322_s22 + $0x130] sm:$0xff] }
  0x3d   : > { %v522_v57 = vmul.f32 %v1335_v5, %v392_v48  ;;  %vm456_vm12 = vcmp.ge.f32.partialorder %v392_v48, 0.0 }
  0x3e   : > { %vm426_vm8 = vcmp.ge.f32.partialorder %v362_v32, 0.0 }
  0x3f   : > { %v586_v3 = vsel %vm456_vm12, %v392_v48, %v522_v57 }
  0x41   : > { %672 = vxpose.xlu0.b32.cont [5/16] %v608_v37, 128  ;;  %v356_v37 = vadd.f32 %v1327_v1, %v290_v31  ;;  %v638_v31 = vmul.f32 %v1341_v9, %v570_v28  ;;  %v263_v28 = vld [vmem:[%s1322_s22 + $0x1a8] sm:$0xff] }
  0x42   : > { %702 = vxpose.xlu1.b32.cont [3/16] %v622_v4, 128  ;;  %v329_v34 = vmul.f32 %v1317_v0, %v263_v28 }
  0x43   : > { %v486_v45 = vmul.f32 %v1335_v5, %v356_v37  ;;  %vm420_vm0 = vcmp.ge.f32.partialorder %v356_v37, 0.0 }
  0x45   : > { %v550_v53 = vsel %vm420_vm0, %v356_v37, %v486_v45 }
  0x49   : > { %673 = vxpose.xlu0.b32.cont [6/16] %v609_v43, 128  ;;  %v617_v43 = vmul.f32 %v1341_v9, %v549_v36  ;;  %v492_v36 = vmul.f32 %v1335_v5, %v362_v32 }
  0x4a   : > { %703 = vxpose.xlu1.b32.cont [4/16] %v623_v24, 128 }
  0x4b   : > { %v556_v41 = vsel %vm426_vm8, %v362_v32, %v492_v36 }
  0x4c   : > { %v624_v42 = vmul.f32 %v1341_v9, %v556_v41 }
  0x51   : > { %674 = vxpose.xlu0.b32.cont [7/16] %v610_v49, 128  ;;  %v504_v49 = vmul.f32 %v1335_v5, %v374_v44 }
  0x52   : > { %704 = vxpose.xlu1.b32.cont [5/16] %v624_v42, 128  ;;  %v395_v42 = vadd.f32 %v1327_v1, %v329_v34  ;;  %v237_v34 = vld [vmem:[%s1322_s22 + $0xd8] sm:$0xff] }
  0x53   : > { %v568_v52 = vsel %vm438_vm1, %v374_v44, %v504_v49  ;;  %v231_v44 = vld [vmem:[%s1322_s22 + $0xa8] sm:$0xff] }
  0x54   : > { %v297_v45 = vmul.f32 %v1317_v0, %v231_v44  ;;  %vm459_vm5 = vcmp.ge.f32.partialorder %v395_v42, 0.0 }
  0x56   : > { %v363_v50 = vadd.f32 %v1327_v1, %v297_v45  ;;  %v249_v45 = vld [vmem:[%s1322_s22 + $0x138] sm:$0xff] }
  0x58   : > { %v493_v54 = vmul.f32 %v1335_v5, %v363_v50  ;;  %vm427_vm11 = vcmp.ge.f32.partialorder %v363_v50, 0.0 }
  0x59   : > { %675 = vxpose.xlu0.b32.cont [8/16] %v611_v55, 128  ;;  %v636_v55 = vmul.f32 %v1341_v9, %v568_v52  ;;  %v261_v52 = vld [vmem:[%s1322_s22 + $0x198] sm:$0xff] }
  0x5a   : > { %v327_v58 = vmul.f32 %v1317_v0, %v261_v52  ;;  %v557_v59 = vsel %vm427_vm11, %v363_v50, %v493_v54 }
  0x5b   : > { %732 = vxpose.xlu2.b32.start [1/16] %v636_v55, 128  ;;  %v653_v55 = vmul.f32 %v1341_v9, %v585_v47  ;;  %v625_v60 = vmul.f32 %v1341_v9, %v557_v59  ;;  %v315_v47 = vmul.f32 %v1317_v0, %v249_v45 }
  0x5c   : > { %v393_v4 = vadd.f32 %v1327_v1, %v327_v58 }
  0x5d   : > { %705 = vxpose.xlu1.b32.cont [6/16] %v625_v60, 128  ;;  %v381_v50 = vadd.f32 %v1327_v1, %v315_v47 }
  0x5e   : > { %v523_v15 = vmul.f32 %v1335_v5, %v393_v4  ;;  %vm457_vm15 = vcmp.ge.f32.partialorder %v393_v4, 0.0 }
  0x60   : > { %v587_v23 = vsel %vm457_vm15, %v393_v4, %v523_v15  ;;  %v236_v15 = vld [vmem:[%s1322_s22 + $0xd0] sm:$0xff] }
  0x61   : > { %676 = vxpose.xlu0.b32.cont [9/16] %v612_v61, 128  ;;  %v618_v61 = vmul.f32 %v1341_v9, %v550_v53  ;;  %v312_v53 = vmul.f32 %v1317_v0, %v246_v51  ;;  %v525_v51 = vmul.f32 %v1335_v5, %v395_v42 }
  0x63   : > { %v378_v56 = vadd.f32 %v1327_v1, %v312_v53  ;;  %v589_v59 = vsel %vm459_vm5, %v395_v42, %v525_v51  ;;  %v267_v42 = vld [vmem:[%s1322_s22 + $0x1c8] sm:$0xff] }
  0x65   : > { %vm442_vm13 = vcmp.ge.f32.partialorder %v378_v56, 0.0 }
  0x69   : > { %677 = vxpose.xlu0.b32.cont [10/16] %v613_v6, 128  ;;  %v505_v6 = vmul.f32 %v1335_v5, %v375_v62 }
  0x6b   : > { %v569_v10 = vsel %vm439_vm4, %v375_v62, %v505_v6  ;;  %v232_v62 = vld [vmem:[%s1322_s22 + $0xb0] sm:$0xff] }
  0x6c   : > { %v298_v63 = vmul.f32 %v1317_v0, %v232_v62 }
  0x6e   : > { %v364_v7 = vadd.f32 %v1327_v1, %v298_v63  ;;  %v250_v63 = vld [vmem:[%s1322_s22 + $0x140] sm:$0xff] }
  0x70   : > { %vm428_vm14 = vcmp.ge.f32.partialorder %v364_v7, 0.0 }
  0x71   : > { %678 = vxpose.xlu0.b32.cont [11/16] %v614_v13, 128  ;;  %v637_v13 = vmul.f32 %v1341_v9, %v569_v10  ;;  %v262_v10 = vld [vmem:[%s1322_s22 + $0x1a0] sm:$0xff] }
  0x72   : > { %v328_v16 = vmul.f32 %v1317_v0, %v262_v10 }
  0x73   : > { %733 = vxpose.xlu2.b32.cont [2/16] %v637_v13, 128  ;;  %v654_v13 = vmul.f32 %v1341_v9, %v586_v3  ;;  %v316_v3 = vmul.f32 %v1317_v0, %v250_v63 }
  0x74   : > { %v394_v24 = vadd.f32 %v1327_v1, %v328_v16  ;;  %v302_v16 = vmul.f32 %v1317_v0, %v236_v15 }
  0x76   : > { %v524_v33 = vmul.f32 %v1335_v5, %v394_v24  ;;  %vm458_vm2 = vcmp.ge.f32.partialorder %v394_v24, 0.0 }
  0x78   : > { %v588_v41 = vsel %vm458_vm2, %v394_v24, %v524_v33 }
  0x79   : > { %679 = vxpose.xlu0.b32.cont [12/16] %v615_v19, 128  ;;  %v619_v19 = vmul.f32 %v1341_v9, %v551_v11  ;;  %v313_v11 = vmul.f32 %v1317_v0, %v247_v8  ;;  %v382_v8 = vadd.f32 %v1327_v1, %v316_v3 }
  0x7b   : > { %734 = vxpose.xlu2.b32.cont [3/16] %v638_v31, 128  ;;  %v379_v14 = vadd.f32 %v1327_v1, %v313_v11  ;;  %v655_v31 = vmul.f32 %v1341_v9, %v587_v23  ;;  %vm446_vm9 = vcmp.ge.f32.partialorder %v382_v8, 0.0  ;;  %v266_v23 = vld [vmem:[%s1322_s22 + $0x1c0] sm:$0xff] }
  0x7d   : > { %vm443_vm0 = vcmp.ge.f32.partialorder %v379_v14, 0.0 }
  0x81   : > { %680 = vxpose.xlu0.b32.cont [13/16] %v616_v29, 128  ;;  %v584_v29 = vsel %vm454_vm6, %v390_v12, %v520_v21  ;;  %v494_v12 = vmul.f32 %v1335_v5, %v364_v7  ;;  %v299_v21 = vmul.f32 %v1317_v0, %v233_v20  ;;  %vm445_vm6 = vcmp.ge.f32.partialorder %v381_v50, 0.0 }
  0x82   : > { %v652_v37 = vmul.f32 %v1341_v9, %v584_v29  ;;  %v314_v29 = vmul.f32 %v1317_v0, %v248_v27 }
  0x83   : > { %v558_v17 = vsel %vm428_vm14, %v364_v7, %v494_v12  ;;  %v365_v26 = vadd.f32 %v1327_v1, %v299_v21  ;;  %v657_v7 = vmul.f32 %v1341_v9, %v589_v59  ;;  %v368_v21 = vadd.f32 %v1327_v1, %v302_v16 }
  0x84   : > { %v626_v18 = vmul.f32 %v1341_v9, %v558_v17  ;;  %v380_v32 = vadd.f32 %v1327_v1, %v314_v29 }
  0x85   : > { %v495_v30 = vmul.f32 %v1335_v5, %v365_v26  ;;  %vm429_vm1 = vcmp.ge.f32.partialorder %v365_v26, 0.0 }
  0x86   : > { %706 = vxpose.xlu1.b32.cont [7/16] %v626_v18, 128  ;;  %vm444_vm3 = vcmp.ge.f32.partialorder %v380_v32, 0.0 }
  0x87   : > { %v559_v35 = vsel %vm429_vm1, %v365_v26, %v495_v30  ;;  %v332_v30 = vmul.f32 %v1317_v0, %v266_v23 }
  0x88   : > { %v627_v36 = vmul.f32 %v1341_v9, %v559_v35  ;;  %v303_v35 = vmul.f32 %v1317_v0, %v237_v34 }
  0x89   : > { %681 = vxpose.xlu0.b32.cont [14/16] %v617_v43, 128  ;;  %v507_v43 = vmul.f32 %v1335_v5, %v377_v38 }
  0x8b   : > { %v571_v46 = vsel %vm441_vm10, %v377_v38, %v507_v43  ;;  %v234_v38 = vld [vmem:[%s1322_s22 + $0xc0] sm:$0xff]  ;;  %vm432_vm10 = vcmp.ge.f32.partialorder %v368_v21, 0.0 }
  0x8c   : > { %v639_v49 = vmul.f32 %v1341_v9, %v571_v46  ;;  %v300_v39 = vmul.f32 %v1317_v0, %v234_v38  ;;  %v264_v46 = vld [vmem:[%s1322_s22 + $0x1b0] sm:$0xff]  ;;  %v398_v38 = vadd.f32 %v1327_v1, %v332_v30 }
  0x8d   : > { %v330_v52 = vmul.f32 %v1317_v0, %v264_v46 }
  0x8e   : > { %735 = vxpose.xlu2.b32.cont [4/16] %v639_v49, 128  ;;  %707 = vxpose.xlu1.b32.cont [8/16] %v627_v36, 128  ;;  %v366_v44 = vadd.f32 %v1327_v1, %v300_v39  ;;  %v656_v49 = vmul.f32 %v1341_v9, %v588_v41  ;;  %v252_v41 = vld [vmem:[%s1322_s22 + $0x150] sm:$0xff]  ;;  %vm462_vm14 = vcmp.ge.f32.partialorder %v398_v38, 0.0 }
  0x8f   : > { %v396_v60 = vadd.f32 %v1327_v1, %v330_v52 }
  0x90   : > { %v496_v48 = vmul.f32 %v1335_v5, %v366_v44  ;;  %vm430_vm4 = vcmp.ge.f32.partialorder %v366_v44, 0.0 }
  0x91   : > { %682 = vxpose.xlu0.b32.cont [15/16] %v618_v61, 128  ;;  %v508_v61 = vmul.f32 %v1335_v5, %v378_v56  ;;  %v526_v10 = vmul.f32 %v1335_v5, %v396_v60  ;;  %vm460_vm8 = vcmp.ge.f32.partialorder %v396_v60, 0.0 }
  0x92   : > { %v560_v53 = vsel %vm430_vm4, %v366_v44, %v496_v48  ;;  %v528_v48 = vmul.f32 %v1335_v5, %v398_v38 }
  0x93   : > { %v572_v2 = vsel %vm442_vm13, %v378_v56, %v508_v61  ;;  %v628_v54 = vmul.f32 %v1341_v9, %v560_v53  ;;  %v235_v56 = vld [vmem:[%s1322_s22 + $0xc8] sm:$0xff]  ;;  %v590_v18 = vsel %vm460_vm8, %v396_v60, %v526_v10  ;;  %v238_v53 = vld [vmem:[%s1322_s22 + $0xe0] sm:$0xff]  ;;  %v253_v60 = vld [vmem:[%s1322_s22 + $0x158] sm:$0xff] }
  0x94   : > { %v640_v6 = vmul.f32 %v1341_v9, %v572_v2  ;;  %v301_v57 = vmul.f32 %v1317_v0, %v235_v56  ;;  %v265_v2 = vld [vmem:[%s1322_s22 + $0x1b8] sm:$0xff]  ;;  %v658_v27 = vmul.f32 %v1341_v9, %v590_v18  ;;  %v592_v56 = vsel %vm462_vm14, %v398_v38, %v528_v48  ;;  %v255_v38 = vld [vmem:[%s1322_s22 + $0x168] sm:$0xff] }
  0x95   : > { %v331_v11 = vmul.f32 %v1317_v0, %v265_v2  ;;  %v660_v3 = vmul.f32 %v1341_v9, %v592_v56 }
  0x96   : > { %736 = vxpose.xlu2.b32.cont [5/16] %v640_v6, 128  ;;  %708 = vxpose.xlu1.b32.cont [9/16] %v628_v54, 128  ;;  %v367_v62 = vadd.f32 %v1327_v1, %v301_v57  ;;  %v304_v54 = vmul.f32 %v1317_v0, %v238_v53 }
  0x98   : > { %v497_v4 = vmul.f32 %v1335_v5, %v367_v62  ;;  %vm431_vm7 = vcmp.ge.f32.partialorder %v367_v62, 0.0  ;;  %v370_v59 = vadd.f32 %v1327_v1, %v304_v54 }
  0x99   : > { %683 = vxpose.xlu0.b32.end [16/16] %v619_v19, 128  ;;  %v509_v19 = vmul.f32 %v1335_v5, %v379_v14 }
  0x9a   : > { %v561_v12 = vsel %vm431_vm7, %v367_v62, %v497_v4  ;;  %v319_v62 = vmul.f32 %v1317_v0, %v253_v60  ;;  %v500_v63 = vmul.f32 %v1335_v5, %v370_v59 }
  0x9b   : > { %v573_v22 = vsel %vm443_vm0, %v379_v14, %v509_v19  ;;  %v512_v14 = vmul.f32 %v1335_v5, %v382_v8  ;;  %v397_v19 = vadd.f32 %v1327_v1, %v331_v11  ;;  %vm434_vm0 = vcmp.ge.f32.partialorder %v370_v59, 0.0 }
  0x9c   : > { %v641_v25 = vmul.f32 %v1341_v9, %v573_v22  ;;  %v251_v22 = vld [vmem:[%s1322_s22 + $0x148] sm:$0xff]  ;;  %v385_v4 = vadd.f32 %v1327_v1, %v319_v62 }
  0x9d   : > { %v576_v17 = vsel %vm446_vm9, %v382_v8, %v512_v14  ;;  %v317_v24 = vmul.f32 %v1317_v0, %v251_v22  ;;  %v527_v29 = vmul.f32 %v1335_v5, %v397_v19  ;;  %vm461_vm11 = vcmp.ge.f32.partialorder %v397_v19, 0.0 }
  0x9e   : > { %737 = vxpose.xlu2.b32.cont [6/16] %v641_v25, 128  ;;  %v644_v20 = vmul.f32 %v1341_v9, %v576_v17  ;;  %v498_v25 = vmul.f32 %v1335_v5, %v368_v21  ;;  %v564_v8 = vsel %vm434_vm0, %v370_v59, %v500_v63  ;;  %v515_v11 = vmul.f32 %v1335_v5, %v385_v4 }
  0x9f   : > { %v383_v28 = vadd.f32 %v1327_v1, %v317_v24  ;;  %v632_v10 = vmul.f32 %v1341_v9, %v564_v8  ;;  %vm449_vm2 = vcmp.ge.f32.partialorder %v385_v4, 0.0 }
  0xa0   : > { %v579_v14 = vsel %vm449_vm2, %v385_v4, %v515_v11 }
  0xa1   : > { %764 = vxpose.xlu0.b32.start [1/16] %v652_v37, 128  ;;  %v510_v37 = vmul.f32 %v1335_v5, %v380_v32  ;;  %v513_v33 = vmul.f32 %v1335_v5, %v383_v28  ;;  %vm447_vm12 = vcmp.ge.f32.partialorder %v383_v28, 0.0  ;;  %v647_v17 = vmul.f32 %v1341_v9, %v579_v14  ;;  %v272_v14 = vld [vmem:[%s1322_s22 + $0x1f0] sm:$0xff] }
  0xa3   : > { %v574_v40 = vsel %vm444_vm3, %v380_v32, %v510_v37  ;;  %v577_v36 = vsel %vm447_vm12, %v383_v28, %v513_v33  ;;  %v591_v37 = vsel %vm461_vm11, %v397_v19, %v527_v29  ;;  %v254_v19 = vld [vmem:[%s1322_s22 + $0x160] sm:$0xff] }
  0xa4   : > { %v642_v43 = vmul.f32 %v1341_v9, %v574_v40  ;;  %v645_v39 = vmul.f32 %v1341_v9, %v577_v36  ;;  %v369_v40 = vadd.f32 %v1327_v1, %v303_v35  ;;  %v659_v46 = vmul.f32 %v1341_v9, %v591_v37 }
  0xa6   : > { %738 = vxpose.xlu2.b32.cont [7/16] %v642_v43, 128  ;;  %v318_v43 = vmul.f32 %v1317_v0, %v252_v41  ;;  %v499_v44 = vmul.f32 %v1335_v5, %v369_v40  ;;  %vm433_vm13 = vcmp.ge.f32.partialorder %v369_v40, 0.0 }
  0xa8   : > { %v384_v47 = vadd.f32 %v1327_v1, %v318_v43 }
  0xa9   : > { %765 = vxpose.xlu0.b32.cont [2/16] %v653_v55, 128  ;;  %v511_v55 = vmul.f32 %v1335_v5, %v381_v50 }
  0xaa   : > { %v514_v52 = vmul.f32 %v1335_v5, %v384_v47  ;;  %vm448_vm15 = vcmp.ge.f32.partialorder %v384_v47, 0.0 }
  0xab   : > { %v575_v58 = vsel %vm445_vm6, %v381_v50, %v511_v55  ;;  %v563_v50 = vsel %vm433_vm13, %v369_v40, %v499_v44  ;;  %v321_v40 = vmul.f32 %v1317_v0, %v255_v38 }
  0xac   : > { %v643_v61 = vmul.f32 %v1341_v9, %v575_v58  ;;  %v631_v51 = vmul.f32 %v1341_v9, %v563_v50  ;;  %v578_v55 = vsel %vm448_vm15, %v384_v47, %v514_v52  ;;  %v241_v50 = vld [vmem:[%s1322_s22 + $0xf8] sm:$0xff] }
  0xad   : > { %v646_v58 = vmul.f32 %v1341_v9, %v578_v55  ;;  %v387_v44 = vadd.f32 %v1327_v1, %v321_v40 }
  0xae   : > { %739 = vxpose.xlu2.b32.cont [8/16] %v643_v61, 128  ;;  %v268_v61 = vld [vmem:[%s1322_s22 + $0x1d0] sm:$0xff] }
  0xaf   : > { %vm451_vm8 = vcmp.ge.f32.partialorder %v387_v44, 0.0 }
  0xb1   : > { %766 = vxpose.xlu0.b32.cont [3/16] %v654_v13, 128  ;;  %v629_v13 = vmul.f32 %v1341_v9, %v561_v12  ;;  %v239_v12 = vld [vmem:[%s1322_s22 + $0xe8] sm:$0xff] }
  0xb3   : > { %709 = vxpose.xlu1.b32.cont [10/16] %v629_v13, 128  ;;  %v305_v13 = vmul.f32 %v1317_v0, %v239_v12 }
  0xb5   : > { %v371_v18 = vadd.f32 %v1327_v1, %v305_v13  ;;  %v257_v13 = vld [vmem:[%s1322_s22 + $0x178] sm:$0xff] }
  0xb6   : > { %740 = vxpose.xlu2.b32.cont [9/16] %v644_v20, 128  ;;  %v269_v20 = vld [vmem:[%s1322_s22 + $0x1d8] sm:$0xff] }
  0xb7   : > { %v501_v22 = vmul.f32 %v1335_v5, %v371_v18  ;;  %vm435_vm3 = vcmp.ge.f32.partialorder %v371_v18, 0.0 }
  0xb9   : > { %767 = vxpose.xlu0.b32.cont [4/16] %v655_v31, 128  ;;  %v562_v31 = vsel %vm432_vm10, %v368_v21, %v498_v25  ;;  %v320_v21 = vmul.f32 %v1317_v0, %v254_v19  ;;  %v565_v28 = vsel %vm435_vm3, %v371_v18, %v501_v22 }
  0xba   : > { %v630_v32 = vmul.f32 %v1341_v9, %v562_v31  ;;  %v633_v29 = vmul.f32 %v1341_v9, %v565_v28  ;;  %v240_v31 = vld [vmem:[%s1322_s22 + $0xf0] sm:$0xff]  ;;  %v1168_v28 = vld [vmem:[%s1312_s7] ss:$0 sm:$0xff]  ;;  %s1101_s7 = sshll.u32 (%p1292_p5), %s1208_s14, 2 }
  0xbb   : > { %v386_v25 = vadd.f32 %v1327_v1, %v320_v21  ;;  %s869_s21 = sadd.s32 (%p1292_p5), %s1102_s11, %s1101_s7 }
  0xbc   : > { %710 = vxpose.xlu1.b32.cont [11/16] %v630_v32, 128  ;;  %v306_v32 = vmul.f32 %v1317_v0, %v240_v31 }
  0xbd   : > { %v516_v30 = vmul.f32 %v1335_v5, %v386_v25  ;;  %vm450_vm5 = vcmp.ge.f32.partialorder %v386_v25, 0.0 }
  0xbe   : > { %741 = vxpose.xlu2.b32.cont [10/16] %v645_v39, 128  ;;  %v372_v37 = vadd.f32 %v1327_v1, %v306_v32  ;;  %v270_v39 = vld [vmem:[%s1322_s22 + $0x1e0] sm:$0xff] }
  0xbf   : > { %v580_v33 = vsel %vm450_vm5, %v386_v25, %v516_v30 }
  0xc0   : > { %v648_v36 = vmul.f32 %v1341_v9, %v580_v33  ;;  %v502_v41 = vmul.f32 %v1335_v5, %v372_v37  ;;  %vm436_vm6 = vcmp.ge.f32.partialorder %v372_v37, 0.0 }
  0xc1   : > { %768 = vxpose.xlu0.b32.cont [5/16] %v656_v49, 128  ;;  %v333_v49 = vmul.f32 %v1317_v0, %v267_v42 }
  0xc2   : > { %v566_v47 = vsel %vm436_vm6, %v372_v37, %v502_v41 }
  0xc3   : > { %v399_v57 = vadd.f32 %v1327_v1, %v333_v49  ;;  %v634_v48 = vmul.f32 %v1341_v9, %v566_v47  ;;  %v517_v49 = vmul.f32 %v1335_v5, %v387_v44 }
  0xc4   : > { %711 = vxpose.xlu1.b32.cont [12/16] %v631_v51, 128  ;;  %v307_v51 = vmul.f32 %v1317_v0, %v241_v50 }
  0xc5   : > { %v684_v6 = vpop.trf.xlu0  ;;  %vm463_vm1 = vcmp.ge.f32.partialorder %v399_v57, 0.0  ;;  %v581_v52 = vsel %vm451_vm8, %v387_v44, %v517_v49 }
  0xc6   : > { %796 = vst [vmem:[%s1544_s12] sm:$0xff] %v684_v6  ;;  %742 = vxpose.xlu2.b32.cont [11/16] %v646_v58, 128  ;;  %v529_v6 = vmul.f32 %v1335_v5, %v399_v57  ;;  %v649_v55 = vmul.f32 %v1341_v9, %v581_v52  ;;  %v373_v56 = vadd.f32 %v1327_v1, %v307_v51  ;;  %v271_v58 = vld [vmem:[%s1322_s22 + $0x1e8] sm:$0xff] }
  0xc8   : > { %v593_v15 = vsel %vm463_vm1, %v399_v57, %v529_v6  ;;  %v256_v57 = vld [vmem:[%s1322_s22 + $0x170] sm:$0xff]  ;;  %v503_v60 = vmul.f32 %v1335_v5, %v373_v56  ;;  %vm437_vm9 = vcmp.ge.f32.partialorder %v373_v56, 0.0 }
  0xc9   : > { %769 = vxpose.xlu0.b32.cont [6/16] %v657_v7, 128  ;;  %v334_v7 = vmul.f32 %v1317_v0, %v268_v61  ;;  %v661_v24 = vmul.f32 %v1341_v9, %v593_v15  ;;  %v322_v59 = vmul.f32 %v1317_v0, %v256_v57  ;;  %v323_v15 = vmul.f32 %v1317_v0, %v257_v13 }
  0xca   : > { %v567_v4 = vsel %vm437_vm9, %v373_v56, %v503_v60 }
  0xcb   : > { %v400_v16 = vadd.f32 %v1327_v1, %v334_v7  ;;  %v388_v63 = vadd.f32 %v1327_v1, %v322_v59  ;;  %v635_v6 = vmul.f32 %v1341_v9, %v567_v4  ;;  %v389_v18 = vadd.f32 %v1327_v1, %v323_v15 }
  0xcc   : > { %712 = vxpose.xlu1.b32.cont [13/16] %v632_v10, 128 }
  0xcd   : > { %v685_v26 = vpop.trf.xlu0  ;;  %vm464_vm4 = vcmp.ge.f32.partialorder %v400_v16, 0.0  ;;  %v518_v7 = vmul.f32 %v1335_v5, %v388_v63  ;;  %vm452_vm11 = vcmp.ge.f32.partialorder %v388_v63, 0.0  ;;  %vm453_vm13 = vcmp.ge.f32.partialorder %v389_v18, 0.0 }
  0xce   : > { %800 = vst [vmem:[%s1544_s12 + $0x20] sm:$0xff] %v685_v26  ;;  %743 = vxpose.xlu2.b32.cont [12/16] %v647_v17, 128  ;;  %v530_v26 = vmul.f32 %v1335_v5, %v400_v16 }
  0xcf   : > { %v582_v8 = vsel %vm452_vm11, %v388_v63, %v518_v7 }
  0xd0   : > { %v594_v34 = vsel %vm464_vm4, %v400_v16, %v530_v26  ;;  %v650_v12 = vmul.f32 %v1341_v9, %v582_v8  ;;  %v273_v26 = vld [vmem:[%s1322_s22 + $0x1f8] sm:$0xff]  ;;  %s1103_s22 = sshll.u32 (%p1292_p5), %s869_s21, 3 }
  0xd1   : > { %770 = vxpose.xlu0.b32.cont [7/16] %v658_v27, 128  ;;  %v335_v27 = vmul.f32 %v1317_v0, %v269_v20  ;;  %v662_v43 = vmul.f32 %v1341_v9, %v594_v34  ;;  %v1166_v20 = vld [vmem:[%s1884_s1] ss:$0 sm:$0xff]  ;;  %s1734_s25 = scalar_lea.vmem (%p1292_p5), %s1886_s3, %s1103_s22 }
  0xd2   : > { %v338_v21 = vmul.f32 %v1166_v20, %v272_v14  ;;  %v339_v31 = vmul.f32 %v1166_v20, %v273_v26 }
  0xd3   : > { %v401_v35 = vadd.f32 %v1327_v1, %v335_v27 }
  0xd4   : > { %713 = vxpose.xlu1.b32.cont [14/16] %v633_v29, 128 }
  0xd5   : > { %v686_v45 = vpop.trf.xlu0  ;;  %vm465_vm7 = vcmp.ge.f32.partialorder %v401_v35, 0.0 }
  0xd6   : > { %804 = vst [vmem:[%s1544_s12 + $0x40] sm:$0xff] %v686_v45  ;;  %744 = vxpose.xlu2.b32.cont [13/16] %v648_v36, 128  ;;  %v531_v45 = vmul.f32 %v1335_v5, %v401_v35 }
  0xd8   : > { %v595_v53 = vsel %vm465_vm7, %v401_v35, %v531_v45 }
  0xd9   : > { %771 = vxpose.xlu0.b32.cont [8/16] %v659_v46, 128  ;;  %v336_v46 = vmul.f32 %v1317_v0, %v270_v39  ;;  %v663_v62 = vmul.f32 %v1341_v9, %v595_v53 }
  0xdb   : > { %v402_v54 = vadd.f32 %v1327_v1, %v336_v46 }
  0xdc   : > { %714 = vxpose.xlu1.b32.cont [15/16] %v634_v48, 128 }
  0xdd   : > { %v687_v2 = vpop.trf.xlu0  ;;  %vm466_vm10 = vcmp.ge.f32.partialorder %v402_v54, 0.0 }
  0xde   : > { %808 = vst [vmem:[%s1544_s12 + $0x60] sm:$0xff] %v687_v2  ;;  %745 = vxpose.xlu2.b32.cont [14/16] %v649_v55, 128  ;;  %v532_v2 = vmul.f32 %v1335_v5, %v402_v54 }
  0xe0   : > { %v596_v10 = vsel %vm466_vm10, %v402_v54, %v532_v2 }
  0xe1   : > { %772 = vxpose.xlu0.b32.cont [9/16] %v660_v3, 128  ;;  %v337_v3 = vmul.f32 %v1317_v0, %v271_v58  ;;  %v664_v17 = vmul.f32 %v1341_v9, %v596_v10  ;;  %v519_v0 = vmul.f32 %v1335_v5, %v389_v18 }
  0xe3   : > { %v403_v11 = vadd.f32 %v1327_v1, %v337_v3  ;;  %v583_v22 = vsel %vm453_vm13, %v389_v18, %v519_v0  ;;  %v1167_v1 = vld [vmem:[%s1884_s1 + $0x1] ss:$0 sm:$0xff] }
  0xe4   : > { %715 = vxpose.xlu1.b32.end [16/16] %v635_v6, 128  ;;  %v651_v25 = vmul.f32 %v1341_v9, %v583_v22  ;;  %v405_v33 = vadd.f32 %v1167_v1, %v339_v31 }
  0xe5   : > { %v688_v23 = vpop.trf.xlu0  ;;  %v533_v19 = vmul.f32 %v1335_v5, %v403_v11  ;;  %vm467_vm12 = vcmp.ge.f32.partialorder %v403_v11, 0.0  ;;  %v1169_v5 = vld [vmem:[%s1884_s1 + $0x2] ss:$0 sm:$0xff] }
  0xe6   : > { %812 = vst [vmem:[%s1544_s12 + $0x80] sm:$0xff] %v688_v23  ;;  %746 = vxpose.xlu2.b32.cont [15/16] %v650_v12, 128  ;;  %v535_v35 = vmul.f32 %v1169_v5, %v405_v33  ;;  %vm469_vm15 = vcmp.ge.f32.partialorder %v405_v33, 0.0 }
  0xe7   : > { %v597_v23 = vsel %vm467_vm12, %v403_v11, %v533_v19 }
  0xe8   : > { %v665_v29 = vmul.f32 %v1168_v28, %v597_v23  ;;  %v599_v36 = vsel %vm469_vm15, %v405_v33, %v535_v35  ;;  %v892_v33 = vld [vmem:[%s1544_s12 + $0x20] sm:$0xff] (%p1292_p5) }
  0xe9   : > { %773 = vxpose.xlu0.b32.cont [10/16] %v661_v24, 128  ;;  %v404_v24 = vadd.f32 %v1167_v1, %v338_v21  ;;  %v667_v38 = vmul.f32 %v1168_v28, %v599_v36  ;;  %893 = vst [vmem:[%s1734_s25 + $0x40] sm:$0xff] (%p1292_p5), %v892_v33  ;;  %v900_v36 = vld [vmem:[%s1544_s12 + $0x40] sm:$0xff] (%p1292_p5) }
  0xea   : > { %901 = vst [vmem:[%s1734_s25 + $0x80] sm:$0xff] (%p1292_p5), %v900_v36 }
  0xeb   : > { %v534_v30 = vmul.f32 %v1169_v5, %v404_v24  ;;  %vm468_vm14 = vcmp.ge.f32.partialorder %v404_v24, 0.0  ;;  %v884_v5 = vld [vmem:[%s1544_s12] sm:$0xff] (%p1292_p5) }
  0xec   : > { %885 = vst [vmem:[%s1734_s25] sm:$0xff] (%p1292_p5), %v884_v5 }
  0xed   : > { %v689_v42 = vpop.trf.xlu0  ;;  %v598_v32 = vsel %vm468_vm14, %v404_v24, %v534_v30 }
  0xee   : > { %816 = vst [vmem:[%s1544_s12 + $0xa0] sm:$0xff] %v689_v42  ;;  %747 = vxpose.xlu2.b32.end [16/16] %v651_v25, 128  ;;  %v666_v34 = vmul.f32 %v1168_v28, %v598_v32 }
  0xf1   : > { %774 = vxpose.xlu0.b32.cont [11/16] %v662_v43, 128 }
  0xf5   : > { %v690_v61 = vpop.trf.xlu0 }
  0xf6   : > { %820 = vst [vmem:[%s1544_s12 + $0xc0] sm:$0xff] %v690_v61 }
  0xf9   : > { %775 = vxpose.xlu0.b32.cont [12/16] %v663_v62, 128 }
  0xfd   : > { %v691_v16 = vpop.trf.xlu0 }
  0xfe   : > { %824 = vst [vmem:[%s1544_s12 + $0xe0] sm:$0xff] %v691_v16 }
 0x101   : > { %776 = vxpose.xlu0.b32.cont [13/16] %v664_v17, 128 }
 0x105   : > { %v692_v27 = vpop.trf.xlu0 }
 0x106   : > { %828 = vst [vmem:[%s1544_s12 + $0x100] sm:$0xff] %v692_v27 }
 0x109   : > { %777 = vxpose.xlu0.b32.cont [14/16] %v665_v29, 128 }
 0x10d   : > { %v693_v9 = vpop.trf.xlu0 }
 0x10e   : > { %832 = vst [vmem:[%s1544_s12 + $0x120] sm:$0xff] %v693_v9 }
 0x10f   : > { %v748_v41 = vpop.trf.xlu2 }
 0x110   : > { %v716_v42 = vpop.trf.xlu1  ;;  %798 = vst [vmem:[%s1544_s12 + $0x10] sm:$0xff] %v748_v41 }
 0x111   : > { %778 = vxpose.xlu0.b32.cont [15/16] %v666_v34, 128  ;;  %797 = vst [vmem:[%s1544_s12 + $0x8] sm:$0xff] %v716_v42 }
 0x115   : > { %v694_v37 = vpop.trf.xlu0 }
 0x116   : > { %836 = vst [vmem:[%s1544_s12 + $0x140] sm:$0xff] %v694_v37 }
 0x117   : > { %v749_v44 = vpop.trf.xlu2  ;;  %v888_v31 = vld [vmem:[%s1544_s12 + $0x10] sm:$0xff] (%p1292_p5) }
 0x118   : > { %v717_v45 = vpop.trf.xlu1  ;;  %802 = vst [vmem:[%s1544_s12 + $0x30] sm:$0xff] %v749_v44  ;;  %v886_v30 = vld [vmem:[%s1544_s12 + $0x8] sm:$0xff] (%p1292_p5)  ;;  %v916_v44 = vld [vmem:[%s1544_s12 + $0x80] sm:$0xff] (%p1292_p5) }
 0x119   : > { %779 = vxpose.xlu0.b32.end [16/16] %v667_v38, 128  ;;  %801 = vst [vmem:[%s1544_s12 + $0x28] sm:$0xff] %v717_v45 }
 0x11a   : > { %887 = vst [vmem:[%s1734_s25 + $0x8] sm:$0xff] (%p1292_p5), %v886_v30 }
 0x11b   : > { %889 = vst [vmem:[%s1734_s25 + $0x10] sm:$0xff] (%p1292_p5), %v888_v31 }
 0x11c   : > { %917 = vst [vmem:[%s1734_s25 + $0x100] sm:$0xff] (%p1292_p5), %v916_v44 }
 0x11d   : > { %v695_v39 = vpop.trf.xlu0 }
 0x11e   : > { %840 = vst [vmem:[%s1544_s12 + $0x160] sm:$0xff] %v695_v39 }
 0x11f   : > { %v750_v47 = vpop.trf.xlu2  ;;  %v896_v34 = vld [vmem:[%s1544_s12 + $0x30] sm:$0xff] (%p1292_p5) }
 0x120   : > { %v718_v48 = vpop.trf.xlu1  ;;  %806 = vst [vmem:[%s1544_s12 + $0x50] sm:$0xff] %v750_v47  ;;  %v894_v9 = vld [vmem:[%s1544_s12 + $0x28] sm:$0xff] (%p1292_p5) }
 0x121   : > { %805 = vst [vmem:[%s1544_s12 + $0x48] sm:$0xff] %v718_v48  ;;  %v924_v48 = vld [vmem:[%s1544_s12 + $0xa0] sm:$0xff] (%p1292_p5) }
 0x122   : > { %895 = vst [vmem:[%s1734_s25 + $0x48] sm:$0xff] (%p1292_p5), %v894_v9 }
 0x123   : > { %897 = vst [vmem:[%s1734_s25 + $0x50] sm:$0xff] (%p1292_p5), %v896_v34 }
 0x124   : > { %925 = vst [vmem:[%s1734_s25 + $0x140] sm:$0xff] (%p1292_p5), %v924_v48 }
 0x125   : > { %v696_v40 = vpop.trf.xlu0 }
 0x126   : > { %844 = vst [vmem:[%s1544_s12 + $0x180] sm:$0xff] %v696_v40  ;;  %v908_v40 = vld [vmem:[%s1544_s12 + $0x60] sm:$0xff] (%p1292_p5) }
 0x127   : > { %v751_v50 = vpop.trf.xlu2  ;;  %v904_v38 = vld [vmem:[%s1544_s12 + $0x50] sm:$0xff] (%p1292_p5)  ;;  %909 = vst [vmem:[%s1734_s25 + $0xc0] sm:$0xff] (%p1292_p5), %v908_v40 }
 0x128   : > { %v719_v51 = vpop.trf.xlu1  ;;  %810 = vst [vmem:[%s1544_s12 + $0x70] sm:$0xff] %v751_v50  ;;  %v902_v37 = vld [vmem:[%s1544_s12 + $0x48] sm:$0xff] (%p1292_p5) }
 0x129   : > { %809 = vst [vmem:[%s1544_s12 + $0x68] sm:$0xff] %v719_v51 }
 0x12a   : > { %903 = vst [vmem:[%s1734_s25 + $0x88] sm:$0xff] (%p1292_p5), %v902_v37 }
 0x12b   : > { %905 = vst [vmem:[%s1734_s25 + $0x90] sm:$0xff] (%p1292_p5), %v904_v38 }
 0x12d   : > { %v697_v43 = vpop.trf.xlu0 }
 0x12e   : > { %848 = vst [vmem:[%s1544_s12 + $0x1a0] sm:$0xff] %v697_v43 }
 0x12f   : > { %v752_v53 = vpop.trf.xlu2  ;;  %v912_v42 = vld [vmem:[%s1544_s12 + $0x70] sm:$0xff] (%p1292_p5) }
 0x130   : > { %v720_v54 = vpop.trf.xlu1  ;;  %814 = vst [vmem:[%s1544_s12 + $0x90] sm:$0xff] %v752_v53  ;;  %v910_v41 = vld [vmem:[%s1544_s12 + $0x68] sm:$0xff] (%p1292_p5) }
 0x131   : > { %813 = vst [vmem:[%s1544_s12 + $0x88] sm:$0xff] %v720_v54 }
 0x132   : > { %911 = vst [vmem:[%s1734_s25 + $0xc8] sm:$0xff] (%p1292_p5), %v910_v41 }
 0x133   : > { %913 = vst [vmem:[%s1734_s25 + $0xd0] sm:$0xff] (%p1292_p5), %v912_v42 }
 0x135   : > { %v698_v46 = vpop.trf.xlu0 }
 0x136   : > { %852 = vst [vmem:[%s1544_s12 + $0x1c0] sm:$0xff] %v698_v46 }
 0x137   : > { %v753_v56 = vpop.trf.xlu2  ;;  %v920_v46 = vld [vmem:[%s1544_s12 + $0x90] sm:$0xff] (%p1292_p5) }
 0x138   : > { %v721_v57 = vpop.trf.xlu1  ;;  %818 = vst [vmem:[%s1544_s12 + $0xb0] sm:$0xff] %v753_v56  ;;  %v918_v45 = vld [vmem:[%s1544_s12 + $0x88] sm:$0xff] (%p1292_p5)  ;;  %v940_v56 = vld [vmem:[%s1544_s12 + $0xe0] sm:$0xff] (%p1292_p5) }
 0x139   : > { %817 = vst [vmem:[%s1544_s12 + $0xa8] sm:$0xff] %v721_v57 }
 0x13a   : > { %919 = vst [vmem:[%s1734_s25 + $0x108] sm:$0xff] (%p1292_p5), %v918_v45 }
 0x13b   : > { %921 = vst [vmem:[%s1734_s25 + $0x110] sm:$0xff] (%p1292_p5), %v920_v46 }
 0x13c   : > { %941 = vst [vmem:[%s1734_s25 + $0x1c0] sm:$0xff] (%p1292_p5), %v940_v56 }
 0x13d   : > { %v699_v49 = vpop.trf.xlu0 }
 0x13e   : > { %856 = vst [vmem:[%s1544_s12 + $0x1e0] sm:$0xff] %v699_v49 }
 0x13f   : > { %v754_v59 = vpop.trf.xlu2  ;;  %v928_v50 = vld [vmem:[%s1544_s12 + $0xb0] sm:$0xff] (%p1292_p5) }
 0x140   : > { %v722_v60 = vpop.trf.xlu1  ;;  %822 = vst [vmem:[%s1544_s12 + $0xd0] sm:$0xff] %v754_v59  ;;  %v926_v49 = vld [vmem:[%s1544_s12 + $0xa8] sm:$0xff] (%p1292_p5) }
 0x141   : > { %821 = vst [vmem:[%s1544_s12 + $0xc8] sm:$0xff] %v722_v60  ;;  %v948_v60 = vld [vmem:[%s1544_s12 + $0x100] sm:$0xff] (%p1292_p5) }
 0x142   : > { %927 = vst [vmem:[%s1734_s25 + $0x148] sm:$0xff] (%p1292_p5), %v926_v49 }
 0x143   : > { %929 = vst [vmem:[%s1734_s25 + $0x150] sm:$0xff] (%p1292_p5), %v928_v50 }
 0x144   : > { %949 = vst [vmem:[%s1734_s25 + $0x200] sm:$0xff] (%p1292_p5), %v948_v60 }
 0x145   : > { %v780_v52 = vpop.trf.xlu0 }
 0x146   : > { %799 = vst [vmem:[%s1544_s12 + $0x18] sm:$0xff] %v780_v52  ;;  %v932_v52 = vld [vmem:[%s1544_s12 + $0xc0] sm:$0xff] (%p1292_p5) }
 0x147   : > { %v755_v62 = vpop.trf.xlu2  ;;  %v936_v54 = vld [vmem:[%s1544_s12 + $0xd0] sm:$0xff] (%p1292_p5)  ;;  %933 = vst [vmem:[%s1734_s25 + $0x180] sm:$0xff] (%p1292_p5), %v932_v52 }
 0x148   : > { %v723_v63 = vpop.trf.xlu1  ;;  %826 = vst [vmem:[%s1544_s12 + $0xf0] sm:$0xff] %v755_v62  ;;  %v934_v53 = vld [vmem:[%s1544_s12 + $0xc8] sm:$0xff] (%p1292_p5) }
 0x149   : > { %825 = vst [vmem:[%s1544_s12 + $0xe8] sm:$0xff] %v723_v63 }
 0x14a   : > { %935 = vst [vmem:[%s1734_s25 + $0x188] sm:$0xff] (%p1292_p5), %v934_v53 }
 0x14b   : > { %937 = vst [vmem:[%s1734_s25 + $0x190] sm:$0xff] (%p1292_p5), %v936_v54 }
 0x14d   : > { %v781_v55 = vpop.trf.xlu0  ;;  %v890_v32 = vld [vmem:[%s1544_s12 + $0x18] sm:$0xff] (%p1292_p5) }
 0x14e   : > { %803 = vst [vmem:[%s1544_s12 + $0x38] sm:$0xff] %v781_v55 }
 0x14f   : > { %v756_v3 = vpop.trf.xlu2  ;;  %891 = vst [vmem:[%s1734_s25 + $0x18] sm:$0xff] (%p1292_p5), %v890_v32 }
 0x150   : > { %v724_v4 = vpop.trf.xlu1  ;;  %830 = vst [vmem:[%s1544_s12 + $0x110] sm:$0xff] %v756_v3  ;;  %v942_v57 = vld [vmem:[%s1544_s12 + $0xe8] sm:$0xff] (%p1292_p5) }
 0x151   : > { %829 = vst [vmem:[%s1544_s12 + $0x108] sm:$0xff] %v724_v4 }
 0x152   : > { %943 = vst [vmem:[%s1734_s25 + $0x1c8] sm:$0xff] (%p1292_p5), %v942_v57 }
 0x155   : > { %v782_v58 = vpop.trf.xlu0  ;;  %v898_v35 = vld [vmem:[%s1544_s12 + $0x38] sm:$0xff] (%p1292_p5) }
 0x156   : > { %807 = vst [vmem:[%s1544_s12 + $0x58] sm:$0xff] %v782_v58  ;;  %v944_v58 = vld [vmem:[%s1544_s12 + $0xf0] sm:$0xff] (%p1292_p5) }
 0x157   : > { %v757_v7 = vpop.trf.xlu2  ;;  %899 = vst [vmem:[%s1734_s25 + $0x58] sm:$0xff] (%p1292_p5), %v898_v35  ;;  %v952_v62 = vld [vmem:[%s1544_s12 + $0x110] sm:$0xff] (%p1292_p5) }
 0x158   : > { %v725_v8 = vpop.trf.xlu1  ;;  %834 = vst [vmem:[%s1544_s12 + $0x130] sm:$0xff] %v757_v7  ;;  %v964_v7 = vld [vmem:[%s1544_s12 + $0x140] sm:$0xff] (%p1292_p5) }
 0x159   : > { %833 = vst [vmem:[%s1544_s12 + $0x128] sm:$0xff] %v725_v8 }
 0x15a   : > { %945 = vst [vmem:[%s1734_s25 + $0x1d0] sm:$0xff] (%p1292_p5), %v944_v58 }
 0x15b   : > { %953 = vst [vmem:[%s1734_s25 + $0x210] sm:$0xff] (%p1292_p5), %v952_v62 }
 0x15c   : > { %965 = vst [vmem:[%s1734_s25 + $0x280] sm:$0xff] (%p1292_p5), %v964_v7 }
 0x15d   : > { %v783_v61 = vpop.trf.xlu0  ;;  %v906_v39 = vld [vmem:[%s1544_s12 + $0x58] sm:$0xff] (%p1292_p5) }
 0x15e   : > { %811 = vst [vmem:[%s1544_s12 + $0x78] sm:$0xff] %v783_v61  ;;  %v950_v61 = vld [vmem:[%s1544_s12 + $0x108] sm:$0xff] (%p1292_p5) }
 0x15f   : > { %v758_v11 = vpop.trf.xlu2  ;;  %907 = vst [vmem:[%s1734_s25 + $0x98] sm:$0xff] (%p1292_p5), %v906_v39  ;;  %v960_v4 = vld [vmem:[%s1544_s12 + $0x130] sm:$0xff] (%p1292_p5) }
 0x160   : > { %v726_v12 = vpop.trf.xlu1  ;;  %838 = vst [vmem:[%s1544_s12 + $0x150] sm:$0xff] %v758_v11  ;;  %v958_v3 = vld [vmem:[%s1544_s12 + $0x128] sm:$0xff] (%p1292_p5) }
 0x161   : > { %837 = vst [vmem:[%s1544_s12 + $0x148] sm:$0xff] %v726_v12  ;;  %v972_v12 = vld [vmem:[%s1544_s12 + $0x160] sm:$0xff] (%p1292_p5) }
 0x162   : > { %951 = vst [vmem:[%s1734_s25 + $0x208] sm:$0xff] (%p1292_p5), %v950_v61 }
 0x163   : > { %959 = vst [vmem:[%s1734_s25 + $0x248] sm:$0xff] (%p1292_p5), %v958_v3 }
 0x164   : > { %961 = vst [vmem:[%s1734_s25 + $0x250] sm:$0xff] (%p1292_p5), %v960_v4 }
 0x165   : > { %v784_v2 = vpop.trf.xlu0  ;;  %v914_v43 = vld [vmem:[%s1544_s12 + $0x78] sm:$0xff] (%p1292_p5)  ;;  %973 = vst [vmem:[%s1734_s25 + $0x2c0] sm:$0xff] (%p1292_p5), %v972_v12 }
 0x166   : > { %815 = vst [vmem:[%s1544_s12 + $0x98] sm:$0xff] %v784_v2  ;;  %v956_v2 = vld [vmem:[%s1544_s12 + $0x120] sm:$0xff] (%p1292_p5) }
 0x167   : > { %v759_v14 = vpop.trf.xlu2  ;;  %915 = vst [vmem:[%s1734_s25 + $0xd8] sm:$0xff] (%p1292_p5), %v914_v43 }
 0x168   : > { %v727_v15 = vpop.trf.xlu1  ;;  %842 = vst [vmem:[%s1544_s12 + $0x170] sm:$0xff] %v759_v14  ;;  %v966_v8 = vld [vmem:[%s1544_s12 + $0x148] sm:$0xff] (%p1292_p5) }
 0x169   : > { %841 = vst [vmem:[%s1544_s12 + $0x168] sm:$0xff] %v727_v15 }
 0x16a   : > { %957 = vst [vmem:[%s1734_s25 + $0x240] sm:$0xff] (%p1292_p5), %v956_v2 }
 0x16b   : > { %967 = vst [vmem:[%s1734_s25 + $0x288] sm:$0xff] (%p1292_p5), %v966_v8 }
 0x16d   : > { %v785_v6 = vpop.trf.xlu0  ;;  %v922_v47 = vld [vmem:[%s1544_s12 + $0x98] sm:$0xff] (%p1292_p5) }
 0x16e   : > { %819 = vst [vmem:[%s1544_s12 + $0xb8] sm:$0xff] %v785_v6 }
 0x16f   : > { %v760_v17 = vpop.trf.xlu2  ;;  %923 = vst [vmem:[%s1734_s25 + $0x118] sm:$0xff] (%p1292_p5), %v922_v47  ;;  %v976_v14 = vld [vmem:[%s1544_s12 + $0x170] sm:$0xff] (%p1292_p5) }
 0x170   : > { %v728_v18 = vpop.trf.xlu1  ;;  %846 = vst [vmem:[%s1544_s12 + $0x190] sm:$0xff] %v760_v17 }
 0x171   : > { %845 = vst [vmem:[%s1544_s12 + $0x188] sm:$0xff] %v728_v18 }
 0x172   : > { %977 = vst [vmem:[%s1734_s25 + $0x2d0] sm:$0xff] (%p1292_p5), %v976_v14 }
 0x175   : > { %v786_v10 = vpop.trf.xlu0  ;;  %v930_v51 = vld [vmem:[%s1544_s12 + $0xb8] sm:$0xff] (%p1292_p5) }
 0x176   : > { %823 = vst [vmem:[%s1544_s12 + $0xd8] sm:$0xff] %v786_v10  ;;  %v968_v10 = vld [vmem:[%s1544_s12 + $0x150] sm:$0xff] (%p1292_p5) }
 0x177   : > { %v761_v20 = vpop.trf.xlu2  ;;  %931 = vst [vmem:[%s1734_s25 + $0x158] sm:$0xff] (%p1292_p5), %v930_v51  ;;  %v984_v18 = vld [vmem:[%s1544_s12 + $0x190] sm:$0xff] (%p1292_p5) }
 0x178   : > { %v729_v21 = vpop.trf.xlu1  ;;  %850 = vst [vmem:[%s1544_s12 + $0x1b0] sm:$0xff] %v761_v20  ;;  %v982_v17 = vld [vmem:[%s1544_s12 + $0x188] sm:$0xff] (%p1292_p5)  ;;  %v988_v20 = vld [vmem:[%s1544_s12 + $0x1a0] sm:$0xff] (%p1292_p5) }
 0x179   : > { %849 = vst [vmem:[%s1544_s12 + $0x1a8] sm:$0xff] %v729_v21 }
 0x17a   : > { %969 = vst [vmem:[%s1734_s25 + $0x290] sm:$0xff] (%p1292_p5), %v968_v10 }
 0x17b   : > { %983 = vst [vmem:[%s1734_s25 + $0x308] sm:$0xff] (%p1292_p5), %v982_v17 }
 0x17c   : > { %985 = vst [vmem:[%s1734_s25 + $0x310] sm:$0xff] (%p1292_p5), %v984_v18 }
 0x17d   : > { %v787_v13 = vpop.trf.xlu0  ;;  %v938_v55 = vld [vmem:[%s1544_s12 + $0xd8] sm:$0xff] (%p1292_p5)  ;;  %989 = vst [vmem:[%s1734_s25 + $0x340] sm:$0xff] (%p1292_p5), %v988_v20 }
 0x17e   : > { %827 = vst [vmem:[%s1544_s12 + $0xf8] sm:$0xff] %v787_v13  ;;  %v974_v13 = vld [vmem:[%s1544_s12 + $0x168] sm:$0xff] (%p1292_p5) }
 0x17f   : > { %v762_v22 = vpop.trf.xlu2  ;;  %939 = vst [vmem:[%s1734_s25 + $0x198] sm:$0xff] (%p1292_p5), %v938_v55 }
 0x180   : > { %v730_v23 = vpop.trf.xlu1  ;;  %854 = vst [vmem:[%s1544_s12 + $0x1d0] sm:$0xff] %v762_v22  ;;  %v990_v21 = vld [vmem:[%s1544_s12 + $0x1a8] sm:$0xff] (%p1292_p5) }
 0x181   : > { %853 = vst [vmem:[%s1544_s12 + $0x1c8] sm:$0xff] %v730_v23  ;;  %v996_v23 = vld [vmem:[%s1544_s12 + $0x1c0] sm:$0xff] (%p1292_p5) }
 0x182   : > { %975 = vst [vmem:[%s1734_s25 + $0x2c8] sm:$0xff] (%p1292_p5), %v974_v13 }
 0x183   : > { %991 = vst [vmem:[%s1734_s25 + $0x348] sm:$0xff] (%p1292_p5), %v990_v21 }
 0x184   : > { %997 = vst [vmem:[%s1734_s25 + $0x380] sm:$0xff] (%p1292_p5), %v996_v23 }
 0x185   : > { %v788_v16 = vpop.trf.xlu0  ;;  %v946_v59 = vld [vmem:[%s1544_s12 + $0xf8] sm:$0xff] (%p1292_p5) }
 0x186   : > { %831 = vst [vmem:[%s1544_s12 + $0x118] sm:$0xff] %v788_v16  ;;  %v980_v16 = vld [vmem:[%s1544_s12 + $0x180] sm:$0xff] (%p1292_p5) }
 0x187   : > { %v763_v24 = vpop.trf.xlu2  ;;  %947 = vst [vmem:[%s1734_s25 + $0x1d8] sm:$0xff] (%p1292_p5), %v946_v59 }
 0x188   : > { %v731_v25 = vpop.trf.xlu1  ;;  %858 = vst [vmem:[%s1544_s12 + $0x1f0] sm:$0xff] %v763_v24  ;;  %v1000_v24 = vld [vmem:[%s1544_s12 + $0x1d0] sm:$0xff] (%p1292_p5) }
 0x189   : > { %857 = vst [vmem:[%s1544_s12 + $0x1e8] sm:$0xff] %v731_v25 }
 0x18a   : > { %981 = vst [vmem:[%s1734_s25 + $0x300] sm:$0xff] (%p1292_p5), %v980_v16 }
 0x18b   : > { %1001 = vst [vmem:[%s1734_s25 + $0x390] sm:$0xff] (%p1292_p5), %v1000_v24 }
 0x18d   : > { %v789_v19 = vpop.trf.xlu0  ;;  %v954_v63 = vld [vmem:[%s1544_s12 + $0x118] sm:$0xff] (%p1292_p5) }
 0x18e   : > { %835 = vst [vmem:[%s1544_s12 + $0x138] sm:$0xff] %v789_v19 }
 0x18f   : > { %955 = vst [vmem:[%s1734_s25 + $0x218] sm:$0xff] (%p1292_p5), %v954_v63 }
 0x195   : > { %v790_v0 = vpop.trf.xlu0  ;;  %v962_v6 = vld [vmem:[%s1544_s12 + $0x138] sm:$0xff] (%p1292_p5) }
 0x196   : > { %839 = vst [vmem:[%s1544_s12 + $0x158] sm:$0xff] %v790_v0  ;;  %v992_v0 = vld [vmem:[%s1544_s12 + $0x1b0] sm:$0xff] (%p1292_p5) }
 0x197   : > { %963 = vst [vmem:[%s1734_s25 + $0x258] sm:$0xff] (%p1292_p5), %v962_v6 }
 0x198   : > { %993 = vst [vmem:[%s1734_s25 + $0x350] sm:$0xff] (%p1292_p5), %v992_v0 }
 0x19d   : > { %v791_v1 = vpop.trf.xlu0  ;;  %v970_v11 = vld [vmem:[%s1544_s12 + $0x158] sm:$0xff] (%p1292_p5) }
 0x19e   : > { %843 = vst [vmem:[%s1544_s12 + $0x178] sm:$0xff] %v791_v1  ;;  %v998_v1 = vld [vmem:[%s1544_s12 + $0x1c8] sm:$0xff] (%p1292_p5) }
 0x19f   : > { %971 = vst [vmem:[%s1734_s25 + $0x298] sm:$0xff] (%p1292_p5), %v970_v11 }
 0x1a0   : > { %999 = vst [vmem:[%s1734_s25 + $0x388] sm:$0xff] (%p1292_p5), %v998_v1 }
 0x1a5   : > { %v792_v26 = vpop.trf.xlu0  ;;  %v978_v15 = vld [vmem:[%s1544_s12 + $0x178] sm:$0xff] (%p1292_p5) }
 0x1a6   : > { %847 = vst [vmem:[%s1544_s12 + $0x198] sm:$0xff] %v792_v26  ;;  %v1004_v26 = vld [vmem:[%s1544_s12 + $0x1e0] sm:$0xff] (%p1292_p5) }
 0x1a7   : > { %979 = vst [vmem:[%s1734_s25 + $0x2d8] sm:$0xff] (%p1292_p5), %v978_v15 }
 0x1a8   : > { %1005 = vst [vmem:[%s1734_s25 + $0x3c0] sm:$0xff] (%p1292_p5), %v1004_v26 }
 0x1ad   : > { %v793_v27 = vpop.trf.xlu0  ;;  %v986_v19 = vld [vmem:[%s1544_s12 + $0x198] sm:$0xff] (%p1292_p5) }
 0x1ae   : > { %851 = vst [vmem:[%s1544_s12 + $0x1b8] sm:$0xff] %v793_v27  ;;  %v1006_v27 = vld [vmem:[%s1544_s12 + $0x1e8] sm:$0xff] (%p1292_p5) }
 0x1af   : > { %987 = vst [vmem:[%s1734_s25 + $0x318] sm:$0xff] (%p1292_p5), %v986_v19 }
 0x1b0   : > { %1007 = vst [vmem:[%s1734_s25 + $0x3c8] sm:$0xff] (%p1292_p5), %v1006_v27 }
 0x1b5   : > { %v794_v28 = vpop.trf.xlu0  ;;  %v994_v22 = vld [vmem:[%s1544_s12 + $0x1b8] sm:$0xff] (%p1292_p5) }
 0x1b6   : > { %855 = vst [vmem:[%s1544_s12 + $0x1d8] sm:$0xff] %v794_v28  ;;  %v1008_v28 = vld [vmem:[%s1544_s12 + $0x1f0] sm:$0xff] (%p1292_p5) }
 0x1b7   : > { %995 = vst [vmem:[%s1734_s25 + $0x358] sm:$0xff] (%p1292_p5), %v994_v22 }
 0x1b8   : > { %1009 = vst [vmem:[%s1734_s25 + $0x3d0] sm:$0xff] (%p1292_p5), %v1008_v28 }
 0x1ba   : > { %866 = sbr.rel (!%p1292_p5) target bundleno = 455 (0x1c7), region = 36 }
 0x1bd   : > { %v795_v29 = vpop.trf.xlu0  ;;  %v1002_v25 = vld [vmem:[%s1544_s12 + $0x1d8] sm:$0xff] (%p1292_p5) }
 0x1be   : > { %859 = vst [vmem:[%s1544_s12 + $0x1f8] sm:$0xff] %v795_v29 }
 0x1bf   : > { %1003 = vst [vmem:[%s1734_s25 + $0x398] sm:$0xff] %v1002_v25 }
 0x1c5   : > { %v1010_v29 = vld [vmem:[%s1544_s12 + $0x1f8] sm:$0xff] }
 0x1c6   : > { %1011 = vst [vmem:[%s1734_s25 + $0x3d8] sm:$0xff] %v1010_v29 }
 0x1c7 PF: > { %s13_s18 = sadd.s32 1, %s1224_s18   ;;  %s1888_s12 = smov %s1204_s13 }
 0x1c8   : > { %p10_p11 = scmp.ge.s32.totalorder %s13_s18, 6   ;;  %s1889_s13 = smov %s1303_s27 }
 0x1c9   : > { %s1890_s14 = smov %s1216_s16  ;;  %s1891_s15 = smov %s1220_s17 }
 0x1ca   : > { %s1892_s16 = smov %s1895_s19  ;;  %s1893_s17 = smov %s1899_s20 }
 0x1cb   :  { %12 = sbr.rel (!%p10_p11) target bundleno = 4 (0x4), region = 88 }

</bundles_post_ra>
